<compile_context>
chip_gen: v7x
topology: tpu7x:2x2x1
jax: 0.10.0
libtpu: 0.0.40
codegen_flags: <defaults>
</compile_context>

<pallas_src>
import jax
import jax.numpy as jnp
import numpy as np
from jax import lax
from jax.experimental import pallas as pl
from jax.experimental.pallas import tpu as pltpu


# ----------------------------------------------------------------------------
# In-kernel helpers (trace-time Python, whole-array ops only)
# ----------------------------------------------------------------------------
def _maxpool3x3_s2_p1(x):
    """Vectorized nn.MaxPool2d(3, stride=2, padding=1) on an NHWC value.

    Separable: row-max over {2i-1, 2i, 2i+1} then col-max over {2j-1, 2j, 2j+1}.
    -inf padding (never wins), stride-2 subsample done with a pair reshape
    (no strided slices, no per-row loops).
    """
    nb, H, W, c = x.shape
    Hp = (H - 1) // 2 + 1
    Wp = (W - 1) // 2 + 1
    neg = jnp.array(-jnp.inf, x.dtype)

    # --- rows ---
    pad_top = jnp.full((nb, 1, W, c), neg, x.dtype)
    pad_bot = jnp.full((nb, 2 * Hp + 1 - H, W, c), neg, x.dtype)
    xp = jnp.concatenate([pad_top, x, pad_bot], axis=1)              # (nb, 2Hp+2, W, c)
    a = jnp.max(xp[:, 0:2 * Hp].reshape(nb, Hp, 2, W, c), axis=2)    # max(x[2i-1], x[2i])
    b = xp[:, 2:2 * Hp + 2].reshape(nb, Hp, 2, W, c)[:, :, 0]        # x[2i+1]
    r = jnp.maximum(a, b)                                            # (nb, Hp, W, c)

    # --- cols ---
    pad_l = jnp.full((nb, Hp, 1, c), neg, x.dtype)
    pad_r = jnp.full((nb, Hp, 2 * Wp + 1 - W, c), neg, x.dtype)
    rp = jnp.concatenate([pad_l, r, pad_r], axis=2)                  # (nb, Hp, 2Wp+2, c)
    a = jnp.max(rp[:, :, 0:2 * Wp].reshape(nb, Hp, Wp, 2, c), axis=3)
    b = rp[:, :, 2:2 * Wp + 2].reshape(nb, Hp, Wp, 2, c)[:, :, :, 0]
    return jnp.maximum(a, b)                                         # (nb, Hp, Wp, c)


# ----------------------------------------------------------------------------
# The Pallas kernel: one batch-block per grid step (default = whole batch).
# ----------------------------------------------------------------------------
def extra_label_kernel(x_ref, w1_ref, b1_ref, w2_ref, b2_ref, wfc_ref, bfc_ref,
                       out_ref, hpad_ref):
    x = x_ref[...]                                   # (NB, H, W, Cin)
    nb, H, W, cin = x.shape
    cout = w1_ref.shape[1]
    Hp = (H - 1) // 2 + 1
    Wp = (W - 1) // 2 + 1
    M = nb * Hp * Wp

    # ---- MaxPool 3x3 / stride 2 / pad 1 (vectorized) ----
    p = _maxpool3x3_s2_p1(x)                         # (NB, Hp, Wp, Cin)

    # ---- 1x1 conv (+ folded BN1 scale) + ReLU : one (M, Cin) @ (Cin, Cout) ----
    h = jnp.dot(p.reshape(M, cin), w1_ref[...],
                preferred_element_type=jnp.float32)
    h = jnp.maximum(h + b1_ref[...], 0.0)            # (M, Cout), f32

    # ---- zero-padded feature map for the 3x3 conv (persistent VMEM scratch) ----
    hpad_ref[...] = jnp.zeros_like(hpad_ref)
    hpad_ref[:, 1:1 + Hp, 1:1 + Wp, :] = h.reshape(nb, Hp, Wp, cout)

    # ---- 3x3 conv (pad=1) as ONE im2col matmul with K = 9*Cout ----
    cols = [hpad_ref[:, dh:dh + Hp, dw:dw + Wp, :].reshape(M, cout)
            for dh in range(3) for dw in range(3)]
    im2col = jnp.concatenate(cols, axis=-1)          # (M, 9*Cout)
    g = jnp.dot(im2col, w2_ref[...], preferred_element_type=jnp.float32)
    g = jnp.maximum(g + b2_ref[...], 0.0)            # (M, Cout)

    # ---- global avg pool (1/(Hp*Wp) folded into wfc -> plain sum) + Linear ----
    feat = jnp.sum(g.reshape(nb, Hp * Wp, cout), axis=1)          # (NB, Cout)
    logits = jnp.dot(feat, wfc_ref[...],
                     preferred_element_type=jnp.float32) + bfc_ref[...]
    out_ref[...] = logits.astype(out_ref.dtype)      # (NB, ncls_pad) lane-dense


# ----------------------------------------------------------------------------
# Wrapper: parameter folding + pallas_call
# ----------------------------------------------------------------------------
def extra_label_predict(x_nhwc, kp, batch_block=None):
    n, h, w, cin = x_nhwc.shape
    cout = kp["w1"].shape[1]
    ncls_pad = kp["wfc"].shape[1]
    hp = (h - 1) // 2 + 1
    wp = (w - 1) // 2 + 1

    if batch_block is None:
        batch_block = n          # fuse the whole batch into one grid step
    assert n % batch_block == 0
    nsteps = n // batch_block    # set batch_block = n//2 on v7x to feed both TCs

    out = pl.pallas_call(
        extra_label_kernel,
        out_shape=jax.ShapeDtypeStruct((n, ncls_pad), jnp.float32),
        grid_spec=pltpu.PrefetchScalarGridSpec(
            num_scalar_prefetch=0,
            grid=(nsteps,),
            in_specs=[
                pl.BlockSpec((batch_block, h, w, cin), lambda b: (b, 0, 0, 0)),  # x NHWC
                pl.BlockSpec((cin, cout), lambda b: (0, 0)),            # w1 (BN1 folded)
                pl.BlockSpec((1, cout), lambda b: (0, 0)),              # b1
                pl.BlockSpec((9 * cout, cout), lambda b: (0, 0)),       # w2 im2col (BN2 folded)
                pl.BlockSpec((1, cout), lambda b: (0, 0)),              # b2
                pl.BlockSpec((cout, ncls_pad), lambda b: (0, 0)),       # fc W^T (1/HW folded)
                pl.BlockSpec((1, ncls_pad), lambda b: (0, 0)),          # fc bias
            ],
            out_specs=pl.BlockSpec((batch_block, ncls_pad), lambda b: (b, 0)),
            scratch_shapes=[
                pltpu.VMEM((batch_block, hp + 2, wp + 2, cout), jnp.float32),
            ],
        ),
        compiler_params=pltpu.CompilerParams(
            dimension_semantics=("parallel",)),
    )(x_nhwc, kp["w1"], kp["b1"], kp["w2"], kp["b2"], kp["wfc"], kp["bfc"])
    return out[:, :kp["ncls"]]                        # (N, num_classes)


def init_raw_params(key, in_channels, out_channels, num_classes):
    ks = jax.random.split(key, 12)
    f32 = jnp.float32
    return dict(
        conv1_w=0.2 * jax.random.normal(ks[0], (out_channels, in_channels, 1, 1), f32),
        bn1_gamma=1.0 + 0.1 * jax.random.normal(ks[1], (out_channels,), f32),
        bn1_beta=0.1 * jax.random.normal(ks[2], (out_channels,), f32),
        bn1_mean=0.1 * jax.random.normal(ks[3], (out_channels,), f32),
        bn1_var=0.5 + jax.random.uniform(ks[4], (out_channels,), f32),
        conv2_w=0.1 * jax.random.normal(ks[5], (out_channels, out_channels, 3, 3), f32),
        bn2_gamma=1.0 + 0.1 * jax.random.normal(ks[6], (out_channels,), f32),
        bn2_beta=0.1 * jax.random.normal(ks[7], (out_channels,), f32),
        bn2_mean=0.1 * jax.random.normal(ks[8], (out_channels,), f32),
        bn2_var=0.5 + jax.random.uniform(ks[9], (out_channels,), f32),
        fc_w=0.1 * jax.random.normal(ks[10], (num_classes, out_channels), f32),
        fc_b=0.1 * jax.random.normal(ks[11], (num_classes,), f32),
    )


def fold_params_for_kernel(raw, hp, wp):
    """Fold eval-mode BN into conv weights, 1/(Hp*Wp) into fc, pad classes to 128."""
    eps = 1e-9
    s1 = raw["bn1_gamma"] / jnp.sqrt(raw["bn1_var"] + eps)
    b1 = raw["bn1_beta"] - raw["bn1_mean"] * s1
    s2 = raw["bn2_gamma"] / jnp.sqrt(raw["bn2_var"] + eps)
    b2 = raw["bn2_beta"] - raw["bn2_mean"] * s2
    cout = raw["conv2_w"].shape[0]
    ncls = raw["fc_w"].shape[0]
    ncls_pad = ((ncls + 127) // 128) * 128

    # 1x1 conv: (O, I, 1, 1) -> (I, O), BN1 scale folded per output column.
    w1 = jnp.transpose(raw["conv1_w"][:, :, 0, 0], (1, 0)) * s1[None, :]
    # 3x3 conv: OIHW -> (kh, kw, I, O) -> (9*I, O) im2col layout, BN2 scale folded.
    w2 = jnp.transpose(raw["conv2_w"], (2, 3, 1, 0)).reshape(9 * cout, cout) * s2[None, :]
    # FC: (ncls, cout) -> (cout, ncls_pad), avg-pool scale folded into the weight.
    wfc = jnp.transpose(raw["fc_w"], (1, 0)) / float(hp * wp)
    wfc = jnp.pad(wfc, ((0, 0), (0, ncls_pad - ncls)))
    bfc = jnp.pad(raw["fc_b"], (0, ncls_pad - ncls))[None, :]

    return dict(w1=w1, b1=b1[None, :], w2=w2, b2=b2[None, :],
                wfc=wfc, bfc=bfc, ncls=ncls)


# ----------------------------------------------------------------------------
# Pure-JAX reference (NCHW, mirrors the PyTorch module in eval mode)
# ----------------------------------------------------------------------------
def reference_forward(x_nchw, raw):
    eps = 1e-9
    y = lax.reduce_window(x_nchw, -jnp.inf, lax.max,
                          window_dimensions=(1, 1, 3, 3),
                          window_strides=(1, 1, 2, 2),
                          padding=((0, 0), (0, 0), (1, 1), (1, 1)))

    def conv(z, wgt, pad):
        return lax.conv_general_dilated(z, wgt, (1, 1), [(pad, pad), (pad, pad)],
                                        dimension_numbers=("NCHW", "OIHW", "NCHW"))

    def bn(z, gamma, beta, mean, var):
        s = gamma / jnp.sqrt(var + eps)
        return z * s[None, :, None, None] + (beta - mean * s)[None, :, None, None]

    y = conv(y, raw["conv1_w"], 0)
    y = jnp.maximum(bn(y, raw["bn1_gamma"], raw["bn1_beta"], raw["bn1_mean"], raw["bn1_var"]), 0.0)
    y = conv(y, raw["conv2_w"], 1)
    y = jnp.maximum(bn(y, raw["bn2_gamma"], raw["bn2_beta"], raw["bn2_mean"], raw["bn2_var"]), 0.0)
    y = jnp.mean(y, axis=(2, 3))                            # (N, Cout)
    return y @ raw["fc_w"].T + raw["fc_b"][None, :]


if __name__ == "__main__":
    # Small shapes consistent with the module (NCHW like PyTorch).
    N, C_IN, H, W = 2, 8, 16, 16
    C_OUT, NUM_CLASSES = 16, 32
    HP = (H - 1) // 2 + 1
    WP = (W - 1) // 2 + 1

    key = jax.random.PRNGKey(0)
    kx, kparam = jax.random.split(key)
    x_nchw = jax.random.normal(kx, (N, C_IN, H, W), jnp.float32)

    raw = init_raw_params(kparam, C_IN, C_OUT, NUM_CLASSES)
    kernel_params = fold_params_for_kernel(raw, HP, WP)

    # NCHW -> NHWC for the kernel (channel = lane dim).
    x_nhwc = jnp.transpose(x_nchw, (0, 2, 3, 1))

    out = extra_label_predict(x_nhwc, kernel_params)
    out = jax.block_until_ready(out)

    ref = jax.block_until_ready(reference_forward(x_nchw, raw))

    assert out.shape == (N, NUM_CLASSES), out.shape
    err = float(jnp.max(jnp.abs(out - ref)))
    if not np.isfinite(err) or err > 5e-2:
        raise AssertionError(f"mismatch vs reference: max abs err = {err}")

    print("KERNEL_OK")
</pallas_src>

<mosaic_0001>
module attributes {stable_mosaic.version = 11 : i64} {
  func.func @extra_label_kernel(%arg0: i32, %arg1: memref<2x16x16x8xf32, #tpu.memory_space<vmem>>, %arg2: memref<8x16xf32, #tpu.memory_space<vmem>>, %arg3: memref<1x16xf32, #tpu.memory_space<vmem>>, %arg4: memref<144x16xf32, #tpu.memory_space<vmem>>, %arg5: memref<1x16xf32, #tpu.memory_space<vmem>>, %arg6: memref<16x128xf32, #tpu.memory_space<vmem>>, %arg7: memref<1x128xf32, #tpu.memory_space<vmem>>, %arg8: memref<2x128xf32, #tpu.memory_space<vmem>>, %arg9: memref<2x10x10x16xf32, #tpu.memory_space<vmem>>) attributes {dimension_semantics = [#tpu.dimension_semantics<parallel>], iteration_bounds = array<i64: 1>, scalar_prefetch = 0 : i64, scratch_operands = 1 : i64, tpu.core_type = #tpu.core_type<tc>, window_params = [{transform_indices = @transform_0, window_bounds = array<i64: 2, 16, 16, 8>}, {pipeline_mode = #tpu.pipeline_mode<synchronous>, transform_indices = @transform_1, window_bounds = array<i64: 8, 16>}, {pipeline_mode = #tpu.pipeline_mode<synchronous>, transform_indices = @transform_2, window_bounds = array<i64: 1, 16>}, {pipeline_mode = #tpu.pipeline_mode<synchronous>, transform_indices = @transform_3, window_bounds = array<i64: 144, 16>}, {pipeline_mode = #tpu.pipeline_mode<synchronous>, transform_indices = @transform_4, window_bounds = array<i64: 1, 16>}, {pipeline_mode = #tpu.pipeline_mode<synchronous>, transform_indices = @transform_5, window_bounds = array<i64: 16, 128>}, {pipeline_mode = #tpu.pipeline_mode<synchronous>, transform_indices = @transform_6, window_bounds = array<i64: 1, 128>}, {transform_indices = @transform_7, window_bounds = array<i64: 2, 128>}]} {
    %c0 = arith.constant 0 : index
    %c0_0 = arith.constant 0 : index
    %c0_1 = arith.constant 0 : index
    %c0_2 = arith.constant 0 : index
    %0 = vector.load %arg1[%c0, %c0_0, %c0_1, %c0_2] : memref<2x16x16x8xf32, #tpu.memory_space<vmem>>, vector<2x16x16x8xf32>
    %cst = arith.constant 0xFF800000 : f32
    %1 = vector.broadcast %cst : f32 to vector<2x1x16x8xf32>
    %cst_3 = arith.constant 0xFF800000 : f32
    %2 = vector.broadcast %cst_3 : f32 to vector<2x1x16x8xf32>
    %3 = tpu.concatenate %1, %0, %2 in 1 : vector<2x1x16x8xf32>, vector<2x16x16x8xf32>, vector<2x1x16x8xf32> -> vector<2x18x16x8xf32>
    %4 = vector.extract_strided_slice %3 {offsets = [0, 0, 0, 0], sizes = [2, 16, 16, 8], strides = [1, 1, 1, 1]} : vector<2x18x16x8xf32> to vector<2x16x16x8xf32>
    %5 = vector.shape_cast %4 : vector<2x16x16x8xf32> to vector<2x8x2x16x8xf32>
    %cst_4 = arith.constant dense<0xFF800000> : vector<2x8x16x8xf32>
    %6 = vector.multi_reduction <maximumf>, %5, %cst_4 [2] : vector<2x8x2x16x8xf32> to vector<2x8x16x8xf32>
    %7 = vector.extract_strided_slice %3 {offsets = [0, 2, 0, 0], sizes = [2, 16, 16, 8], strides = [1, 1, 1, 1]} : vector<2x18x16x8xf32> to vector<2x16x16x8xf32>
    %8 = vector.shape_cast %7 : vector<2x16x16x8xf32> to vector<2x8x2x16x8xf32>
    %9 = vector.extract_strided_slice %8 {offsets = [0, 0, 0, 0, 0], sizes = [2, 8, 1, 16, 8], strides = [1, 1, 1, 1, 1]} : vector<2x8x2x16x8xf32> to vector<2x8x1x16x8xf32>
    %10 = vector.shape_cast %9 : vector<2x8x1x16x8xf32> to vector<2x8x16x8xf32>
    %11 = arith.maximumf %6, %10 : vector<2x8x16x8xf32>
    %cst_5 = arith.constant 0xFF800000 : f32
    %12 = vector.broadcast %cst_5 : f32 to vector<2x8x1x8xf32>
    %cst_6 = arith.constant 0xFF800000 : f32
    %13 = vector.broadcast %cst_6 : f32 to vector<2x8x1x8xf32>
    %14 = tpu.concatenate %12, %11, %13 in 2 : vector<2x8x1x8xf32>, vector<2x8x16x8xf32>, vector<2x8x1x8xf32> -> vector<2x8x18x8xf32>
    %15 = vector.extract_strided_slice %14 {offsets = [0, 0, 0, 0], sizes = [2, 8, 16, 8], strides = [1, 1, 1, 1]} : vector<2x8x18x8xf32> to vector<2x8x16x8xf32>
    %16 = vector.shape_cast %15 : vector<2x8x16x8xf32> to vector<2x8x8x2x8xf32>
    %cst_7 = arith.constant dense<0xFF800000> : vector<2x8x8x8xf32>
    %17 = vector.multi_reduction <maximumf>, %16, %cst_7 [3] : vector<2x8x8x2x8xf32> to vector<2x8x8x8xf32>
    %18 = vector.extract_strided_slice %14 {offsets = [0, 0, 2, 0], sizes = [2, 8, 16, 8], strides = [1, 1, 1, 1]} : vector<2x8x18x8xf32> to vector<2x8x16x8xf32>
    %19 = vector.shape_cast %18 : vector<2x8x16x8xf32> to vector<2x8x8x2x8xf32>
    %20 = vector.extract_strided_slice %19 {offsets = [0, 0, 0, 0, 0], sizes = [2, 8, 8, 1, 8], strides = [1, 1, 1, 1, 1]} : vector<2x8x8x2x8xf32> to vector<2x8x8x1x8xf32>
    %21 = vector.shape_cast %20 : vector<2x8x8x1x8xf32> to vector<2x8x8x8xf32>
    %22 = arith.maximumf %17, %21 : vector<2x8x8x8xf32>
    %23 = vector.shape_cast %22 : vector<2x8x8x8xf32> to vector<128x8xf32>
    %c0_8 = arith.constant 0 : index
    %c0_9 = arith.constant 0 : index
    %24 = vector.load %arg2[%c0_8, %c0_9] : memref<8x16xf32, #tpu.memory_space<vmem>>, vector<8x16xf32>
    %cst_10 = arith.constant dense<0.000000e+00> : vector<128x16xf32>
    %25 = tpu.matmul %23, %24, %cst_10 {dimension_numbers = #tpu.dot_dimension_numbers<[1], [0], [0], [1], [0, 0, 1, 1], [], []>} : vector<128x8xf32>, vector<8x16xf32>, vector<128x16xf32> -> vector<128x16xf32>
    %c0_11 = arith.constant 0 : index
    %c0_12 = arith.constant 0 : index
    %26 = vector.load %arg3[%c0_11, %c0_12] : memref<1x16xf32, #tpu.memory_space<vmem>>, vector<1x16xf32>
    %27 = vector.broadcast %26 : vector<1x16xf32> to vector<128x16xf32>
    %28 = arith.addf %25, %27 : vector<128x16xf32>
    %cst_13 = arith.constant 0.000000e+00 : f32
    %29 = vector.broadcast %cst_13 : f32 to vector<128x16xf32>
    %30 = arith.maximumf %28, %29 : vector<128x16xf32>
    %cst_14 = arith.constant 0.000000e+00 : f32
    %31 = vector.broadcast %cst_14 : f32 to vector<2x10x10x16xf32>
    %c0_15 = arith.constant 0 : index
    %c0_16 = arith.constant 0 : index
    %c0_17 = arith.constant 0 : index
    %c0_18 = arith.constant 0 : index
    %32 = vector.load %arg9[%c0_15, %c0_16, %c0_17, %c0_18] : memref<2x10x10x16xf32, #tpu.memory_space<vmem>>, vector<2x10x10x16xf32>
    tpu.vector_store %arg9[%c0_15, %c0_16, %c0_17, %c0_18], %31 {strides = array<i32>} : memref<2x10x10x16xf32, #tpu.memory_space<vmem>>, vector<2x10x10x16xf32>,
    %33 = vector.shape_cast %30 : vector<128x16xf32> to vector<2x8x8x16xf32>
    %c0_19 = arith.constant 0 : index
    %c1 = arith.constant 1 : index
    %c1_20 = arith.constant 1 : index
    %c0_21 = arith.constant 0 : index
    %34 = vector.load %arg9[%c0_19, %c1, %c1_20, %c0_21] : memref<2x10x10x16xf32, #tpu.memory_space<vmem>>, vector<2x8x8x16xf32>
    tpu.vector_store %arg9[%c0_19, %c1, %c1_20, %c0_21], %33 {strides = array<i32>} : memref<2x10x10x16xf32, #tpu.memory_space<vmem>>, vector<2x8x8x16xf32>,
    %c0_22 = arith.constant 0 : index
    %c0_23 = arith.constant 0 : index
    %c0_24 = arith.constant 0 : index
    %c0_25 = arith.constant 0 : index
    %35 = vector.load %arg9[%c0_22, %c0_23, %c0_24, %c0_25] : memref<2x10x10x16xf32, #tpu.memory_space<vmem>>, vector<2x8x8x16xf32>
    %36 = vector.shape_cast %35 : vector<2x8x8x16xf32> to vector<128x16xf32>
    %c0_26 = arith.constant 0 : index
    %c0_27 = arith.constant 0 : index
    %c1_28 = arith.constant 1 : index
    %c0_29 = arith.constant 0 : index
    %37 = vector.load %arg9[%c0_26, %c0_27, %c1_28, %c0_29] : memref<2x10x10x16xf32, #tpu.memory_space<vmem>>, vector<2x8x8x16xf32>
    %38 = vector.shape_cast %37 : vector<2x8x8x16xf32> to vector<128x16xf32>
    %c0_30 = arith.constant 0 : index
    %c0_31 = arith.constant 0 : index
    %c2 = arith.constant 2 : index
    %c0_32 = arith.constant 0 : index
    %39 = vector.load %arg9[%c0_30, %c0_31, %c2, %c0_32] : memref<2x10x10x16xf32, #tpu.memory_space<vmem>>, vector<2x8x8x16xf32>
    %40 = vector.shape_cast %39 : vector<2x8x8x16xf32> to vector<128x16xf32>
    %c0_33 = arith.constant 0 : index
    %c1_34 = arith.constant 1 : index
    %c0_35 = arith.constant 0 : index
    %c0_36 = arith.constant 0 : index
    %41 = vector.load %arg9[%c0_33, %c1_34, %c0_35, %c0_36] : memref<2x10x10x16xf32, #tpu.memory_space<vmem>>, vector<2x8x8x16xf32>
    %42 = vector.shape_cast %41 : vector<2x8x8x16xf32> to vector<128x16xf32>
    %c0_37 = arith.constant 0 : index
    %c1_38 = arith.constant 1 : index
    %c1_39 = arith.constant 1 : index
    %c0_40 = arith.constant 0 : index
    %43 = vector.load %arg9[%c0_37, %c1_38, %c1_39, %c0_40] : memref<2x10x10x16xf32, #tpu.memory_space<vmem>>, vector<2x8x8x16xf32>
    %44 = vector.shape_cast %43 : vector<2x8x8x16xf32> to vector<128x16xf32>
    %c0_41 = arith.constant 0 : index
    %c1_42 = arith.constant 1 : index
    %c2_43 = arith.constant 2 : index
    %c0_44 = arith.constant 0 : index
    %45 = vector.load %arg9[%c0_41, %c1_42, %c2_43, %c0_44] : memref<2x10x10x16xf32, #tpu.memory_space<vmem>>, vector<2x8x8x16xf32>
    %46 = vector.shape_cast %45 : vector<2x8x8x16xf32> to vector<128x16xf32>
    %c0_45 = arith.constant 0 : index
    %c2_46 = arith.constant 2 : index
    %c0_47 = arith.constant 0 : index
    %c0_48 = arith.constant 0 : index
    %47 = vector.load %arg9[%c0_45, %c2_46, %c0_47, %c0_48] : memref<2x10x10x16xf32, #tpu.memory_space<vmem>>, vector<2x8x8x16xf32>
    %48 = vector.shape_cast %47 : vector<2x8x8x16xf32> to vector<128x16xf32>
    %c0_49 = arith.constant 0 : index
    %c2_50 = arith.constant 2 : index
    %c1_51 = arith.constant 1 : index
    %c0_52 = arith.constant 0 : index
    %49 = vector.load %arg9[%c0_49, %c2_50, %c1_51, %c0_52] : memref<2x10x10x16xf32, #tpu.memory_space<vmem>>, vector<2x8x8x16xf32>
    %50 = vector.shape_cast %49 : vector<2x8x8x16xf32> to vector<128x16xf32>
    %c0_53 = arith.constant 0 : index
    %c2_54 = arith.constant 2 : index
    %c2_55 = arith.constant 2 : index
    %c0_56 = arith.constant 0 : index
    %51 = vector.load %arg9[%c0_53, %c2_54, %c2_55, %c0_56] : memref<2x10x10x16xf32, #tpu.memory_space<vmem>>, vector<2x8x8x16xf32>
    %52 = vector.shape_cast %51 : vector<2x8x8x16xf32> to vector<128x16xf32>
    %53 = tpu.concatenate %36, %38, %40, %42, %44, %46, %48, %50, %52 in 1 : vector<128x16xf32>, vector<128x16xf32>, vector<128x16xf32>, vector<128x16xf32>, vector<128x16xf32>, vector<128x16xf32>, vector<128x16xf32>, vector<128x16xf32>, vector<128x16xf32> -> vector<128x144xf32>
    %c0_57 = arith.constant 0 : index
    %c0_58 = arith.constant 0 : index
    %54 = vector.load %arg4[%c0_57, %c0_58] : memref<144x16xf32, #tpu.memory_space<vmem>>, vector<144x16xf32>
    %cst_59 = arith.constant dense<0.000000e+00> : vector<128x16xf32>
    %55 = tpu.matmul %53, %54, %cst_59 {dimension_numbers = #tpu.dot_dimension_numbers<[1], [0], [0], [1], [0, 0, 1, 1], [], []>} : vector<128x144xf32>, vector<144x16xf32>, vector<128x16xf32> -> vector<128x16xf32>
    %c0_60 = arith.constant 0 : index
    %c0_61 = arith.constant 0 : index
    %56 = vector.load %arg5[%c0_60, %c0_61] : memref<1x16xf32, #tpu.memory_space<vmem>>, vector<1x16xf32>
    %57 = vector.broadcast %56 : vector<1x16xf32> to vector<128x16xf32>
    %58 = arith.addf %55, %57 : vector<128x16xf32>
    %cst_62 = arith.constant 0.000000e+00 : f32
    %59 = vector.broadcast %cst_62 : f32 to vector<128x16xf32>
    %60 = arith.maximumf %58, %59 : vector<128x16xf32>
    %61 = vector.shape_cast %60 : vector<128x16xf32> to vector<2x64x16xf32>
    %cst_63 = arith.constant dense<0.000000e+00> : vector<2x16xf32>
    %62 = vector.multi_reduction <add>, %61, %cst_63 [1] : vector<2x64x16xf32> to vector<2x16xf32>
    %c0_64 = arith.constant 0 : index
    %c0_65 = arith.constant 0 : index
    %63 = vector.load %arg6[%c0_64, %c0_65] : memref<16x128xf32, #tpu.memory_space<vmem>>, vector<16x128xf32>
    %cst_66 = arith.constant dense<0.000000e+00> : vector<2x128xf32>
    %64 = tpu.matmul %62, %63, %cst_66 {dimension_numbers = #tpu.dot_dimension_numbers<[1], [0], [0], [1], [0, 0, 1, 1], [], []>} : vector<2x16xf32>, vector<16x128xf32>, vector<2x128xf32> -> vector<2x128xf32>
    %c0_67 = arith.constant 0 : index
    %c0_68 = arith.constant 0 : index
    %65 = vector.load %arg7[%c0_67, %c0_68] : memref<1x128xf32, #tpu.memory_space<vmem>>, vector<1x128xf32>
    %66 = vector.broadcast %65 : vector<1x128xf32> to vector<2x128xf32>
    %67 = arith.addf %64, %66 : vector<2x128xf32>
    %c0_69 = arith.constant 0 : index
    %c0_70 = arith.constant 0 : index
    %68 = vector.load %arg8[%c0_69, %c0_70] : memref<2x128xf32, #tpu.memory_space<vmem>>, vector<2x128xf32>
    tpu.vector_store %arg8[%c0_69, %c0_70], %67 {strides = array<i32>} : memref<2x128xf32, #tpu.memory_space<vmem>>, vector<2x128xf32>,
    return
  }
  func.func @transform_0(%arg0: i32) -> (i32, i32, i32, i32) {
    %c0_i32 = arith.constant 0 : i32
    %c0_i32_0 = arith.constant 0 : i32
    %c0_i32_1 = arith.constant 0 : i32
    %c0_i32_2 = arith.constant 0 : i32
    return %arg0, %c0_i32, %c0_i32_0, %c0_i32_1 : i32, i32, i32, i32
  }
  func.func @transform_1(%arg0: i32) -> (i32, i32) {
    %c0_i32 = arith.constant 0 : i32
    %c0_i32_0 = arith.constant 0 : i32
    %c0_i32_1 = arith.constant 0 : i32
    return %c0_i32, %c0_i32_0 : i32, i32
  }
  func.func @transform_2(%arg0: i32) -> (i32, i32) {
    %c0_i32 = arith.constant 0 : i32
    %c0_i32_0 = arith.constant 0 : i32
    %c0_i32_1 = arith.constant 0 : i32
    return %c0_i32, %c0_i32_0 : i32, i32
  }
  func.func @transform_3(%arg0: i32) -> (i32, i32) {
    %c0_i32 = arith.constant 0 : i32
    %c0_i32_0 = arith.constant 0 : i32
    %c0_i32_1 = arith.constant 0 : i32
    return %c0_i32, %c0_i32_0 : i32, i32
  }
  func.func @transform_4(%arg0: i32) -> (i32, i32) {
    %c0_i32 = arith.constant 0 : i32
    %c0_i32_0 = arith.constant 0 : i32
    %c0_i32_1 = arith.constant 0 : i32
    return %c0_i32, %c0_i32_0 : i32, i32
  }
  func.func @transform_5(%arg0: i32) -> (i32, i32) {
    %c0_i32 = arith.constant 0 : i32
    %c0_i32_0 = arith.constant 0 : i32
    %c0_i32_1 = arith.constant 0 : i32
    return %c0_i32, %c0_i32_0 : i32, i32
  }
  func.func @transform_6(%arg0: i32) -> (i32, i32) {
    %c0_i32 = arith.constant 0 : i32
    %c0_i32_0 = arith.constant 0 : i32
    %c0_i32_1 = arith.constant 0 : i32
    return %c0_i32, %c0_i32_0 : i32, i32
  }
  func.func @transform_7(%arg0: i32) -> (i32, i32) {
    %c0_i32 = arith.constant 0 : i32
    %c0_i32_0 = arith.constant 0 : i32
    return %arg0, %c0_i32 : i32, i32
  }
}

</mosaic_0001>

<bundles_post_ra>
// kernel: tpu_custom_call.1
= control target key start
LH: loop header
LB: loop body
LE: loop exit
PB: predicated region body
PF: predicated region fallthrough
CT: control target
= control target key end

     0   :  { %vm91_vm0 = vcmask 64512   ;;  %v377_v3 = vlaneseq  ;;  %vm244_vm1 = vcmask 1040384   ;;  %v4367_v17 = vmov 1983009808   ;;  %s6538_s0 = inlined_call_operand.vmem [shape: f32[2,16,16,8], index: 0, kind: input, shape index: {}]   ;;  %s6539_s1 = inlined_call_operand.vmem [shape: f32[8,16], index: 1, kind: input, shape index: {}]   ;;  %s6540_s2 = inlined_call_operand.vmem [shape: f32[1,16], index: 2, kind: input, shape index: {}]   ;;  %s6541_s3 = inlined_call_operand.vmem [shape: f32[144,16], index: 3, kind: input, shape index: {}]   ;;  %s6542_s4 = inlined_call_operand.vmem [shape: f32[1,16], index: 4, kind: input, shape index: {}]   ;;  %s6543_s5 = inlined_call_operand.vmem [shape: f32[16,128], index: 5, kind: input, shape index: {}]   ;;  %s6544_s6 = inlined_call_operand.vmem [shape: f32[1,128], index: 6, kind: input, shape index: {}]   ;;  %s6545_s7 = inlined_call_operand.hbm [shape: f32[2,128], index: 7, kind: output, shape index: {}]  }
   0x1   :  { %v2214_v0 = vld [vmem:[%s6539_s1] sm:$0xff]  ;;  %v28_v2 = vld [vmem:[%s6538_s0 + $0x8] sm:$0xff]  ;;  %v29_v4 = vld [vmem:[%s6538_s0 + $0x10] sm:$0xff]  ;;  %v375_v18 = vunpack.c.l.s4 %v4367_v17  ;;  %vm1045_vm2 = vcmask 58368  }
   0x2   :  { %v27_v1 = vld [vmem:[%s6538_s0] sm:$0xff]  ;;  %3975 = vmatprep.subr.mxu0 %v2214_v0  ;;  %v30_v5 = vld [vmem:[%s6538_s0 + $0x18] sm:$0xff]  ;;  %v93_v8 = vsel %vm91_vm0, %v28_v2, -inf  ;;  %v32_v9 = vld [vmem:[%s6538_s0 + $0x28] sm:$0xff]  ;;  %v94_v10 = vsel %vm91_vm0, %v29_v4, -inf  ;;  %v378_v19 = vshrl.u32 %v377_v3, 7 }
   0x3   :  { %v31_v6 = vld [vmem:[%s6538_s0 + $0x20] sm:$0xff]  ;;  %v92_v7 = vsel %vm91_vm0, %v27_v1, -inf  ;;  %3976 = vmatpush3.msra.mxu0 %v2214_v0  ;;  %v97_v12 = vsel %vm91_vm0, %v30_v5, -inf  ;;  %v98_v14 = vsel %vm91_vm0, %v32_v9, -inf  ;;  %v181_v15 = vmax.f32 %v93_v8, %v30_v5  ;;  %v33_v23 = vld [vmem:[%s6538_s0 + $0x30] sm:$0xff]  ;;  %v34_v24 = vld [vmem:[%s6538_s0 + $0x38] sm:$0xff] }
   0x4   :  { %v95_v11 = vsel %vm91_vm0, %v31_v6, -inf  ;;  %v180_v13 = vmax.f32 %v92_v7, %v29_v4  ;;  %v99_v21 = vmax.f32 %v97_v12, %v98_v14  ;;  %v376_v26 = vunpack.c.0.s8 %v375_v18  ;;  %v35_v27 = vld [vmem:[%s6538_s0 + $0x40] sm:$0xff]  ;;  %v36_v28 = vld [vmem:[%s6538_s0 + $0x48] sm:$0xff] }
   0x5   :  { %v96_v20 = vmax.f32 %v94_v10, %v95_v11  ;;  %v246_v22 = vrot.slane %v181_v15, 7  ;;  %v4466_v34 = vsel %vm91_vm0, %v33_v23, -inf  ;;  %v4469_v35 = vsel %vm91_vm0, %v34_v24, -inf }
   0x6   :  { %v245_v16 = vrot.slane %v180_v13, 7  ;;  %v4463_v32 = vsub.s32 %v376_v26, %v378_v19  ;;  %v4473_v37 = vmax.f32 %v99_v21, %v34_v24  ;;  %v4476_v38 = vsel %vm91_vm0, %v35_v27, -inf }
   0x7   :  { %v4461_v30 = vsel %vm244_vm1, %v246_v22, -inf  ;;  %v4471_v36 = vmax.f32 %v96_v20, %v33_v23  ;;  %v4479_v39 = vsel %vm91_vm0, %v36_v28, -inf }
   0x8   :  { %v325_v25 = vsel %vm244_vm1, -inf, %v245_v16  ;;  %v247_v29 = vsel %vm244_vm1, %v245_v16, %v246_v22 }
   0x9   :  { %v373_v31 = vcombine.high %v325_v25, %v325_v25  ;;  %v390_v33 = vcombine.high %v247_v29, %v247_v29  ;;  %v380_v40 = vrot.slane %v325_v25, %v4463_v32  ;;  %v4486_v42 = vrot.slane %v247_v29, %v4463_v32 }
   0xb   :  { %v4483_v41 = vrot.slane %v373_v31, %v4463_v32  ;;  %v4489_v43 = vrot.slane %v390_v33, %v4463_v32 }
   0xc   :  { %12 = vsyncpa [#allocation4], 0  ;;  %v1964_v44 = vrot.slane %v4461_v30, %v4463_v32  ;;  %v248_v45 = vrot.slane %v4471_v36, 7  ;;  %v249_v46 = vrot.slane %v4473_v37, 7  ;;  %v102_v47 = vmax.f32 %v4466_v34, %v4476_v38  ;;  %v43_v34 = vld [vmem:[%s6538_s0 + $0x80] sm:$0xff]  ;;  %s4370_s11 = smov 96  }
   0xd   :  { %v4497_v48 = vcombine.high %v380_v40, %v380_v40  ;;  %v4501_v49 = vcombine.high %v4483_v41, %v4483_v41  ;;  %v4505_v50 = vcombine.high %v4486_v42, %v4486_v42  ;;  %v4509_v51 = vcombine.high %v4489_v43, %v4489_v43  ;;  %s4371_s12 = smov 32   ;;  %s4372_s13 = smov 112  }
   0xe   :  { %v1046_v52 = vsel %vm1045_vm2, %v380_v40, -inf  ;;  %v1060_v53 = vsel %vm1045_vm2, %v4483_v41, -inf  ;;  %v1074_v54 = vsel %vm1045_vm2, %v4486_v42, -inf  ;;  %v1088_v55 = vsel %vm1045_vm2, %v4489_v43, -inf  ;;  %s4373_s14 = smov 64   ;;  %s4374_s15 = smov 48  }
   0xf   :  { %v1047_v56 = vrot.slane %v1046_v52, 4  ;;  %v1053_v57 = vsel %vm1045_vm2, %v4497_v48, -inf  ;;  %v1061_v58 = vrot.slane %v1060_v53, 4  ;;  %v1067_v59 = vsel %vm1045_vm2, %v4501_v49, -inf  ;;  %s4375_s16 = smov 80  }
  0x10   :  { %v1054_v60 = vrot.slane %v1053_v57, 4  ;;  %v1068_v61 = vrot.slane %v1067_v59, 4  ;;  %v1075_v62 = vrot.slane %v1074_v54, 4  ;;  %v1081_v63 = vsel %vm1045_vm2, %v4505_v50, -inf }
  0x11   :  { %v1048_v0 = vmax.f32 %v1046_v52, %v1047_v56  ;;  %v1062_v1 = vmax.f32 %v1060_v53, %v1061_v58  ;;  %v1082_v2 = vrot.slane %v1081_v63, 4  ;;  %v1089_v3 = vrot.slane %v1088_v55, 4 }
  0x12   :  { %v1055_v4 = vmax.f32 %v1053_v57, %v1054_v60  ;;  %v1069_v5 = vmax.f32 %v1067_v59, %v1068_v61  ;;  %v1076_v6 = vmax.f32 %v1074_v54, %v1075_v62  ;;  %v1095_v7 = vsel %vm1045_vm2, %v4509_v51, -inf }
  0x13   :  { %v1049_v8 = vrot.slane %v1048_v0, 2  ;;  %v1063_v9 = vrot.slane %v1062_v1, 2  ;;  %v1083_v10 = vmax.f32 %v1081_v63, %v1082_v2  ;;  %v1090_v11 = vmax.f32 %v1088_v55, %v1089_v3 }
  0x14   :  { %v1056_v12 = vrot.slane %v1055_v4, 2  ;;  %v1070_v13 = vrot.slane %v1069_v5, 2  ;;  %v1077_v14 = vrot.slane %v1076_v6, 2  ;;  %v1096_v15 = vrot.slane %v1095_v7, 4 }
  0x15   :  { %v1050_v16 = vmax.f32 %v1048_v0, %v1049_v8  ;;  %v1064_v17 = vmax.f32 %v1062_v1, %v1063_v9  ;;  %v1084_v18 = vrot.slane %v1083_v10, 2  ;;  %v1091_v19 = vrot.slane %v1090_v11, 2 }
  0x16   :  { %vm2351_vm3 = vcmask 1041409   ;;  %v1057_v20 = vmax.f32 %v1055_v4, %v1056_v12  ;;  %v1071_v21 = vmax.f32 %v1069_v5, %v1070_v13  ;;  %v1078_v22 = vmax.f32 %v1076_v6, %v1077_v14 }
  0x17   :  { %v1097_v23 = vmax.f32 %v1095_v7, %v1096_v15  ;;  %vm2354_vm4 = vcmask 1042434   ;;  %v1051_v24 = vrot.slane %v1050_v16, 1  ;;  %v1065_v25 = vrot.slane %v1064_v17, 1 }
  0x18   :  { %v1085_v26 = vmax.f32 %v1083_v10, %v1084_v18  ;;  %v1092_v27 = vmax.f32 %v1090_v11, %v1091_v19  ;;  %vm2357_vm5 = vcmask 1043459   ;;  %v1058_v28 = vrot.slane %v1057_v20, 1 }
  0x19   :  { %v1072_v29 = vrot.slane %v1071_v21, 1  ;;  %v1079_v31 = vrot.slane %v1078_v22, 1  ;;  %v1098_v33 = vrot.slane %v1097_v23, 2  ;;  %vm2360_vm6 = vcmask 1044484  }
  0x1a   :  { %v1052_v40 = vmax.f32 %v1050_v16, %v1051_v24  ;;  %v1066_v52 = vmax.f32 %v1064_v17, %v1065_v25  ;;  %v1086_v53 = vrot.slane %v1085_v26, 1  ;;  %v1093_v54 = vrot.slane %v1092_v27, 1 }
  0x1b   :  { %vm2363_vm7 = vcmask 1045509   ;;  %v1059_v55 = vmax.f32 %v1057_v20, %v1058_v28  ;;  %v1073_v56 = vmax.f32 %v1071_v21, %v1072_v29  ;;  %v1080_v57 = vmax.f32 %v1078_v22, %v1079_v31 }
  0x1c   :  { %v1099_v58 = vmax.f32 %v1097_v23, %v1098_v33  ;;  %vm2366_vm8 = vcmask 1046534   ;;  %v1087_v59 = vmax.f32 %v1085_v26, %v1086_v53  ;;  %v1094_v60 = vmax.f32 %v1092_v27, %v1093_v54 }
  0x1d   :  { %v2086_v61 = vmax.f32 %v1052_v40, %v4497_v48  ;;  %v2088_v62 = vmax.f32 %v1066_v52, %v4501_v49  ;;  %vm2369_vm9 = vcmask 1047559   ;;  %v2087_v0 = vmax.f32 %v1059_v55, %v4483_v41 }
  0x1e   :  { %v1100_v63 = vrot.slane %v1099_v58, 1  ;;  %v2089_v1 = vmax.f32 %v1073_v56, %v4486_v42  ;;  %v2090_v2 = vmax.f32 %v1080_v57, %v4505_v50  ;;  %v2091_v3 = vmax.f32 %v1087_v59, %v4489_v43 }
  0x1f   :  { %v2092_v4 = vmax.f32 %v1094_v60, %v4509_v51  ;;  %v2353_v5 = vrot.slane %v2088_v62, 6  ;;  %v250_v48 = vsel %vm244_vm1, %v248_v45, %v249_v46  ;;  %v2350_v6 = vrot.slane %v2087_v0, 7 }
  0x20   :  { %v1101_v49 = vmax.f32 %v1099_v58, %v1100_v63  ;;  %v2356_v7 = vrot.slane %v2089_v1, 5  ;;  %v2359_v8 = vrot.slane %v2090_v2, 4  ;;  %v2362_v41 = vrot.slane %v2091_v3, 3 }
  0x21   :  { %v2365_v9 = vrot.slane %v2092_v4, 2  ;;  %v326_v42 = vsel %vm244_vm1, -inf, %v248_v45  ;;  %v4544_v43 = vsel %vm244_vm1, %v249_v46, -inf  ;;  %v2352_v51 = vsel %vm2351_vm3, %v2350_v6, %v2086_v61 }
  0x22   :  { %v2093_v50 = vmax.f32 %v1101_v49, %v1964_v44  ;;  %v407_v10 = vcombine.high %v326_v42, %v326_v42  ;;  %v414_v11 = vrot.slane %v326_v42, %v4463_v32  ;;  %v2355_v12 = vsel %vm2354_vm4, %v2353_v5, %v2352_v51 }
  0x23   :  { %v424_v13 = vcombine.high %v250_v48, %v250_v48  ;;  %v4553_v36 = vrot.slane %v250_v48, %v4463_v32  ;;  %v1971_v37 = vrot.slane %v4544_v43, %v4463_v32  ;;  %v2358_v45 = vsel %vm2357_vm5, %v2356_v7, %v2355_v12 }
  0x24   :  { %v2368_v46 = vrot.slane %v2093_v50, 1  ;;  %v4559_v30 = vrot.slane %v407_v10, %v4463_v32  ;;  %v4561_v44 = vcombine.high %v414_v11, %v414_v11  ;;  %v2361_v14 = vsel %vm2360_vm6, %v2359_v8, %v2358_v45 }
  0x25   :  { %v4565_v15 = vrot.slane %v424_v13, %v4463_v32  ;;  %v4569_v16 = vcombine.high %v4553_v36, %v4553_v36  ;;  %v1102_v17 = vsel %vm1045_vm2, %v414_v11, -inf  ;;  %v2364_v18 = vsel %vm2363_vm7, %v2362_v41, %v2361_v14 }
  0x26   :  { %v4575_v19 = vcombine.high %v4559_v30, %v4559_v30  ;;  %v1103_v20 = vrot.slane %v1102_v17, 4  ;;  %v1109_v21 = vsel %vm1045_vm2, %v4561_v44, -inf  ;;  %v2367_v22 = vsel %vm2366_vm8, %v2365_v9, %v2364_v18 }
  0x27   :  { %v4582_v23 = vcombine.high %v4565_v15, %v4565_v15  ;;  %v1110_v24 = vrot.slane %v1109_v21, 4  ;;  %v1116_v25 = vsel %vm1045_vm2, %v4559_v30, -inf  ;;  %v2370_v26 = vsel %vm2369_vm9, %v2368_v46, %v2367_v22 }
  0x28   :  { %v1104_v27 = vmax.f32 %v1102_v17, %v1103_v20  ;;  %v1117_v28 = vrot.slane %v1116_v25, 4  ;;  %v1123_v29 = vsel %vm1045_vm2, %v4575_v19, -inf  ;;  %3977 = vmatprep.mubr.msk.f32.mxu0 %vm91_vm0, %v2370_v26  ;;  %v1130_v40 = vsel %vm1045_vm2, %v4553_v36, -inf }
  0x29   :  { %v1111_v31 = vmax.f32 %v1109_v21, %v1110_v24  ;;  %v1124_v33 = vrot.slane %v1123_v29, 4  ;;  %v1137_v52 = vsel %vm1045_vm2, %v4569_v16, -inf  ;;  %v1131_v55 = vrot.slane %v1130_v40, 4 }
  0x2a   :  { %v1105_v53 = vrot.slane %v1104_v27, 2  ;;  %v1118_v54 = vmax.f32 %v1116_v25, %v1117_v28  ;;  %v1138_v56 = vrot.slane %v1137_v52, 4  ;;  %v1144_v59 = vsel %vm1045_vm2, %v4565_v15, -inf  ;;  %v37_v25 = vld [vmem:[%s6538_s0 + $0x50] sm:$0xff] }
  0x2b   :  { %v1112_v57 = vrot.slane %v1111_v31, 2  ;;  %v1125_v58 = vmax.f32 %v1123_v29, %v1124_v33  ;;  %v1151_v60 = vsel %vm1045_vm2, %v4582_v23, -inf  ;;  %v1132_v63 = vmax.f32 %v1130_v40, %v1131_v55 }
  0x2c   :  { %v1106_v61 = vmax.f32 %v1104_v27, %v1105_v53  ;;  %v1119_v62 = vrot.slane %v1118_v54, 2  ;;  %v1139_v0 = vmax.f32 %v1137_v52, %v1138_v56  ;;  %v1145_v3 = vrot.slane %v1144_v59, 4 }
  0x2d   :  { %v1113_v1 = vmax.f32 %v1111_v31, %v1112_v57  ;;  %v1126_v2 = vrot.slane %v1125_v58, 2  ;;  %v1152_v4 = vrot.slane %v1151_v60, 4  ;;  %v1133_v49 = vrot.slane %v1132_v63, 2  ;;  %v40_v57 = vld [vmem:[%s6538_s0 + $0x68] sm:$0xff] }
  0x2e   :  { %v1107_v5 = vrot.slane %v1106_v61, 1  ;;  %v1120_v48 = vmax.f32 %v1118_v54, %v1119_v62  ;;  %v1140_v6 = vrot.slane %v1139_v0, 2  ;;  %v1146_v41 = vmax.f32 %v1144_v59, %v1145_v3 }
  0x2f   :  { %v1114_v7 = vrot.slane %v1113_v1, 1  ;;  %v1127_v8 = vmax.f32 %v1125_v58, %v1126_v2  ;;  %v1153_v9 = vmax.f32 %v1151_v60, %v1152_v4  ;;  %v1134_v51 = vmax.f32 %v1132_v63, %v1133_v49 }
  0x30   :  { %v1108_v42 = vmax.f32 %v1106_v61, %v1107_v5  ;;  %v1121_v50 = vrot.slane %v1120_v48, 1  ;;  %v1141_v10 = vmax.f32 %v1139_v0, %v1140_v6  ;;  %v1147_v13 = vrot.slane %v1146_v41, 2  ;;  %v41_v0 = vld [vmem:[%s6538_s0 + $0x70] sm:$0xff] }
  0x31   :  { %v1115_v11 = vmax.f32 %v1113_v1, %v1114_v7  ;;  %v1128_v12 = vrot.slane %v1127_v8, 1  ;;  %v1154_v45 = vrot.slane %v1153_v9, 2  ;;  %v1135_v14 = vrot.slane %v1134_v51, 1 }
  0x32   :  { %v1122_v46 = vmax.f32 %v1120_v48, %v1121_v50  ;;  %v1142_v17 = vrot.slane %v1141_v10, 1  ;;  %v2094_v18 = vmax.f32 %v1108_v42, %v4561_v44  ;;  %v1148_v21 = vmax.f32 %v1146_v41, %v1147_v13 }
  0x33   :  { %v1129_v20 = vmax.f32 %v1127_v8, %v1128_v12  ;;  %v1155_v22 = vmax.f32 %v1153_v9, %v1154_v45  ;;  %v2095_v24 = vmax.f32 %v1115_v11, %v4559_v30  ;;  %v1136_v26 = vmax.f32 %v1134_v51, %v1135_v14  ;;  %v38_v30 = vld [vmem:[%s6538_s0 + $0x58] sm:$0xff] }
  0x34   :  { %v1143_v27 = vmax.f32 %v1141_v10, %v1142_v17  ;;  %v2096_v28 = vmax.f32 %v1122_v46, %v4575_v19  ;;  %v105_v29 = vmax.f32 %v4469_v35, %v4479_v39  ;;  %v1149_v31 = vrot.slane %v1148_v21, 1 }
  0x35   :  { %v1156_v33 = vrot.slane %v1155_v22, 1  ;;  %v2097_v44 = vmax.f32 %v1129_v20, %v4553_v36  ;;  %v2371_v40 = vrot.slane %v2095_v24, 7  ;;  %v2098_v52 = vmax.f32 %v1136_v26, %v4569_v16  ;;  %v39_v36 = vld [vmem:[%s6538_s0 + $0x60] sm:$0xff] }
  0x36   :  { %v2099_v53 = vmax.f32 %v1143_v27, %v4565_v15  ;;  %v2373_v54 = vrot.slane %v2096_v28, 6  ;;  %v106_v55 = vsel %vm91_vm0, %v37_v25, -inf  ;;  %v1150_v19 = vmax.f32 %v1148_v21, %v1149_v31 }
  0x37   :  { %v1157_v56 = vmax.f32 %v1155_v22, %v1156_v33  ;;  %v2372_v35 = vsel %vm2351_vm3, %v2371_v40, %v2094_v18  ;;  %v2375_v39 = vrot.slane %v2097_v44, 5  ;;  %v2377_v58 = vrot.slane %v2098_v52, 4 }
  0x38   :  { %v2374_v16 = vsel %vm2354_vm4, %v2373_v54, %v2372_v35  ;;  %v2379_v15 = vrot.slane %v2099_v53, 3  ;;  %v109_v59 = vsel %vm91_vm0, %v38_v30, -inf  ;;  %v2100_v60 = vmax.f32 %v1150_v19, %v4582_v23  ;;  %v42_v23 = vld [vmem:[%s6538_s0 + $0x78] sm:$0xff] }
  0x39   :  { %v2101_v61 = vmax.f32 %v1157_v56, %v1971_v37  ;;  %v2376_v62 = vsel %vm2357_vm5, %v2375_v39, %v2374_v16  ;;  %v184_v63 = vmax.f32 %v102_v47, %v37_v25  ;;  %v185_v2 = vmax.f32 %v105_v29, %v38_v30 }
  0x3a   :  { %v2378_v1 = vsel %vm2360_vm6, %v2377_v58, %v2376_v62  ;;  %v107_v43 = vsel %vm91_vm0, %v39_v36, -inf  ;;  %v110_v37 = vsel %vm91_vm0, %v40_v57, -inf  ;;  %v2381_v47 = vrot.slane %v2100_v60, 2 }
  0x3b   :  { %v2380_v38 = vsel %vm2363_vm7, %v2379_v15, %v2378_v1  ;;  %v2383_v3 = vrot.slane %v2101_v61, 1  ;;  %v251_v4 = vrot.slane %v184_v63, 7  ;;  %v252_v5 = vrot.slane %v185_v2, 7 }
  0x3c   :  { %v108_v48 = vmax.f32 %v106_v55, %v107_v43  ;;  %v111_v49 = vmax.f32 %v109_v59, %v110_v37  ;;  %v4644_v6 = vsel %vm91_vm0, %v41_v0, -inf  ;;  %v2382_v7 = vsel %vm2366_vm8, %v2381_v47, %v2380_v38 }
  0x3d   :  { %v327_v8 = vsel %vm244_vm1, -inf, %v251_v4  ;;  %v4649_v41 = vsel %vm91_vm0, %v42_v23, -inf  ;;  %v4652_v9 = vsel %vm91_vm0, %v43_v34, -inf  ;;  %v2384_v42 = vsel %vm2369_vm9, %v2383_v3, %v2382_v7 }
  0x3e   :  { %v253_v50 = vsel %vm244_vm1, %v251_v4, %v252_v5  ;;  %v4657_v51 = vsel %vm244_vm1, %v252_v5, -inf  ;;  %v441_v10 = vcombine.high %v327_v8, %v327_v8  ;;  %3978 = vmatmul.mubr.msk.f32.vlgmr.msra.gmra.mrb[0].mxu0 %vm91_vm0, %v2384_v42  ;;  %v448_v11 = vrot.slane %v327_v8, %v4463_v32 }
  0x3f   :  { %v458_v12 = vcombine.high %v253_v50, %v253_v50  ;;  %v4662_v13 = vrot.slane %v253_v50, %v4463_v32  ;;  %v1978_v45 = vrot.slane %v4657_v51, %v4463_v32  ;;  %v4669_v14 = vmax.f32 %v108_v48, %v41_v0 }
  0x40   :  { %v4667_v46 = vrot.slane %v441_v10, %v4463_v32  ;;  %v4671_v17 = vmax.f32 %v111_v49, %v42_v23  ;;  %v114_v18 = vmax.f32 %v4644_v6, %v4652_v9  ;;  %v4675_v20 = vcombine.high %v448_v11, %v448_v11  ;;  %v49_v6 = vld [vmem:[%s6538_s0 + $0xb0] sm:$0xff] }
  0x41   :  { %v4678_v21 = vrot.slane %v458_v12, %v4463_v32  ;;  %v4682_v22 = vcombine.high %v4662_v13, %v4662_v13  ;;  %v1158_v24 = vsel %vm1045_vm2, %v448_v11, -inf  ;;  %v1186_v28 = vsel %vm1045_vm2, %v4662_v13, -inf }
  0x42   :  { %v4687_v25 = vcombine.high %v4667_v46, %v4667_v46  ;;  %v1159_v26 = vrot.slane %v1158_v24, 4  ;;  %v1172_v27 = vsel %vm1045_vm2, %v4667_v46, -inf  ;;  %v1165_v31 = vsel %vm1045_vm2, %v4675_v20, -inf }
  0x43   :  { %v4695_v29 = vcombine.high %v4678_v21, %v4678_v21  ;;  %v1173_v33 = vrot.slane %v1172_v27, 4  ;;  %v1187_v44 = vrot.slane %v1186_v28, 4  ;;  %v1166_v30 = vrot.slane %v1165_v31, 4 }
  0x44   :  { %v1160_v40 = vmax.f32 %v1158_v24, %v1159_v26  ;;  %v1179_v52 = vsel %vm1045_vm2, %v4687_v25, -inf  ;;  %v1193_v53 = vsel %vm1045_vm2, %v4682_v22, -inf  ;;  %v1200_v36 = vsel %vm1045_vm2, %v4678_v21, -inf }
  0x45   :  { %v1174_v54 = vmax.f32 %v1172_v27, %v1173_v33  ;;  %v1180_v55 = vrot.slane %v1179_v52, 4  ;;  %v1188_v19 = vmax.f32 %v1186_v28, %v1187_v44  ;;  %v1194_v56 = vrot.slane %v1193_v53, 4 }
  0x46   :  { %v1161_v35 = vrot.slane %v1160_v40, 2  ;;  %v1167_v39 = vmax.f32 %v1165_v31, %v1166_v30  ;;  %v1207_v57 = vsel %vm1045_vm2, %v4695_v29, -inf  ;;  %v1201_v62 = vrot.slane %v1200_v36, 4 }
  0x47   :  { %v1175_v16 = vrot.slane %v1174_v54, 2  ;;  %v1181_v58 = vmax.f32 %v1179_v52, %v1180_v55  ;;  %v1189_v15 = vrot.slane %v1188_v19, 2  ;;  %v1195_v59 = vmax.f32 %v1193_v53, %v1194_v56 }
  0x48   :  { %v1162_v60 = vmax.f32 %v1160_v40, %v1161_v35  ;;  %v1168_v61 = vrot.slane %v1167_v39, 2  ;;  %v1208_v63 = vrot.slane %v1207_v57, 4  ;;  %v1202_v34 = vmax.f32 %v1200_v36, %v1201_v62 }
  0x49   :  { %v1176_v0 = vmax.f32 %v1174_v54, %v1175_v16  ;;  %v1182_v1 = vrot.slane %v1181_v58, 2  ;;  %v1190_v2 = vmax.f32 %v1188_v19, %v1189_v15  ;;  %v1196_v23 = vrot.slane %v1195_v59, 2  ;;  %v44_v54 = vld [vmem:[%s6538_s0 + $0x88] sm:$0xff] }
  0x4a   :  { %v1163_v43 = vrot.slane %v1162_v60, 1  ;;  %v1169_v37 = vmax.f32 %v1167_v39, %v1168_v61  ;;  %v1209_v38 = vmax.f32 %v1207_v57, %v1208_v63  ;;  %v1203_v7 = vrot.slane %v1202_v34, 2 }
  0x4b   :  { %v1177_v47 = vrot.slane %v1176_v0, 1  ;;  %v1183_v3 = vmax.f32 %v1181_v58, %v1182_v1  ;;  %v1191_v4 = vrot.slane %v1190_v2, 1  ;;  %v1197_v5 = vmax.f32 %v1195_v59, %v1196_v23 }
  0x4c   :  { %v1164_v48 = vmax.f32 %v1162_v60, %v1163_v43  ;;  %v1170_v49 = vrot.slane %v1169_v37, 1  ;;  %v1210_v8 = vrot.slane %v1209_v38, 2  ;;  %v1204_v24 = vmax.f32 %v1202_v34, %v1203_v7 }
  0x4d   :  { %v1178_v42 = vmax.f32 %v1176_v0, %v1177_v47  ;;  %v1184_v50 = vrot.slane %v1183_v3, 1  ;;  %v1192_v10 = vmax.f32 %v1190_v2, %v1191_v4  ;;  %v1198_v11 = vrot.slane %v1197_v5, 1 }
  0x4e   :  { %v1171_v12 = vmax.f32 %v1169_v37, %v1170_v49  ;;  %v1211_v26 = vmax.f32 %v1209_v38, %v1210_v8  ;;  %v2102_v27 = vmax.f32 %v1164_v48, %v4675_v20  ;;  %v1205_v40 = vrot.slane %v1204_v24, 1 }
  0x4f   :  { %v1185_v28 = vmax.f32 %v1183_v3, %v1184_v50  ;;  %v1199_v31 = vmax.f32 %v1197_v5, %v1198_v11  ;;  %v2104_v33 = vmax.f32 %v1178_v42, %v4687_v25  ;;  %v2106_v44 = vmax.f32 %v1192_v10, %v4682_v22 }
  0x50   :  { %v1212_v30 = vrot.slane %v1211_v26, 1  ;;  %v2103_v52 = vmax.f32 %v1171_v12, %v4667_v46  ;;  %v254_v53 = vrot.slane %v4669_v14, 7  ;;  %v1206_v35 = vmax.f32 %v1204_v24, %v1205_v40 }
  0x51   :  { %v2105_v55 = vmax.f32 %v1185_v28, %v4662_v13  ;;  %v2107_v20 = vmax.f32 %v1199_v31, %v4678_v21  ;;  %v2387_v19 = vrot.slane %v2104_v33, 6  ;;  %v2391_v56 = vrot.slane %v2106_v44, 4 }
  0x52   :  { %v1213_v25 = vmax.f32 %v1211_v26, %v1212_v30  ;;  %v2385_v39 = vrot.slane %v2103_v52, 7  ;;  %v255_v22 = vrot.slane %v4671_v17, 7  ;;  %v328_v46 = vsel %vm244_vm1, -inf, %v254_v53 }
  0x53   :  { %v2389_v36 = vrot.slane %v2105_v55, 5  ;;  %v2393_v57 = vrot.slane %v2107_v20, 3  ;;  %v4720_v14 = vsel %vm91_vm0, %v44_v54, -inf  ;;  %v2108_v16 = vmax.f32 %v1206_v35, %v4695_v29 }
  0x54   :  { %v2109_v13 = vmax.f32 %v1213_v25, %v1978_v45  ;;  %v2386_v21 = vsel %vm2351_vm3, %v2385_v39, %v2102_v27  ;;  %v256_v58 = vsel %vm244_vm1, %v254_v53, %v255_v22  ;;  %v4730_v17 = vsel %vm244_vm1, %v255_v22, -inf }
  0x55   :  { %v2388_v15 = vsel %vm2354_vm4, %v2387_v19, %v2386_v21  ;;  %v475_v59 = vcombine.high %v328_v46, %v328_v46  ;;  %v482_v60 = vrot.slane %v328_v46, %v4463_v32  ;;  %v2395_v62 = vrot.slane %v2108_v16, 2 }
  0x56   :  { %v2390_v61 = vsel %vm2357_vm5, %v2389_v36, %v2388_v15  ;;  %v2397_v29 = vrot.slane %v2109_v13, 1  ;;  %v492_v63 = vcombine.high %v256_v58, %v256_v58  ;;  %v4741_v1 = vrot.slane %v256_v58, %v4463_v32 }
  0x57   :  { %v2392_v51 = vsel %vm2360_vm6, %v2391_v56, %v2390_v61  ;;  %v4736_v45 = vrot.slane %v475_v59, %v4463_v32  ;;  %v4738_v0 = vcombine.high %v482_v60, %v482_v60  ;;  %v1214_v43 = vsel %vm1045_vm2, %v482_v60, -inf }
  0x58   :  { %v2394_v2 = vsel %vm2363_vm7, %v2393_v57, %v2392_v51  ;;  %v4745_v23 = vrot.slane %v492_v63, %v4463_v32  ;;  %v1985_v37 = vrot.slane %v4730_v17, %v4463_v32  ;;  %v4757_v47 = vcombine.high %v4741_v1, %v4741_v1  ;;  %v50_v17 = vld [vmem:[%s6538_s0 + $0xb8] sm:$0xff] }
  0x59   :  { %v2396_v34 = vsel %vm2366_vm8, %v2395_v62, %v2394_v2  ;;  %v4753_v38 = vcombine.high %v4736_v45, %v4736_v45  ;;  %v1215_v3 = vrot.slane %v1214_v43, 4  ;;  %v1221_v48 = vsel %vm1045_vm2, %v4738_v0, -inf }
  0x5a   :  { %v2398_v4 = vsel %vm2369_vm9, %v2397_v29, %v2396_v34  ;;  %v4762_v5 = vcombine.high %v4745_v23, %v4745_v23  ;;  %v1228_v49 = vsel %vm1045_vm2, %v4736_v45, -inf  ;;  %v1222_v8 = vrot.slane %v1221_v48, 4 }
  0x5b   :  { %3980 = vmatprep.mubr.msk.f32.mxu0 %vm91_vm0, %v2398_v4  ;;  %v1216_v7 = vmax.f32 %v1214_v43, %v1215_v3  ;;  %v1229_v42 = vrot.slane %v1228_v49, 4  ;;  %v1235_v50 = vsel %vm1045_vm2, %v4753_v38, -inf  ;;  %v1242_v11 = vsel %vm1045_vm2, %v4741_v1, -inf }
  0x5c   :  { %v1236_v10 = vrot.slane %v1235_v50, 4  ;;  %v1249_v12 = vsel %vm1045_vm2, %v4757_v47, -inf  ;;  %v1256_v24 = vsel %vm1045_vm2, %v4745_v23, -inf  ;;  %v1223_v27 = vmax.f32 %v1221_v48, %v1222_v8 }
  0x5d   :  { %v1217_v26 = vrot.slane %v1216_v7, 2  ;;  %v1230_v28 = vmax.f32 %v1228_v49, %v1229_v42  ;;  %v1243_v31 = vrot.slane %v1242_v11, 4  ;;  %v1250_v44 = vrot.slane %v1249_v12, 4  ;;  %v45_v49 = vld [vmem:[%s6538_s0 + $0x90] sm:$0xff] }
  0x5e   :  { %v1237_v33 = vmax.f32 %v1235_v50, %v1236_v10  ;;  %v1257_v40 = vrot.slane %v1256_v24, 4  ;;  %v1263_v30 = vsel %vm1045_vm2, %v4762_v5, -inf  ;;  %v1224_v53 = vrot.slane %v1223_v27, 2 }
  0x5f   :  { %v1218_v52 = vmax.f32 %v1216_v7, %v1217_v26  ;;  %v1231_v54 = vrot.slane %v1230_v28, 2  ;;  %v1244_v55 = vmax.f32 %v1242_v11, %v1243_v31  ;;  %v1251_v19 = vmax.f32 %v1249_v12, %v1250_v44 }
  0x60   :  { %v1238_v20 = vrot.slane %v1237_v33, 2  ;;  %v1258_v56 = vmax.f32 %v1256_v24, %v1257_v40  ;;  %v1264_v35 = vrot.slane %v1263_v30, 4  ;;  %v1225_v39 = vmax.f32 %v1223_v27, %v1224_v53  ;;  %v46_v24 = vld [vmem:[%s6538_s0 + $0x98] sm:$0xff] }
  0x61   :  { %v1219_v25 = vrot.slane %v1218_v52, 1  ;;  %v1232_v22 = vmax.f32 %v1230_v28, %v1231_v54  ;;  %v1245_v36 = vrot.slane %v1244_v55, 2  ;;  %v1252_v46 = vrot.slane %v1251_v19, 2 }
  0x62   :  { %v1239_v57 = vmax.f32 %v1237_v33, %v1238_v20  ;;  %v1259_v16 = vrot.slane %v1258_v56, 2  ;;  %v1265_v13 = vmax.f32 %v1263_v30, %v1264_v35  ;;  %v1226_v58 = vrot.slane %v1225_v39, 1 }
  0x63   :  { %v1220_v21 = vmax.f32 %v1218_v52, %v1219_v25  ;;  %v1233_v15 = vrot.slane %v1232_v22, 1  ;;  %v1246_v59 = vmax.f32 %v1244_v55, %v1245_v36  ;;  %v1253_v61 = vmax.f32 %v1251_v19, %v1252_v46 }
  0x64   :  { %v1240_v60 = vrot.slane %v1239_v57, 1  ;;  %v1260_v62 = vmax.f32 %v1258_v56, %v1259_v16  ;;  %v1266_v29 = vrot.slane %v1265_v13, 2  ;;  %v1227_v63 = vmax.f32 %v1225_v39, %v1226_v58 }
  0x65   :  { %v1234_v51 = vmax.f32 %v1232_v22, %v1233_v15  ;;  %v1247_v2 = vrot.slane %v1246_v59, 1  ;;  %v2110_v43 = vmax.f32 %v1220_v21, %v4738_v0  ;;  %v1254_v3 = vrot.slane %v1253_v61, 1 }
  0x66   :  { %v1241_v34 = vmax.f32 %v1239_v57, %v1240_v60  ;;  %v1261_v4 = vrot.slane %v1260_v62, 1  ;;  %v1267_v48 = vmax.f32 %v1265_v13, %v1266_v29  ;;  %v2111_v8 = vmax.f32 %v1227_v63, %v4736_v45 }
  0x67   :  { %v1248_v7 = vmax.f32 %v1246_v59, %v1247_v2  ;;  %v2112_v42 = vmax.f32 %v1234_v51, %v4753_v38  ;;  %v117_v50 = vmax.f32 %v4649_v41, %v4720_v14  ;;  %v1255_v10 = vmax.f32 %v1253_v61, %v1254_v3 }
  0x68   :  { %v1262_v11 = vmax.f32 %v1260_v62, %v1261_v4  ;;  %v1268_v12 = vrot.slane %v1267_v48, 1  ;;  %v2113_v0 = vmax.f32 %v1241_v34, %v4741_v1  ;;  %v2399_v27 = vrot.slane %v2111_v8, 7  ;;  %v47_v1 = vld [vmem:[%s6538_s0 + $0xa0] sm:$0xff] }
  0x69   :  { %v2114_v26 = vmax.f32 %v1248_v7, %v4757_v47  ;;  %v2401_v28 = vrot.slane %v2112_v42, 6  ;;  %v118_v45 = vsel %vm91_vm0, %v45_v49, -inf  ;;  %v2115_v38 = vmax.f32 %v1255_v10, %v4745_v23  ;;  %v48_v23 = vld [vmem:[%s6538_s0 + $0xa8] sm:$0xff] }
  0x6a   :  { %v1269_v31 = vmax.f32 %v1267_v48, %v1268_v12  ;;  %v2116_v41 = vmax.f32 %v1262_v11, %v4762_v5  ;;  %v2403_v14 = vrot.slane %v2113_v0, 5  ;;  %v2400_v33 = vsel %vm2351_vm3, %v2399_v27, %v2110_v43 }
  0x6b   :  { %v2405_v44 = vrot.slane %v2114_v26, 4  ;;  %v121_v40 = vsel %vm91_vm0, %v46_v24, -inf  ;;  %v188_v47 = vmax.f32 %v114_v18, %v45_v49  ;;  %v2402_v30 = vsel %vm2354_vm4, %v2401_v28, %v2400_v33 }
  0x6c   :  { %v2117_v5 = vmax.f32 %v1269_v31, %v1985_v37  ;;  %v2407_v52 = vrot.slane %v2115_v38, 3  ;;  %v2409_v53 = vrot.slane %v2116_v41, 2  ;;  %v2404_v54 = vsel %vm2357_vm5, %v2403_v14, %v2402_v30 }
  0x6d   :  { %v189_v55 = vmax.f32 %v117_v50, %v46_v24  ;;  %v257_v20 = vrot.slane %v188_v47, 7  ;;  %v119_v9 = vsel %vm91_vm0, %v47_v1, -inf  ;;  %v2406_v18 = vsel %vm2360_vm6, %v2405_v44, %v2404_v54 }
  0x6e   :  { %v2411_v19 = vrot.slane %v2117_v5, 1  ;;  %v120_v37 = vmax.f32 %v118_v45, %v119_v9  ;;  %v122_v56 = vsel %vm91_vm0, %v48_v23, -inf  ;;  %v2408_v35 = vsel %vm2363_vm7, %v2407_v52, %v2406_v18 }
  0x6f   :  { %v258_v25 = vrot.slane %v189_v55, 7  ;;  %v329_v39 = vsel %vm244_vm1, -inf, %v257_v20  ;;  %v123_v22 = vmax.f32 %v121_v40, %v122_v56  ;;  %v2410_v36 = vsel %vm2366_vm8, %v2409_v53, %v2408_v35 }
  0x70   :  { %v509_v57 = vcombine.high %v329_v39, %v329_v39  ;;  %v516_v46 = vrot.slane %v329_v39, %v4463_v32  ;;  %v4825_v16 = vsel %vm91_vm0, %v49_v6, -inf  ;;  %v2412_v13 = vsel %vm2369_vm9, %v2411_v19, %v2410_v36 }
  0x71   :  { %v259_v21 = vsel %vm244_vm1, %v257_v20, %v258_v25  ;;  %v4830_v58 = vsel %vm244_vm1, %v258_v25, -inf  ;;  %v4833_v15 = vsel %vm91_vm0, %v50_v17, -inf  ;;  %3981 = vmatmul.mubr.msk.f32.gmra.mrb[2].mxu0 %vm91_vm0, %v2412_v13  ;;  %v4847_v51 = vmax.f32 %v120_v37, %v49_v6 }
  0x72   :  { %v4837_v59 = vrot.slane %v509_v57, %v4463_v32  ;;  %v4839_v60 = vcombine.high %v516_v46, %v516_v46  ;;  %v526_v61 = vcombine.high %v259_v21, %v259_v21  ;;  %v4842_v62 = vrot.slane %v259_v21, %v4463_v32 }
  0x73   :  { %v1270_v29 = vsel %vm1045_vm2, %v516_v46, -inf  ;;  %v1992_v63 = vrot.slane %v4830_v58, %v4463_v32  ;;  %v4849_v2 = vmax.f32 %v123_v22, %v50_v17  ;;  %v260_v8 = vrot.slane %v4847_v51, 7 }
  0x74   :  { %v4853_v43 = vcombine.high %v4837_v59, %v4837_v59  ;;  %v4856_v34 = vrot.slane %v526_v61, %v4463_v32  ;;  %v4860_v3 = vcombine.high %v4842_v62, %v4842_v62  ;;  %v1271_v4 = vrot.slane %v1270_v29, 4 }
  0x75   :  { %v1277_v48 = vsel %vm1045_vm2, %v4839_v60, -inf  ;;  %v1284_v49 = vsel %vm1045_vm2, %v4837_v59, -inf  ;;  %v1298_v7 = vsel %vm1045_vm2, %v4842_v62, -inf  ;;  %vm2774_vm10 = vcmask 130048  }
  0x76   :  { %v4871_v42 = vcombine.high %v4856_v34, %v4856_v34  ;;  %v1272_v50 = vmax.f32 %v1270_v29, %v1271_v4  ;;  %v1278_v10 = vrot.slane %v1277_v48, 4  ;;  %v1285_v11 = vrot.slane %v1284_v49, 4 }
  0x77   :  { %v1291_v12 = vsel %vm1045_vm2, %v4853_v43, -inf  ;;  %v1299_v0 = vrot.slane %v1298_v7, 4  ;;  %v1305_v24 = vsel %vm1045_vm2, %v4860_v3, -inf  ;;  %v1312_v26 = vsel %vm1045_vm2, %v4856_v34, -inf }
  0x78   :  { %v1273_v27 = vrot.slane %v1272_v50, 2  ;;  %v1279_v28 = vmax.f32 %v1277_v48, %v1278_v10  ;;  %v1286_v45 = vmax.f32 %v1284_v49, %v1285_v11  ;;  %v1292_v31 = vrot.slane %v1291_v12, 4 }
  0x79   :  { %v1300_v38 = vmax.f32 %v1298_v7, %v1299_v0  ;;  %v1306_v41 = vrot.slane %v1305_v24, 4  ;;  %v1313_v14 = vrot.slane %v1312_v26, 4  ;;  %v1319_v1 = vsel %vm1045_vm2, %v4871_v42, -inf }
  0x7a   :  { %v1274_v33 = vmax.f32 %v1272_v50, %v1273_v27  ;;  %v1280_v44 = vrot.slane %v1279_v28, 2  ;;  %v1287_v40 = vrot.slane %v1286_v45, 2  ;;  %v1293_v47 = vmax.f32 %v1291_v12, %v1292_v31 }
  0x7b   :  { %v1301_v23 = vrot.slane %v1300_v38, 2  ;;  %v1307_v5 = vmax.f32 %v1305_v24, %v1306_v41  ;;  %v1314_v30 = vmax.f32 %v1312_v26, %v1313_v14  ;;  %v1320_v52 = vrot.slane %v1319_v1, 4 }
  0x7c   :  { %v1275_v53 = vrot.slane %v1274_v33, 1  ;;  %v1281_v54 = vmax.f32 %v1279_v28, %v1280_v44  ;;  %v1288_v55 = vmax.f32 %v1286_v45, %v1287_v40  ;;  %v1294_v20 = vrot.slane %v1293_v47, 2 }
  0x7d   :  { %v1302_v6 = vmax.f32 %v1300_v38, %v1301_v23  ;;  %v1308_v9 = vrot.slane %v1307_v5, 2  ;;  %v1315_v18 = vrot.slane %v1314_v30, 2  ;;  %v1321_v19 = vmax.f32 %v1319_v1, %v1320_v52 }
  0x7e   :  { %v1276_v17 = vmax.f32 %v1274_v33, %v1275_v53  ;;  %v1282_v37 = vrot.slane %v1281_v54, 1  ;;  %v1289_v56 = vrot.slane %v1288_v55, 1  ;;  %v1295_v35 = vmax.f32 %v1293_v47, %v1294_v20 }
  0x7f   :  { %v1303_v25 = vrot.slane %v1302_v6, 1  ;;  %v1309_v39 = vmax.f32 %v1307_v5, %v1308_v9  ;;  %v1316_v22 = vmax.f32 %v1314_v30, %v1315_v18  ;;  %v1322_v36 = vrot.slane %v1321_v19, 2 }
  0x80   :  { %v1283_v57 = vmax.f32 %v1281_v54, %v1282_v37  ;;  %v1290_v46 = vmax.f32 %v1288_v55, %v1289_v56  ;;  %v1296_v13 = vrot.slane %v1295_v35, 1  ;;  %v2118_v21 = vmax.f32 %v1276_v17, %v4839_v60 }
  0x81   :  { %v1304_v61 = vmax.f32 %v1302_v6, %v1303_v25  ;;  %v1310_v29 = vrot.slane %v1309_v39, 1  ;;  %v1317_v4 = vrot.slane %v1316_v22, 1  ;;  %v1323_v48 = vmax.f32 %v1321_v19, %v1322_v36 }
  0x82   :  { %v1297_v49 = vmax.f32 %v1295_v35, %v1296_v13  ;;  %v2119_v7 = vmax.f32 %v1283_v57, %v4837_v59  ;;  %v2120_v50 = vmax.f32 %v1290_v46, %v4853_v43  ;;  %v261_v10 = vrot.slane %v4849_v2, 7 }
  0x83   :  { %v1311_v11 = vmax.f32 %v1309_v39, %v1310_v29  ;;  %v1318_v12 = vmax.f32 %v1316_v22, %v1317_v4  ;;  %v1324_v0 = vrot.slane %v1323_v48, 1  ;;  %v2122_v24 = vmax.f32 %v1304_v61, %v4860_v3 }
  0x84   :  { %v2121_v26 = vmax.f32 %v1297_v49, %v4842_v62  ;;  %v2413_v27 = vrot.slane %v2119_v7, 7  ;;  %v2415_v60 = vrot.slane %v2120_v50, 6  ;;  %v262_v28 = vsel %vm244_vm1, %v260_v8, %v261_v10 }
  0x85   :  { %v1325_v45 = vmax.f32 %v1323_v48, %v1324_v0  ;;  %v2123_v59 = vmax.f32 %v1311_v11, %v4856_v34  ;;  %v2124_v43 = vmax.f32 %v1318_v12, %v4871_v42  ;;  %v2419_v31 = vrot.slane %v2122_v24, 4 }
  0x86   :  { %v2414_v2 = vsel %vm2351_vm3, %v2413_v27, %v2118_v21  ;;  %v2417_v38 = vrot.slane %v2121_v26, 5  ;;  %v330_v3 = vsel %vm244_vm1, -inf, %v260_v8  ;;  %v4897_v62 = vsel %vm244_vm1, %v261_v10, -inf }
  0x87   :  { %v2125_v41 = vmax.f32 %v1325_v45, %v1992_v63  ;;  %v2416_v14 = vsel %vm2354_vm4, %v2415_v60, %v2414_v2  ;;  %v2421_v34 = vrot.slane %v2123_v59, 3  ;;  %v2423_v1 = vrot.slane %v2124_v43, 2 }
  0x88   :  { %v2418_v42 = vsel %vm2357_vm5, %v2417_v38, %v2416_v14  ;;  %v543_v33 = vcombine.high %v330_v3, %v330_v3  ;;  %v550_v44 = vrot.slane %v330_v3, %v4463_v32  ;;  %v560_v40 = vcombine.high %v262_v28, %v262_v28 }
  0x89   :  { %v2420_v51 = vsel %vm2360_vm6, %v2419_v31, %v2418_v42  ;;  %v2425_v8 = vrot.slane %v2125_v41, 1  ;;  %v4907_v47 = vrot.slane %v262_v28, %v4463_v32  ;;  %v1999_v58 = vrot.slane %v4897_v62, %v4463_v32 }
  0x8a   :  { %v2422_v63 = vsel %vm2363_vm7, %v2421_v34, %v2420_v51  ;;  %v4913_v23 = vrot.slane %v543_v33, %v4463_v32  ;;  %v4915_v5 = vcombine.high %v550_v44, %v550_v44  ;;  %v4918_v30 = vrot.slane %v560_v40, %v4463_v32  ;;  %v51_v51 = vld [vmem:[%s6538_s0 + $0xc0] sm:$0xff] }
  0x8b   :  { %v2424_v52 = vsel %vm2366_vm8, %v2423_v1, %v2422_v63  ;;  %v4923_v53 = vcombine.high %v4907_v47, %v4907_v47  ;;  %v1326_v54 = vsel %vm1045_vm2, %v550_v44, -inf  ;;  %v1354_v55 = vsel %vm1045_vm2, %v4907_v47, -inf }
  0x8c   :  { %v2426_v20 = vsel %vm2369_vm9, %v2425_v8, %v2424_v52  ;;  %v4931_v6 = vcombine.high %v4913_v23, %v4913_v23  ;;  %v4935_v9 = vcombine.high %v4918_v30, %v4918_v30  ;;  %v1327_v18 = vrot.slane %v1326_v54, 4 }
  0x8d   :  { %3983 = vmatprep.mubr.msk.f32.mxu0 %vm91_vm0, %v2426_v20  ;;  %v1333_v19 = vsel %vm1045_vm2, %v4915_v5, -inf  ;;  %v1340_v17 = vsel %vm1045_vm2, %v4913_v23, -inf  ;;  %v1355_v37 = vrot.slane %v1354_v55, 4  ;;  %v1361_v56 = vsel %vm1045_vm2, %v4923_v53, -inf }
  0x8e   :  { %v1328_v35 = vmax.f32 %v1326_v54, %v1327_v18  ;;  %v1334_v25 = vrot.slane %v1333_v19, 4  ;;  %v1341_v39 = vrot.slane %v1340_v17, 4  ;;  %v1347_v22 = vsel %vm1045_vm2, %v4931_v6, -inf }
  0x8f   :  { %v1348_v36 = vrot.slane %v1347_v22, 4  ;;  %v1356_v57 = vmax.f32 %v1354_v55, %v1355_v37  ;;  %v1362_v46 = vrot.slane %v1361_v56, 4  ;;  %v1368_v13 = vsel %vm1045_vm2, %v4918_v30, -inf }
  0x90   :  { %v1329_v21 = vrot.slane %v1328_v35, 2  ;;  %v1335_v61 = vmax.f32 %v1333_v19, %v1334_v25  ;;  %v1342_v29 = vmax.f32 %v1340_v17, %v1341_v39  ;;  %v1369_v4 = vrot.slane %v1368_v13, 4 }
  0x91   :  { %v1349_v48 = vmax.f32 %v1347_v22, %v1348_v36  ;;  %v1357_v49 = vrot.slane %v1356_v57, 2  ;;  %v1363_v7 = vmax.f32 %v1361_v56, %v1362_v46  ;;  %v1375_v50 = vsel %vm1045_vm2, %v4935_v9, -inf  ;;  %v54_v46 = vld [vmem:[%s6538_s0 + $0xd8] sm:$0xff] }
  0x92   :  { %v1330_v10 = vmax.f32 %v1328_v35, %v1329_v21  ;;  %v1336_v11 = vrot.slane %v1335_v61, 2  ;;  %v1343_v12 = vrot.slane %v1342_v29, 2  ;;  %v1370_v0 = vmax.f32 %v1368_v13, %v1369_v4  ;;  %v52_v35 = vld [vmem:[%s6538_s0 + $0xc8] sm:$0xff] }
  0x93   :  { %v1350_v24 = vrot.slane %v1349_v48, 2  ;;  %v1358_v26 = vmax.f32 %v1356_v57, %v1357_v49  ;;  %v1364_v27 = vrot.slane %v1363_v7, 2  ;;  %v1376_v60 = vrot.slane %v1375_v50, 4 }
  0x94   :  { %v1331_v28 = vrot.slane %v1330_v10, 1  ;;  %v1337_v45 = vmax.f32 %v1335_v61, %v1336_v11  ;;  %v1344_v59 = vmax.f32 %v1342_v29, %v1343_v12  ;;  %v1371_v43 = vrot.slane %v1370_v0, 2  ;;  %v55_v29 = vld [vmem:[%s6538_s0 + $0xe0] sm:$0xff] }
  0x95   :  { %v1351_v31 = vmax.f32 %v1349_v48, %v1350_v24  ;;  %v1359_v2 = vrot.slane %v1358_v26, 1  ;;  %v1365_v38 = vmax.f32 %v1363_v7, %v1364_v27  ;;  %v1377_v3 = vmax.f32 %v1375_v50, %v1376_v60  ;;  %v59_v12 = vld [vmem:[%s6538_s0 + $0x100] sm:$0xff] }
  0x96   :  { %v1332_v41 = vmax.f32 %v1330_v10, %v1331_v28  ;;  %v1338_v14 = vrot.slane %v1337_v45, 1  ;;  %v1345_v34 = vrot.slane %v1344_v59, 1  ;;  %v1372_v1 = vmax.f32 %v1370_v0, %v1371_v43 }
  0x97   :  { %v1352_v42 = vrot.slane %v1351_v31, 1  ;;  %v1360_v33 = vmax.f32 %v1358_v26, %v1359_v2  ;;  %v1366_v44 = vrot.slane %v1365_v38, 1  ;;  %v1378_v40 = vrot.slane %v1377_v3, 2 }
  0x98   :  { %v1339_v8 = vmax.f32 %v1337_v45, %v1338_v14  ;;  %v1346_v63 = vmax.f32 %v1344_v59, %v1345_v34  ;;  %v1373_v52 = vrot.slane %v1372_v1, 1  ;;  %v2126_v54 = vmax.f32 %v1332_v41, %v4915_v5  ;;  %v58_v41 = vld [vmem:[%s6538_s0 + $0xf8] sm:$0xff]  ;;  %v5013_v34 = vld [vmem:[%s6538_s0 + $0x110] sm:$0xff] }
  0x99   :  { %v1353_v55 = vmax.f32 %v1351_v31, %v1352_v42  ;;  %v1367_v20 = vmax.f32 %v1365_v38, %v1366_v44  ;;  %v1379_v18 = vmax.f32 %v1377_v3, %v1378_v40  ;;  %v2130_v19 = vmax.f32 %v1360_v33, %v4923_v53  ;;  %v53_v53 = vld [vmem:[%s6538_s0 + $0xd0] sm:$0xff] }
  0x9a   :  { %v1374_v17 = vmax.f32 %v1372_v1, %v1373_v52  ;;  %v2127_v37 = vmax.f32 %v1339_v8, %v4913_v23  ;;  %v2128_v56 = vmax.f32 %v1346_v63, %v4931_v6  ;;  %v125_v25 = vsel %vm91_vm0, %v51_v51, -inf }
  0x9b   :  { %v1380_v39 = vrot.slane %v1379_v18, 1  ;;  %v2129_v22 = vmax.f32 %v1353_v55, %v4907_v47  ;;  %v2131_v5 = vmax.f32 %v1367_v20, %v4918_v30  ;;  %v2433_v36 = vrot.slane %v2130_v19, 4 }
  0x9c   :  { %v2132_v23 = vmax.f32 %v1374_v17, %v4935_v9  ;;  %v2427_v57 = vrot.slane %v2127_v37, 7  ;;  %v2429_v6 = vrot.slane %v2128_v56, 6  ;;  %v126_v13 = vmax.f32 %v4825_v16, %v125_v25  ;;  %v56_v9 = vld [vmem:[%s6538_s0 + $0xe8] sm:$0xff] }
  0x9d   :  { %v1381_v21 = vmax.f32 %v1379_v18, %v1380_v39  ;;  %v2431_v61 = vrot.slane %v2129_v22, 5  ;;  %v2435_v47 = vrot.slane %v2131_v5, 3  ;;  %v128_v30 = vsel %vm91_vm0, %v52_v35, -inf }
  0x9e   :  { %v2428_v4 = vsel %vm2351_vm3, %v2427_v57, %v2126_v54  ;;  %v2437_v48 = vrot.slane %v2132_v23, 2  ;;  %v129_v49 = vmax.f32 %v4833_v15, %v128_v30  ;;  %v130_v16 = vsel %vm91_vm0, %v53_v53, -inf  ;;  %v57_v15 = vld [vmem:[%s6538_s0 + $0xf0] sm:$0xff] }
  0x9f   :  { %v2133_v7 = vmax.f32 %v1381_v21, %v1999_v58  ;;  %v2430_v50 = vsel %vm2354_vm4, %v2429_v6, %v2428_v4  ;;  %v133_v10 = vsel %vm91_vm0, %v54_v46, -inf  ;;  %v192_v11 = vmax.f32 %v126_v13, %v53_v53  ;;  %v60_v58 = vld [vmem:[%s6538_s0 + $0x108] sm:$0xff] }
  0xa0   :  { %v2432_v0 = vsel %vm2357_vm5, %v2431_v61, %v2430_v50  ;;  %v193_v24 = vmax.f32 %v129_v49, %v54_v46  ;;  %v131_v26 = vsel %vm91_vm0, %v55_v29, -inf  ;;  %v134_v62 = vsel %vm91_vm0, %v56_v9, -inf }
  0xa1   :  { %v2434_v27 = vsel %vm2360_vm6, %v2433_v36, %v2432_v0  ;;  %v2439_v60 = vrot.slane %v2133_v7, 1  ;;  %v263_v28 = vrot.slane %v192_v11, 7  ;;  %v132_v45 = vmax.f32 %v130_v16, %v131_v26 }
  0xa2   :  { %v2436_v59 = vsel %vm2363_vm7, %v2435_v47, %v2434_v27  ;;  %v264_v43 = vrot.slane %v193_v24, 7  ;;  %v135_v31 = vmax.f32 %v133_v10, %v134_v62  ;;  %v5001_v2 = vsel %vm91_vm0, %v59_v12, -inf }
  0xa3   :  { %v2438_v38 = vsel %vm2366_vm8, %v2437_v48, %v2436_v59  ;;  %v331_v3 = vsel %vm244_vm1, -inf, %v263_v28  ;;  %v5008_v14 = vmax.f32 %v132_v45, %v57_v15  ;;  %v5016_v1 = vsel %vm91_vm0, %v60_v58, -inf }
  0xa4   :  { %v2440_v42 = vsel %vm2369_vm9, %v2439_v60, %v2438_v38  ;;  %v265_v33 = vsel %vm244_vm1, %v263_v28, %v264_v43  ;;  %v5021_v44 = vsel %vm244_vm1, %v264_v43, -inf  ;;  %v577_v40 = vcombine.high %v331_v3, %v331_v3 }
  0xa5   :  { %3984 = vmatmul.mubr.msk.f32.gmra.mrb[4].mxu0 %vm91_vm0, %v2440_v42  ;;  %v584_v51 = vrot.slane %v331_v3, %v4463_v32  ;;  %v594_v8 = vcombine.high %v265_v33, %v265_v33  ;;  %v5026_v63 = vrot.slane %v265_v33, %v4463_v32  ;;  %v2006_v52 = vrot.slane %v5021_v44, %v4463_v32 }
  0xa6   :  { %v5031_v54 = vrot.slane %v577_v40, %v4463_v32  ;;  %v5033_v55 = vmax.f32 %v135_v31, %v58_v41  ;;  %v266_v20 = vrot.slane %v5008_v14, 7  ;;  %v5038_v18 = vsel %vm91_vm0, %v5013_v34, -inf }
  0xa7   :  { %v5040_v19 = vcombine.high %v584_v51, %v584_v51  ;;  %v5043_v17 = vrot.slane %v594_v8, %v4463_v32  ;;  %v5047_v37 = vcombine.high %v5026_v63, %v5026_v63  ;;  %v1382_v56 = vsel %vm1045_vm2, %v584_v51, -inf }
  0xa8   :  { %v593_v35 = vcombine.high %v5031_v54, %v5031_v54  ;;  %v1383_v25 = vrot.slane %v1382_v56, 4  ;;  %v1396_v39 = vsel %vm1045_vm2, %v5031_v54, -inf  ;;  %v1410_v22 = vsel %vm1045_vm2, %v5026_v63, -inf }
  0xa9   :  { %v5058_v5 = vcombine.high %v5043_v17, %v5043_v17  ;;  %v1389_v36 = vsel %vm1045_vm2, %v5040_v19, -inf  ;;  %v1397_v53 = vrot.slane %v1396_v39, 4  ;;  %v1411_v23 = vrot.slane %v1410_v22, 4 }
  0xaa   :  { %v1384_v57 = vmax.f32 %v1382_v56, %v1383_v25  ;;  %v1390_v6 = vrot.slane %v1389_v36, 4  ;;  %v1403_v46 = vsel %vm1045_vm2, %v593_v35, -inf  ;;  %v1417_v13 = vsel %vm1045_vm2, %v5047_v37, -inf }
  0xab   :  { %v1398_v21 = vmax.f32 %v1396_v39, %v1397_v53  ;;  %v1404_v61 = vrot.slane %v1403_v46, 4  ;;  %v1412_v47 = vmax.f32 %v1410_v22, %v1411_v23  ;;  %v1418_v30 = vrot.slane %v1417_v13, 4 }
  0xac   :  { %v1385_v29 = vrot.slane %v1384_v57, 2  ;;  %v1391_v9 = vmax.f32 %v1389_v36, %v1390_v6  ;;  %v1424_v4 = vsel %vm1045_vm2, %v5043_v17, -inf  ;;  %v1431_v48 = vsel %vm1045_vm2, %v5058_v5, -inf }
  0xad   :  { %v1399_v49 = vrot.slane %v1398_v21, 2  ;;  %v1405_v16 = vmax.f32 %v1403_v46, %v1404_v61  ;;  %v1413_v7 = vrot.slane %v1412_v47, 2  ;;  %v1419_v50 = vmax.f32 %v1417_v13, %v1418_v30 }
  0xae   :  { %v1386_v10 = vmax.f32 %v1384_v57, %v1385_v29  ;;  %v1392_v11 = vrot.slane %v1391_v9, 2  ;;  %v1425_v12 = vrot.slane %v1424_v4, 4  ;;  %v1432_v0 = vrot.slane %v1431_v48, 4 }
  0xaf   :  { %v1400_v24 = vmax.f32 %v1398_v21, %v1399_v49  ;;  %v1406_v15 = vrot.slane %v1405_v16, 2  ;;  %v1414_v26 = vmax.f32 %v1412_v47, %v1413_v7  ;;  %v1420_v62 = vrot.slane %v1419_v50, 2 }
  0xb0   :  { %v1387_v58 = vrot.slane %v1386_v10, 1  ;;  %v1393_v27 = vmax.f32 %v1391_v9, %v1392_v11  ;;  %v1426_v60 = vmax.f32 %v1424_v4, %v1425_v12  ;;  %v1433_v28 = vmax.f32 %v1431_v48, %v1432_v0 }
  0xb1   :  { %v1401_v45 = vrot.slane %v1400_v24, 1  ;;  %v1407_v59 = vmax.f32 %v1405_v16, %v1406_v15  ;;  %v1415_v43 = vrot.slane %v1414_v26, 1  ;;  %v1421_v31 = vmax.f32 %v1419_v50, %v1420_v62 }
  0xb2   :  { %v1388_v38 = vmax.f32 %v1386_v10, %v1387_v58  ;;  %v1394_v3 = vrot.slane %v1393_v27, 1  ;;  %v1427_v41 = vrot.slane %v1426_v60, 2  ;;  %v1434_v42 = vrot.slane %v1433_v28, 2 }
  0xb3   :  { %v1402_v33 = vmax.f32 %v1400_v24, %v1401_v45  ;;  %v1408_v40 = vrot.slane %v1407_v59, 1  ;;  %v1416_v51 = vmax.f32 %v1414_v26, %v1415_v43  ;;  %v1422_v8 = vrot.slane %v1421_v31, 1 }
  0xb4   :  { %v1395_v56 = vmax.f32 %v1393_v27, %v1394_v3  ;;  %v1428_v25 = vmax.f32 %v1426_v60, %v1427_v41  ;;  %v1435_v39 = vmax.f32 %v1433_v28, %v1434_v42  ;;  %v2134_v22 = vmax.f32 %v1388_v38, %v5040_v19 }
  0xb5   :  { %v1409_v36 = vmax.f32 %v1407_v59, %v1408_v40  ;;  %v1423_v53 = vmax.f32 %v1421_v31, %v1422_v8  ;;  %v2136_v23 = vmax.f32 %v1402_v33, %v593_v35  ;;  %v2138_v57 = vmax.f32 %v1416_v51, %v5047_v37 }
  0xb6   :  { %v1429_v6 = vrot.slane %v1428_v25, 1  ;;  %v1436_v46 = vrot.slane %v1435_v39, 1  ;;  %v2135_v13 = vmax.f32 %v1395_v56, %v5031_v54  ;;  %v267_v21 = vrot.slane %v5033_v55, 7 }
  0xb7   :  { %v2137_v61 = vmax.f32 %v1409_v36, %v5026_v63  ;;  %v2139_v47 = vmax.f32 %v1423_v53, %v5043_v17  ;;  %v2443_v30 = vrot.slane %v2136_v23, 6  ;;  %v2447_v29 = vrot.slane %v2138_v57, 4 }
  0xb8   :  { %v1430_v9 = vmax.f32 %v1428_v25, %v1429_v6  ;;  %v1437_v4 = vmax.f32 %v1435_v39, %v1436_v46  ;;  %v2441_v19 = vrot.slane %v2135_v13, 7  ;;  %v268_v35 = vsel %vm244_vm1, %v266_v20, %v267_v21 }
  0xb9   :  { %v2445_v37 = vrot.slane %v2137_v61, 5  ;;  %v2449_v48 = vrot.slane %v2139_v47, 3  ;;  %v332_v54 = vsel %vm244_vm1, -inf, %v266_v20  ;;  %v5082_v55 = vsel %vm244_vm1, %v267_v21, -inf }
  0xba   :  { %v2140_v63 = vmax.f32 %v1430_v9, %v5058_v5  ;;  %v2141_v17 = vmax.f32 %v1437_v4, %v2006_v52  ;;  %v2442_v49 = vsel %vm2351_vm3, %v2441_v19, %v2134_v22  ;;  %v611_v16 = vcombine.high %v332_v54, %v332_v54 }
  0xbb   :  { %v2444_v7 = vsel %vm2354_vm4, %v2443_v30, %v2442_v49  ;;  %v618_v50 = vrot.slane %v332_v54, %v4463_v32  ;;  %v628_v10 = vcombine.high %v268_v35, %v268_v35  ;;  %v5092_v14 = vrot.slane %v268_v35, %v4463_v32 }
  0xbc   :  { %v2446_v20 = vsel %vm2357_vm5, %v2445_v37, %v2444_v7  ;;  %v2451_v11 = vrot.slane %v2140_v63, 2  ;;  %v2453_v12 = vrot.slane %v2141_v17, 1  ;;  %v5096_v5 = vrot.slane %v611_v16, %v4463_v32 }
  0xbd   :  { %v2448_v44 = vsel %vm2360_vm6, %v2447_v29, %v2446_v20  ;;  %v5099_v52 = vcombine.high %v618_v50, %v618_v50  ;;  %v5102_v0 = vrot.slane %v628_v10, %v4463_v32  ;;  %v5106_v24 = vcombine.high %v5092_v14, %v5092_v14 }
  0xbe   :  { %v2450_v15 = vsel %vm2363_vm7, %v2449_v48, %v2448_v44  ;;  %v5111_v26 = vcombine.high %v5096_v5, %v5096_v5  ;;  %v1438_v62 = vsel %vm1045_vm2, %v618_v50, -inf  ;;  %v1452_v58 = vsel %vm1045_vm2, %v5096_v5, -inf }
  0xbf   :  { %v2452_v27 = vsel %vm2366_vm8, %v2451_v11, %v2450_v15  ;;  %v5119_v60 = vcombine.high %v5102_v0, %v5102_v0  ;;  %v1439_v28 = vrot.slane %v1438_v62, 4  ;;  %v1445_v45 = vsel %vm1045_vm2, %v5099_v52, -inf }
  0xc0   :  { %v2454_v59 = vsel %vm2369_vm9, %v2453_v12, %v2452_v27  ;;  %v1446_v43 = vrot.slane %v1445_v45, 4  ;;  %v1453_v31 = vrot.slane %v1452_v58, 4  ;;  %v1459_v38 = vsel %vm1045_vm2, %v5111_v26, -inf  ;;  %v62_v27 = vld [vmem:[%s6538_s0 + $0x118] sm:$0xff] }
  0xc1   :  { %3986 = vmatprep.mubr.msk.f32.mxu0 %vm91_vm0, %v2454_v59  ;;  %v1440_v3 = vmax.f32 %v1438_v62, %v1439_v28  ;;  %v1460_v41 = vrot.slane %v1459_v38, 4  ;;  %v1466_v42 = vsel %vm1045_vm2, %v5092_v14, -inf  ;;  %v1473_v33 = vsel %vm1045_vm2, %v5106_v24, -inf }
  0xc2   :  { %v1447_v40 = vmax.f32 %v1445_v45, %v1446_v43  ;;  %v1454_v51 = vmax.f32 %v1452_v58, %v1453_v31  ;;  %v1467_v8 = vrot.slane %v1466_v42, 4  ;;  %v1474_v56 = vrot.slane %v1473_v33, 4 }
  0xc3   :  { %v1441_v25 = vrot.slane %v1440_v3, 2  ;;  %v1461_v39 = vmax.f32 %v1459_v38, %v1460_v41  ;;  %v1480_v22 = vsel %vm1045_vm2, %v5102_v0, -inf  ;;  %v1487_v36 = vsel %vm1045_vm2, %v5119_v60, -inf }
  0xc4   :  { %v1448_v53 = vrot.slane %v1447_v40, 2  ;;  %v1455_v23 = vrot.slane %v1454_v51, 2  ;;  %v1468_v57 = vmax.f32 %v1466_v42, %v1467_v8  ;;  %v1475_v6 = vmax.f32 %v1473_v33, %v1474_v56 }
  0xc5   :  { %v1442_v46 = vmax.f32 %v1440_v3, %v1441_v25  ;;  %v1462_v13 = vrot.slane %v1461_v39, 2  ;;  %v1481_v21 = vrot.slane %v1480_v22, 4  ;;  %v1488_v61 = vrot.slane %v1487_v36, 4 }
  0xc6   :  { %v1449_v47 = vmax.f32 %v1447_v40, %v1448_v53  ;;  %v1456_v30 = vmax.f32 %v1454_v51, %v1455_v23  ;;  %v1469_v29 = vrot.slane %v1468_v57, 2  ;;  %v1476_v9 = vrot.slane %v1475_v6, 2 }
  0xc7   :  { %v1443_v4 = vrot.slane %v1442_v46, 1  ;;  %v1463_v19 = vmax.f32 %v1461_v39, %v1462_v13  ;;  %v1482_v35 = vmax.f32 %v1480_v22, %v1481_v21  ;;  %v1489_v37 = vmax.f32 %v1487_v36, %v1488_v61 }
  0xc8   :  { %v1450_v48 = vrot.slane %v1449_v47, 1  ;;  %v1457_v54 = vrot.slane %v1456_v30, 1  ;;  %v1470_v63 = vmax.f32 %v1468_v57, %v1469_v29  ;;  %v1477_v17 = vmax.f32 %v1475_v6, %v1476_v9 }
  0xc9   :  { %v1444_v49 = vmax.f32 %v1442_v46, %v1443_v4  ;;  %v1464_v16 = vrot.slane %v1463_v19, 1  ;;  %v1483_v7 = vrot.slane %v1482_v35, 2  ;;  %v1490_v50 = vrot.slane %v1489_v37, 2 }
  0xca   :  { %v1451_v10 = vmax.f32 %v1449_v47, %v1450_v48  ;;  %v1458_v20 = vmax.f32 %v1456_v30, %v1457_v54  ;;  %v1471_v11 = vrot.slane %v1470_v63, 1  ;;  %v1478_v12 = vrot.slane %v1477_v17, 1  ;;  %v5179_v47 = vld [vmem:[%s6538_s0 + $0x138] sm:$0xff] }
  0xcb   :  { %v1465_v44 = vmax.f32 %v1463_v19, %v1464_v16  ;;  %v1484_v15 = vmax.f32 %v1482_v35, %v1483_v7  ;;  %v1491_v62 = vmax.f32 %v1489_v37, %v1490_v50  ;;  %v2013_v58 = vrot.slane %v5082_v55, %v4463_v32 }
  0xcc   :  { %v1472_v28 = vmax.f32 %v1470_v63, %v1471_v11  ;;  %v1479_v45 = vmax.f32 %v1477_v17, %v1478_v12  ;;  %v2142_v59 = vmax.f32 %v1444_v49, %v5099_v52  ;;  %v2143_v43 = vmax.f32 %v1451_v10, %v5096_v5  ;;  %v63_v5 = vld [vmem:[%s6538_s0 + $0x120] sm:$0xff] }
  0xcd   :  { %v1485_v31 = vrot.slane %v1484_v15, 1  ;;  %v1492_v38 = vrot.slane %v1491_v62, 1  ;;  %v2144_v3 = vmax.f32 %v1458_v20, %v5111_v26  ;;  %v2145_v41 = vmax.f32 %v1465_v44, %v5092_v14  ;;  %v64_v14 = vld [vmem:[%s6538_s0 + $0x128] sm:$0xff] }
  0xce   :  { %v2146_v42 = vmax.f32 %v1472_v28, %v5106_v24  ;;  %v2147_v55 = vmax.f32 %v1479_v45, %v5102_v0  ;;  %v2455_v33 = vrot.slane %v2143_v43, 7  ;;  %v5147_v40 = vsel %vm91_vm0, %v62_v27, -inf }
  0xcf   :  { %v1486_v51 = vmax.f32 %v1484_v15, %v1485_v31  ;;  %v1493_v8 = vmax.f32 %v1491_v62, %v1492_v38  ;;  %v2457_v56 = vrot.slane %v2144_v3, 6  ;;  %v2459_v52 = vrot.slane %v2145_v41, 5 }
  0xd0   :  { %v2456_v24 = vsel %vm2351_vm3, %v2455_v33, %v2142_v59  ;;  %v2461_v26 = vrot.slane %v2146_v42, 4  ;;  %v2463_v0 = vrot.slane %v2147_v55, 3  ;;  %v196_v25 = vmax.f32 %v5001_v2, %v5013_v34 }
  0xd1   :  { %v2148_v39 = vmax.f32 %v1486_v51, %v5119_v60  ;;  %v2149_v22 = vmax.f32 %v1493_v8, %v2013_v58  ;;  %v2458_v36 = vsel %vm2354_vm4, %v2457_v56, %v2456_v24  ;;  %v197_v53 = vmax.f32 %v5016_v1, %v62_v27  ;;  %v5174_v1 = vld [vmem:[%s6538_s0 + $0x130] sm:$0xff] }
  0xd2   :  { %v2460_v23 = vsel %vm2357_vm5, %v2459_v52, %v2458_v36  ;;  %v269_v57 = vrot.slane %v196_v25, 7  ;;  %v5163_v6 = vsel %vm91_vm0, %v63_v5, -inf  ;;  %v5166_v46 = vsel %vm91_vm0, %v64_v14, -inf }
  0xd3   :  { %v2462_v13 = vsel %vm2360_vm6, %v2461_v26, %v2460_v23  ;;  %v2465_v21 = vrot.slane %v2148_v39, 2  ;;  %v2467_v2 = vrot.slane %v2149_v22, 1  ;;  %v270_v34 = vrot.slane %v197_v53, 7 }
  0xd4   :  { %v2464_v60 = vsel %vm2363_vm7, %v2463_v0, %v2462_v13  ;;  %v333_v61 = vsel %vm244_vm1, -inf, %v269_v57  ;;  %v140_v30 = vmax.f32 %v5038_v18, %v5163_v6  ;;  %v143_v29 = vmax.f32 %v5147_v40, %v5166_v46  ;;  %v68_v18 = vld [vmem:[%s6538_s0 + $0x148] sm:$0xff] }
  0xd5   :  { %v2466_v9 = vsel %vm2366_vm8, %v2465_v21, %v2464_v60  ;;  %v271_v4 = vsel %vm244_vm1, %v269_v57, %v270_v34  ;;  %v5188_v19 = vsel %vm244_vm1, %v270_v34, -inf  ;;  %v645_v35 = vcombine.high %v333_v61, %v333_v61 }
  0xd6   :  { %v2468_v37 = vsel %vm2369_vm9, %v2467_v2, %v2466_v9  ;;  %v652_v48 = vrot.slane %v333_v61, %v4463_v32  ;;  %v662_v54 = vcombine.high %v271_v4, %v271_v4  ;;  %v5193_v63 = vrot.slane %v271_v4, %v4463_v32 }
  0xd7   :  { %3987 = vmatmul.mubr.msk.f32.gmra.mrb[6].mxu0 %vm91_vm0, %v2468_v37  ;;  %v5197_v17 = vrot.slane %v645_v35, %v4463_v32  ;;  %v2020_v49 = vrot.slane %v5188_v19, %v4463_v32  ;;  %v5203_v16 = vsel %vm91_vm0, %v5174_v1, -inf  ;;  %v5207_v7 = vsel %vm91_vm0, %v5179_v47, -inf }
  0xd8   :  { %v5209_v50 = vcombine.high %v652_v48, %v652_v48  ;;  %v5212_v10 = vrot.slane %v662_v54, %v4463_v32  ;;  %v5216_v20 = vcombine.high %v5193_v63, %v5193_v63  ;;  %v1494_v11 = vsel %vm1045_vm2, %v652_v48, -inf }
  0xd9   :  { %v5221_v12 = vcombine.high %v5197_v17, %v5197_v17  ;;  %v1495_v44 = vrot.slane %v1494_v11, 4  ;;  %v1508_v15 = vsel %vm1045_vm2, %v5197_v17, -inf  ;;  %v1522_v62 = vsel %vm1045_vm2, %v5193_v63, -inf }
  0xda   :  { %v5229_v58 = vcombine.high %v5212_v10, %v5212_v10  ;;  %v1501_v27 = vsel %vm1045_vm2, %v5209_v50, -inf  ;;  %v1509_v28 = vrot.slane %v1508_v15, 4  ;;  %v1523_v45 = vrot.slane %v1522_v62, 4 }
  0xdb   :  { %v1496_v59 = vmax.f32 %v1494_v11, %v1495_v44  ;;  %v1502_v43 = vrot.slane %v1501_v27, 4  ;;  %v1515_v31 = vsel %vm1045_vm2, %v5221_v12, -inf  ;;  %v1529_v38 = vsel %vm1045_vm2, %v5216_v20, -inf }
  0xdc   :  { %v1510_v3 = vmax.f32 %v1508_v15, %v1509_v28  ;;  %v1516_v41 = vrot.slane %v1515_v31, 4  ;;  %v1524_v42 = vmax.f32 %v1522_v62, %v1523_v45  ;;  %v1530_v55 = vrot.slane %v1529_v38, 4 }
  0xdd   :  { %v1497_v33 = vrot.slane %v1496_v59, 2  ;;  %v1503_v51 = vmax.f32 %v1501_v27, %v1502_v43  ;;  %v1536_v8 = vsel %vm1045_vm2, %v5212_v10, -inf  ;;  %v1543_v56 = vsel %vm1045_vm2, %v5229_v58, -inf }
  0xde   :  { %v1511_v52 = vrot.slane %v1510_v3, 2  ;;  %v1517_v5 = vmax.f32 %v1515_v31, %v1516_v41  ;;  %v1525_v14 = vrot.slane %v1524_v42, 2  ;;  %v1531_v24 = vmax.f32 %v1529_v38, %v1530_v55 }
  0xdf   :  { %v1498_v26 = vmax.f32 %v1496_v59, %v1497_v33  ;;  %v1504_v0 = vrot.slane %v1503_v51, 2  ;;  %v1537_v25 = vrot.slane %v1536_v8, 4  ;;  %v1544_v39 = vrot.slane %v1543_v56, 4  ;;  %v67_v33 = vld [vmem:[%s6538_s0 + $0x140] sm:$0xff] }
  0xe0   :  { %v1512_v22 = vmax.f32 %v1510_v3, %v1511_v52  ;;  %v1518_v36 = vrot.slane %v1517_v5, 2  ;;  %v1526_v53 = vmax.f32 %v1524_v42, %v1525_v14  ;;  %v1532_v23 = vrot.slane %v1531_v24, 2 }
  0xe1   :  { %v1499_v57 = vrot.slane %v1498_v26, 1  ;;  %v1505_v13 = vmax.f32 %v1503_v51, %v1504_v0  ;;  %v1538_v21 = vmax.f32 %v1536_v8, %v1537_v25  ;;  %v1545_v2 = vmax.f32 %v1543_v56, %v1544_v39 }
  0xe2   :  { %v1513_v34 = vrot.slane %v1512_v22, 1  ;;  %v1519_v60 = vmax.f32 %v1517_v5, %v1518_v36  ;;  %v1527_v61 = vrot.slane %v1526_v53, 1  ;;  %v1533_v9 = vmax.f32 %v1531_v24, %v1532_v23 }
  0xe3   :  { %v1500_v4 = vmax.f32 %v1498_v26, %v1499_v57  ;;  %v1506_v35 = vrot.slane %v1505_v13, 1  ;;  %v1539_v37 = vrot.slane %v1538_v21, 2  ;;  %v1546_v48 = vrot.slane %v1545_v2, 2 }
  0xe4   :  { %v1514_v54 = vmax.f32 %v1512_v22, %v1513_v34  ;;  %v1520_v11 = vrot.slane %v1519_v60, 1  ;;  %v1528_v44 = vmax.f32 %v1526_v53, %v1527_v61  ;;  %v1534_v15 = vrot.slane %v1533_v9, 1 }
  0xe5   :  { %v1507_v62 = vmax.f32 %v1505_v13, %v1506_v35  ;;  %v1540_v27 = vmax.f32 %v1538_v21, %v1539_v37  ;;  %v1547_v28 = vmax.f32 %v1545_v2, %v1546_v48  ;;  %v2150_v45 = vmax.f32 %v1500_v4, %v5209_v50 }
  0xe6   :  { %v1521_v59 = vmax.f32 %v1519_v60, %v1520_v11  ;;  %v1535_v43 = vmax.f32 %v1533_v9, %v1534_v15  ;;  %v2152_v31 = vmax.f32 %v1514_v54, %v5221_v12  ;;  %v2154_v38 = vmax.f32 %v1528_v44, %v5216_v20 }
  0xe7   :  { %v1541_v3 = vrot.slane %v1540_v27, 1  ;;  %v1548_v41 = vrot.slane %v1547_v28, 1  ;;  %v2151_v42 = vmax.f32 %v1507_v62, %v5197_v17  ;;  %v198_v55 = vmax.f32 %v140_v30, %v5174_v1 }
  0xe8   :  { %v2153_v50 = vmax.f32 %v1521_v59, %v5193_v63  ;;  %v2155_v51 = vmax.f32 %v1535_v43, %v5212_v10  ;;  %v2471_v12 = vrot.slane %v2152_v31, 6  ;;  %v2475_v8 = vrot.slane %v2154_v38, 4 }
  0xe9   :  { %v1542_v20 = vmax.f32 %v1540_v27, %v1541_v3  ;;  %v1549_v56 = vmax.f32 %v1547_v28, %v1548_v41  ;;  %v2469_v52 = vrot.slane %v2151_v42, 7  ;;  %v199_v17 = vmax.f32 %v143_v29, %v5179_v47 }
  0xea   :  { %v2473_v6 = vrot.slane %v2153_v50, 5  ;;  %v2477_v1 = vrot.slane %v2155_v51, 3  ;;  %v272_v30 = vrot.slane %v198_v55, 7  ;;  %v5262_v63 = vsel %vm91_vm0, %v67_v33, -inf }
  0xeb   :  { %v2156_v10 = vmax.f32 %v1542_v20, %v5229_v58  ;;  %v2157_v5 = vmax.f32 %v1549_v56, %v2020_v49  ;;  %v2470_v14 = vsel %vm2351_vm3, %v2469_v52, %v2150_v45  ;;  %v273_v40 = vrot.slane %v199_v17, 7 }
  0xec   :  { %v2472_v46 = vsel %vm2354_vm4, %v2471_v12, %v2470_v14  ;;  %v334_v47 = vsel %vm244_vm1, -inf, %v272_v30  ;;  %v146_v29 = vmax.f32 %v5203_v16, %v5262_v63  ;;  %v5274_v24 = vsel %vm91_vm0, %v68_v18, -inf  ;;  %v73_v16 = vld [vmem:[%s6538_s0 + $0x170] sm:$0xff] }
  0xed   :  { %v2474_v26 = vsel %vm2357_vm5, %v2473_v6, %v2472_v46  ;;  %v2479_v58 = vrot.slane %v2156_v10, 2  ;;  %v2481_v0 = vrot.slane %v2157_v5, 1  ;;  %v274_v19 = vsel %vm244_vm1, %v272_v30, %v273_v40 }
  0xee   :  { %v2476_v49 = vsel %vm2360_vm6, %v2475_v8, %v2474_v26  ;;  %v5280_v25 = vsel %vm244_vm1, %v273_v40, -inf  ;;  %v679_v39 = vcombine.high %v334_v47, %v334_v47  ;;  %v686_v22 = vrot.slane %v334_v47, %v4463_v32 }
  0xef   :  { %v2478_v36 = vsel %vm2363_vm7, %v2477_v1, %v2476_v49  ;;  %v696_v53 = vcombine.high %v274_v19, %v274_v19  ;;  %v5285_v23 = vrot.slane %v274_v19, %v4463_v32  ;;  %v2027_v57 = vrot.slane %v5280_v25, %v4463_v32  ;;  %v74_v25 = vld [vmem:[%s6538_s0 + $0x178] sm:$0xff] }
  0xf0   :  { %v2480_v13 = vsel %vm2366_vm8, %v2479_v58, %v2478_v36  ;;  %v5291_v21 = vrot.slane %v679_v39, %v4463_v32  ;;  %v5293_v2 = vcombine.high %v686_v22, %v686_v22  ;;  %v1550_v34 = vsel %vm1045_vm2, %v686_v22, -inf }
  0xf1   :  { %v2482_v60 = vsel %vm2369_vm9, %v2481_v0, %v2480_v13  ;;  %v5298_v61 = vrot.slane %v696_v53, %v4463_v32  ;;  %v5302_v9 = vcombine.high %v5285_v23, %v5285_v23  ;;  %v1551_v4 = vrot.slane %v1550_v34, 4 }
  0xf2   :  { %3989 = vmatprep.mubr.msk.f32.mxu0 %vm91_vm0, %v2482_v60  ;;  %v5307_v35 = vcombine.high %v5291_v21, %v5291_v21  ;;  %v1557_v37 = vsel %vm1045_vm2, %v5293_v2, -inf  ;;  %v1564_v48 = vsel %vm1045_vm2, %v5291_v21, -inf  ;;  %v1578_v54 = vsel %vm1045_vm2, %v5285_v23, -inf }
  0xf3   :  { %v5317_v11 = vcombine.high %v5298_v61, %v5298_v61  ;;  %v1552_v44 = vmax.f32 %v1550_v34, %v1551_v4  ;;  %v1558_v15 = vrot.slane %v1557_v37, 4  ;;  %v1565_v62 = vrot.slane %v1564_v48, 4 }
  0xf4   :  { %v1571_v27 = vsel %vm1045_vm2, %v5307_v35, -inf  ;;  %v1579_v28 = vrot.slane %v1578_v54, 4  ;;  %v1585_v45 = vsel %vm1045_vm2, %v5302_v9, -inf  ;;  %v1592_v59 = vsel %vm1045_vm2, %v5298_v61, -inf }
  0xf5   :  { %v1553_v43 = vrot.slane %v1552_v44, 2  ;;  %v1559_v31 = vmax.f32 %v1557_v37, %v1558_v15  ;;  %v1566_v38 = vmax.f32 %v1564_v48, %v1565_v62  ;;  %v1572_v3 = vrot.slane %v1571_v27, 4  ;;  %v69_v48 = vld [vmem:[%s6538_s0 + $0x150] sm:$0xff] }
  0xf6   :  { %v1580_v41 = vmax.f32 %v1578_v54, %v1579_v28  ;;  %v1586_v42 = vrot.slane %v1585_v45, 4  ;;  %v1593_v55 = vrot.slane %v1592_v59, 4  ;;  %v1599_v33 = vsel %vm1045_vm2, %v5317_v11, -inf }
  0xf7   :  { %v1554_v50 = vmax.f32 %v1552_v44, %v1553_v43  ;;  %v1560_v51 = vrot.slane %v1559_v31, 2  ;;  %v1567_v12 = vrot.slane %v1566_v38, 2  ;;  %v1573_v8 = vmax.f32 %v1571_v27, %v1572_v3 }
  0xf8   :  { %v1581_v20 = vrot.slane %v1580_v41, 2  ;;  %v1587_v56 = vmax.f32 %v1585_v45, %v1586_v42  ;;  %v1594_v52 = vmax.f32 %v1592_v59, %v1593_v55  ;;  %v1600_v17 = vrot.slane %v1599_v33, 4  ;;  %v70_v59 = vld [vmem:[%s6538_s0 + $0x158] sm:$0xff] }
  0xf9   :  { %v1555_v18 = vrot.slane %v1554_v50, 1  ;;  %v1561_v6 = vmax.f32 %v1559_v31, %v1560_v51  ;;  %v1568_v1 = vmax.f32 %v1566_v38, %v1567_v12  ;;  %v1574_v30 = vrot.slane %v1573_v8, 2 }
  0xfa   :  { %v1582_v10 = vmax.f32 %v1580_v41, %v1581_v20  ;;  %v1588_v5 = vrot.slane %v1587_v56, 2  ;;  %v1595_v14 = vrot.slane %v1594_v52, 2  ;;  %v1601_v40 = vmax.f32 %v1599_v33, %v1600_v17 }
  0xfb   :  { %v1556_v46 = vmax.f32 %v1554_v50, %v1555_v18  ;;  %v1562_v47 = vrot.slane %v1561_v6, 1  ;;  %v1569_v26 = vrot.slane %v1568_v1, 1  ;;  %v1575_v58 = vmax.f32 %v1573_v8, %v1574_v30 }
  0xfc   :  { %v1583_v0 = vrot.slane %v1582_v10, 1  ;;  %v1589_v19 = vmax.f32 %v1587_v56, %v1588_v5  ;;  %v1596_v49 = vmax.f32 %v1594_v52, %v1595_v14  ;;  %v1602_v39 = vrot.slane %v1601_v40, 2 }
  0xfd   :  { %v1563_v22 = vmax.f32 %v1561_v6, %v1562_v47  ;;  %v1570_v36 = vmax.f32 %v1568_v1, %v1569_v26  ;;  %v1576_v53 = vrot.slane %v1575_v58, 1  ;;  %v2158_v13 = vmax.f32 %v1556_v46, %v5293_v2 }
  0xfe   :  { %v1584_v34 = vmax.f32 %v1582_v10, %v1583_v0  ;;  %v1590_v60 = vrot.slane %v1589_v19, 1  ;;  %v1597_v4 = vrot.slane %v1596_v49, 1  ;;  %v1603_v37 = vmax.f32 %v1601_v40, %v1602_v39 }
  0xff   :  { %v1577_v54 = vmax.f32 %v1575_v58, %v1576_v53  ;;  %v2159_v44 = vmax.f32 %v1563_v22, %v5291_v21  ;;  %v2160_v15 = vmax.f32 %v1570_v36, %v5307_v35  ;;  %v149_v62 = vmax.f32 %v5207_v7, %v5274_v24 }
 0x100   :  { %v1591_v27 = vmax.f32 %v1589_v19, %v1590_v60  ;;  %v1598_v28 = vmax.f32 %v1596_v49, %v1597_v4  ;;  %v1604_v45 = vrot.slane %v1603_v37, 1  ;;  %v2162_v2 = vmax.f32 %v1584_v34, %v5302_v9  ;;  %v71_v9 = vld [vmem:[%s6538_s0 + $0x160] sm:$0xff] }
 0x101   :  { %v2161_v43 = vmax.f32 %v1577_v54, %v5285_v23  ;;  %v2483_v31 = vrot.slane %v2159_v44, 7  ;;  %v2485_v38 = vrot.slane %v2160_v15, 6  ;;  %v150_v21 = vsel %vm91_vm0, %v69_v48, -inf }
 0x102   :  { %v1605_v3 = vmax.f32 %v1603_v37, %v1604_v45  ;;  %v2163_v35 = vmax.f32 %v1591_v27, %v5298_v61  ;;  %v2164_v7 = vmax.f32 %v1598_v28, %v5317_v11  ;;  %v2489_v24 = vrot.slane %v2162_v2, 4  ;;  %v72_v61 = vld [vmem:[%s6538_s0 + $0x168] sm:$0xff] }
 0x103   :  { %v2484_v41 = vsel %vm2351_vm3, %v2483_v31, %v2158_v13  ;;  %v2487_v42 = vrot.slane %v2161_v43, 5  ;;  %v153_v55 = vsel %vm91_vm0, %v70_v59, -inf  ;;  %v200_v23 = vmax.f32 %v146_v29, %v69_v48 }
 0x104   :  { %v2165_v11 = vmax.f32 %v1605_v3, %v2027_v57  ;;  %v2486_v33 = vsel %vm2354_vm4, %v2485_v38, %v2484_v41  ;;  %v2491_v50 = vrot.slane %v2163_v35, 3  ;;  %v2493_v51 = vrot.slane %v2164_v7, 2 }
 0x105   :  { %v2488_v12 = vsel %vm2357_vm5, %v2487_v42, %v2486_v33  ;;  %v201_v8 = vmax.f32 %v149_v62, %v70_v59  ;;  %v275_v20 = vrot.slane %v200_v23, 7  ;;  %v151_v63 = vsel %vm91_vm0, %v71_v9, -inf }
 0x106   :  { %v2490_v29 = vsel %vm2360_vm6, %v2489_v24, %v2488_v12  ;;  %v2495_v56 = vrot.slane %v2165_v11, 1  ;;  %v152_v57 = vmax.f32 %v150_v21, %v151_v63  ;;  %v154_v52 = vsel %vm91_vm0, %v72_v61, -inf }
 0x107   :  { %v2492_v17 = vsel %vm2363_vm7, %v2491_v50, %v2490_v29  ;;  %v276_v18 = vrot.slane %v201_v8, 7  ;;  %v335_v6 = vsel %vm244_vm1, -inf, %v275_v20  ;;  %v155_v1 = vmax.f32 %v153_v55, %v154_v52 }
 0x108   :  { %v2494_v30 = vsel %vm2366_vm8, %v2493_v51, %v2492_v17  ;;  %v713_v10 = vcombine.high %v335_v6, %v335_v6  ;;  %v720_v5 = vrot.slane %v335_v6, %v4463_v32  ;;  %v5373_v14 = vsel %vm91_vm0, %v73_v16, -inf }
 0x109   :  { %v2496_v40 = vsel %vm2369_vm9, %v2495_v56, %v2494_v30  ;;  %v277_v46 = vsel %vm244_vm1, %v275_v20, %v276_v18  ;;  %v5378_v47 = vsel %vm244_vm1, %v276_v18, -inf  ;;  %v5381_v26 = vsel %vm91_vm0, %v74_v25, -inf }
 0x10a   :  { %3990 = vmatmul.mubr.msk.f32.gmra.mrb[8].mxu0 %vm91_vm0, %v2496_v40  ;;  %v5385_v58 = vrot.slane %v713_v10, %v4463_v32  ;;  %v5387_v0 = vcombine.high %v720_v5, %v720_v5  ;;  %v730_v19 = vcombine.high %v277_v46, %v277_v46  ;;  %v5390_v49 = vrot.slane %v277_v46, %v4463_v32 }
 0x10b   :  { %v1606_v39 = vsel %vm1045_vm2, %v720_v5, -inf  ;;  %v2034_v22 = vrot.slane %v5378_v47, %v4463_v32  ;;  %v5395_v36 = vmax.f32 %v152_v57, %v73_v16  ;;  %v5397_v53 = vmax.f32 %v155_v1, %v74_v25 }
 0x10c   :  { %v5401_v13 = vcombine.high %v5385_v58, %v5385_v58  ;;  %v5404_v34 = vrot.slane %v730_v19, %v4463_v32  ;;  %v5408_v60 = vcombine.high %v5390_v49, %v5390_v49  ;;  %v1607_v4 = vrot.slane %v1606_v39, 4 }
 0x10d   :  { %v1613_v37 = vsel %vm1045_vm2, %v5387_v0, -inf  ;;  %v1620_v48 = vsel %vm1045_vm2, %v5385_v58, -inf  ;;  %v1634_v54 = vsel %vm1045_vm2, %v5390_v49, -inf  ;;  %v278_v44 = vrot.slane %v5395_v36, 7 }
 0x10e   :  { %v5419_v15 = vcombine.high %v5404_v34, %v5404_v34  ;;  %v1608_v62 = vmax.f32 %v1606_v39, %v1607_v4  ;;  %v1614_v27 = vrot.slane %v1613_v37, 4  ;;  %v1621_v28 = vrot.slane %v1620_v48, 4 }
 0x10f   :  { %v1627_v45 = vsel %vm1045_vm2, %v5401_v13, -inf  ;;  %v1635_v2 = vrot.slane %v1634_v54, 4  ;;  %v1641_v59 = vsel %vm1045_vm2, %v5408_v60, -inf  ;;  %v1648_v43 = vsel %vm1045_vm2, %v5404_v34, -inf }
 0x110   :  { %v1609_v31 = vrot.slane %v1608_v62, 2  ;;  %v1615_v38 = vmax.f32 %v1613_v37, %v1614_v27  ;;  %v1622_v21 = vmax.f32 %v1620_v48, %v1621_v28  ;;  %v1628_v3 = vrot.slane %v1627_v45, 4 }
 0x111   :  { %v1636_v35 = vmax.f32 %v1634_v54, %v1635_v2  ;;  %v1642_v7 = vrot.slane %v1641_v59, 4  ;;  %v1649_v24 = vrot.slane %v1648_v43, 4  ;;  %v1655_v9 = vsel %vm1045_vm2, %v5419_v15, -inf }
 0x112   :  { %v1610_v41 = vmax.f32 %v1608_v62, %v1609_v31  ;;  %v1616_v42 = vrot.slane %v1615_v38, 2  ;;  %v1623_v55 = vrot.slane %v1622_v21, 2  ;;  %v1629_v23 = vmax.f32 %v1627_v45, %v1628_v3 }
 0x113   :  { %v1637_v61 = vrot.slane %v1636_v35, 2  ;;  %v1643_v11 = vmax.f32 %v1641_v59, %v1642_v7  ;;  %v1650_v33 = vmax.f32 %v1648_v43, %v1649_v24  ;;  %v1656_v50 = vrot.slane %v1655_v9, 4 }
 0x114   :  { %v1611_v51 = vrot.slane %v1610_v41, 1  ;;  %v1617_v12 = vmax.f32 %v1615_v38, %v1616_v42  ;;  %v1624_v8 = vmax.f32 %v1622_v21, %v1623_v55  ;;  %v1630_v20 = vrot.slane %v1629_v23, 2 }
 0x115   :  { %v1638_v16 = vmax.f32 %v1636_v35, %v1637_v61  ;;  %v1644_v63 = vrot.slane %v1643_v11, 2  ;;  %v1651_v29 = vrot.slane %v1650_v33, 2  ;;  %v1657_v56 = vmax.f32 %v1655_v9, %v1656_v50 }
 0x116   :  { %v1612_v25 = vmax.f32 %v1610_v41, %v1611_v51  ;;  %v1618_v57 = vrot.slane %v1617_v12, 1  ;;  %v1625_v52 = vrot.slane %v1624_v8, 1  ;;  %v1631_v17 = vmax.f32 %v1629_v23, %v1630_v20  ;;  %v5476_v20 = vpop.f32.mrb[0].mxu0 }
 0x117   :  { %v1639_v18 = vrot.slane %v1638_v16, 1  ;;  %v1645_v6 = vmax.f32 %v1643_v11, %v1644_v63  ;;  %v1652_v1 = vmax.f32 %v1650_v33, %v1651_v29  ;;  %v1658_v30 = vrot.slane %v1657_v56, 2 }
 0x118   :  { %v1619_v10 = vmax.f32 %v1617_v12, %v1618_v57  ;;  %v1626_v5 = vmax.f32 %v1624_v8, %v1625_v52  ;;  %v1632_v40 = vrot.slane %v1631_v17, 1  ;;  %v2166_v46 = vmax.f32 %v1612_v25, %v5387_v0  ;;  %v5487_v25 = vpop.f32.mrb[1].mxu0 }
 0x119   :  { %v1640_v19 = vmax.f32 %v1638_v16, %v1639_v18  ;;  %v1646_v39 = vrot.slane %v1645_v6, 1  ;;  %v1653_v4 = vrot.slane %v1652_v1, 1  ;;  %v1659_v37 = vmax.f32 %v1657_v56, %v1658_v30 }
 0x11a   :  { %v1633_v48 = vmax.f32 %v1631_v17, %v1632_v40  ;;  %v2167_v54 = vmax.f32 %v1619_v10, %v5385_v58  ;;  %v2168_v62 = vmax.f32 %v1626_v5, %v5401_v13  ;;  %v279_v27 = vrot.slane %v5397_v53, 7 }
 0x11b   :  { %v1647_v28 = vmax.f32 %v1645_v6, %v1646_v39  ;;  %v1654_v45 = vmax.f32 %v1652_v1, %v1653_v4  ;;  %v1660_v2 = vrot.slane %v1659_v37, 1  ;;  %v2170_v59 = vmax.f32 %v1640_v19, %v5408_v60 }
 0x11c   :  { %v2169_v43 = vmax.f32 %v1633_v48, %v5390_v49  ;;  %v2497_v31 = vrot.slane %v2167_v54, 7  ;;  %v2499_v0 = vrot.slane %v2168_v62, 6  ;;  %v280_v38 = vsel %vm244_vm1, %v278_v44, %v279_v27 }
 0x11d   :  { %v1661_v21 = vmax.f32 %v1659_v37, %v1660_v2  ;;  %v2171_v58 = vmax.f32 %v1647_v28, %v5404_v34  ;;  %v2172_v13 = vmax.f32 %v1654_v45, %v5419_v15  ;;  %v2503_v3 = vrot.slane %v2170_v59, 4 }
 0x11e   :  { %v2498_v53 = vsel %vm2351_vm3, %v2497_v31, %v2166_v46  ;;  %v2501_v35 = vrot.slane %v2169_v43, 5  ;;  %v336_v60 = vsel %vm244_vm1, -inf, %v278_v44  ;;  %v5445_v49 = vsel %vm244_vm1, %v279_v27, -inf }
 0x11f   :  { %v2173_v7 = vmax.f32 %v1661_v21, %v2034_v22  ;;  %v2500_v24 = vsel %vm2354_vm4, %v2499_v0, %v2498_v53  ;;  %v2505_v34 = vrot.slane %v2171_v58, 3  ;;  %v2507_v9 = vrot.slane %v2172_v13, 2 }
 0x120   :  { %v2502_v15 = vsel %vm2357_vm5, %v2501_v35, %v2500_v24  ;;  %v747_v41 = vcombine.high %v336_v60, %v336_v60  ;;  %v754_v42 = vrot.slane %v336_v60, %v4463_v32  ;;  %v764_v55 = vcombine.high %v280_v38, %v280_v38 }
 0x121   :  { %v2504_v36 = vsel %vm2360_vm6, %v2503_v3, %v2502_v15  ;;  %v2509_v44 = vrot.slane %v2173_v7, 1  ;;  %v5455_v23 = vrot.slane %v280_v38, %v4463_v32  ;;  %v2041_v47 = vrot.slane %v5445_v49, %v4463_v32 }
 0x122   :  { %v2506_v22 = vsel %vm2363_vm7, %v2505_v34, %v2504_v36  ;;  %v5461_v61 = vrot.slane %v747_v41, %v4463_v32  ;;  %v5463_v11 = vcombine.high %v754_v42, %v754_v42  ;;  %v5466_v33 = vrot.slane %v764_v55, %v4463_v32 }
 0x123   :  { %v2508_v50 = vsel %vm2366_vm8, %v2507_v9, %v2506_v22  ;;  %v5471_v51 = vcombine.high %v5455_v23, %v5455_v23  ;;  %v1662_v12 = vsel %vm1045_vm2, %v754_v42, -inf  ;;  %v1690_v8 = vsel %vm1045_vm2, %v5455_v23, -inf  ;;  %v75_v22 = vld [vmem:[%s6538_s0 + $0x180] sm:$0xff] }
 0x124   :  { %v2510_v16 = vsel %vm2369_vm9, %v2509_v44, %v2508_v50  ;;  %v5481_v63 = vcombine.high %v5461_v61, %v5461_v61  ;;  %v5485_v29 = vcombine.high %v5466_v33, %v5466_v33  ;;  %v1663_v56 = vrot.slane %v1662_v12, 4 }
 0x125   :  { %3992 = vmatprep.mubr.msk.f32.mxu0 %vm91_vm0, %v2510_v16  ;;  %v1669_v57 = vsel %vm1045_vm2, %v5463_v11, -inf  ;;  %v1676_v52 = vsel %vm1045_vm2, %v5461_v61, -inf  ;;  %v1691_v17 = vrot.slane %v1690_v8, 4  ;;  %v1697_v18 = vsel %vm1045_vm2, %v5471_v51, -inf }
 0x126   :  { %v1664_v6 = vmax.f32 %v1662_v12, %v1663_v56  ;;  %v1670_v1 = vrot.slane %v1669_v57, 4  ;;  %v1677_v30 = vrot.slane %v1676_v52, 4  ;;  %v1683_v10 = vsel %vm1045_vm2, %v5481_v63, -inf }
 0x127   :  { %v1684_v5 = vrot.slane %v1683_v10, 4  ;;  %v1692_v40 = vmax.f32 %v1690_v8, %v1691_v17  ;;  %v1698_v46 = vrot.slane %v1697_v18, 4  ;;  %v1704_v19 = vsel %vm1045_vm2, %v5466_v33, -inf }
 0x128   :  { %v1665_v39 = vrot.slane %v1664_v6, 2  ;;  %v1671_v4 = vmax.f32 %v1669_v57, %v1670_v1  ;;  %v1678_v37 = vmax.f32 %v1676_v52, %v1677_v30  ;;  %v1705_v48 = vrot.slane %v1704_v19, 4  ;;  %v76_v30 = vld [vmem:[%s6538_s0 + $0x188] sm:$0xff] }
 0x129   :  { %v1685_v54 = vmax.f32 %v1683_v10, %v1684_v5  ;;  %v1693_v62 = vrot.slane %v1692_v40, 2  ;;  %v1699_v27 = vmax.f32 %v1697_v18, %v1698_v46  ;;  %v1711_v28 = vsel %vm1045_vm2, %v5485_v29, -inf }
 0x12a   :  { %v1666_v45 = vmax.f32 %v1664_v6, %v1665_v39  ;;  %v1672_v2 = vrot.slane %v1671_v4, 2  ;;  %v1679_v59 = vrot.slane %v1678_v37, 2  ;;  %v1706_v43 = vmax.f32 %v1704_v19, %v1705_v48  ;;  %v78_v39 = vld [vmem:[%s6538_s0 + $0x198] sm:$0xff] }
 0x12b   :  { %v1686_v31 = vrot.slane %v1685_v54, 2  ;;  %v1694_v0 = vmax.f32 %v1692_v40, %v1693_v62  ;;  %v1700_v38 = vrot.slane %v1699_v27, 2  ;;  %v1712_v21 = vrot.slane %v1711_v28, 4 }
 0x12c   :  { %v1667_v58 = vrot.slane %v1666_v45, 1  ;;  %v1673_v13 = vmax.f32 %v1671_v4, %v1672_v2  ;;  %v1680_v3 = vmax.f32 %v1678_v37, %v1679_v59  ;;  %v1707_v53 = vrot.slane %v1706_v43, 2 }
 0x12d   :  { %v1687_v35 = vmax.f32 %v1685_v54, %v1686_v31  ;;  %v1695_v60 = vrot.slane %v1694_v0, 1  ;;  %v1701_v7 = vmax.f32 %v1699_v27, %v1700_v38  ;;  %v1713_v24 = vmax.f32 %v1711_v28, %v1712_v21  ;;  %v79_v54 = vld [vmem:[%s6538_s0 + $0x1a0] sm:$0xff]  ;;  %v81_v31 = vld [vmem:[%s6538_s0 + $0x1b0] sm:$0xff] }
 0x12e   :  { %v1668_v34 = vmax.f32 %v1666_v45, %v1667_v58  ;;  %v1674_v9 = vrot.slane %v1673_v13, 1  ;;  %v1681_v15 = vrot.slane %v1680_v3, 1  ;;  %v1708_v41 = vmax.f32 %v1706_v43, %v1707_v53 }
 0x12f   :  { %v1688_v42 = vrot.slane %v1687_v35, 1  ;;  %v1696_v55 = vmax.f32 %v1694_v0, %v1695_v60  ;;  %v1702_v36 = vrot.slane %v1701_v7, 1  ;;  %v1714_v44 = vrot.slane %v1713_v24, 2 }
 0x130   :  { %v1675_v50 = vmax.f32 %v1673_v13, %v1674_v9  ;;  %v1682_v12 = vmax.f32 %v1680_v3, %v1681_v15  ;;  %v1709_v8 = vrot.slane %v1708_v41, 1  ;;  %v2174_v16 = vmax.f32 %v1668_v34, %v5463_v11 }
 0x131   :  { %v1689_v56 = vmax.f32 %v1687_v35, %v1688_v42  ;;  %v1703_v57 = vmax.f32 %v1701_v7, %v1702_v36  ;;  %v1715_v52 = vmax.f32 %v1713_v24, %v1714_v44  ;;  %v2178_v17 = vmax.f32 %v1696_v55, %v5471_v51  ;;  %v77_v51 = vld [vmem:[%s6538_s0 + $0x190] sm:$0xff] }
 0x132   :  { %v1710_v18 = vmax.f32 %v1708_v41, %v1709_v8  ;;  %v2175_v6 = vmax.f32 %v1675_v50, %v5461_v61  ;;  %v2176_v1 = vmax.f32 %v1682_v12, %v5481_v63  ;;  %v157_v10 = vsel %vm91_vm0, %v75_v22, -inf  ;;  %v83_v41 = vld [vmem:[%s6538_s0 + $0x1c0] sm:$0xff] }
 0x133   :  { %v1716_v5 = vrot.slane %v1715_v52, 1  ;;  %v2177_v40 = vmax.f32 %v1689_v56, %v5455_v23  ;;  %v2179_v11 = vmax.f32 %v1703_v57, %v5466_v33  ;;  %v2517_v46 = vrot.slane %v2178_v17, 4 }
 0x134   :  { %v2180_v61 = vmax.f32 %v1710_v18, %v5485_v29  ;;  %v2511_v19 = vrot.slane %v2175_v6, 7  ;;  %v2513_v63 = vrot.slane %v2176_v1, 6  ;;  %v158_v4 = vmax.f32 %v5373_v14, %v157_v10  ;;  %v80_v29 = vld [vmem:[%s6538_s0 + $0x1a8] sm:$0xff] }
 0x135   :  { %v1717_v37 = vmax.f32 %v1715_v52, %v1716_v5  ;;  %v2515_v48 = vrot.slane %v2177_v40, 5  ;;  %v2519_v23 = vrot.slane %v2179_v11, 3  ;;  %v160_v33 = vsel %vm91_vm0, %v76_v30, -inf }
 0x136   :  { %v2512_v62 = vsel %vm2351_vm3, %v2511_v19, %v2174_v16  ;;  %v2521_v27 = vrot.slane %v2180_v61, 2  ;;  %v161_v28 = vmax.f32 %v5381_v26, %v160_v33  ;;  %v162_v14 = vsel %vm91_vm0, %v77_v51, -inf  ;;  %v82_v26 = vld [vmem:[%s6538_s0 + $0x1b8] sm:$0xff] }
 0x137   :  { %v2181_v45 = vmax.f32 %v1717_v37, %v2041_v47  ;;  %v2514_v2 = vsel %vm2354_vm4, %v2513_v63, %v2512_v62  ;;  %v165_v59 = vsel %vm91_vm0, %v78_v39, -inf  ;;  %v204_v43 = vmax.f32 %v158_v4, %v77_v51 }
 0x138   :  { %v2516_v0 = vsel %vm2357_vm5, %v2515_v48, %v2514_v2  ;;  %v205_v38 = vmax.f32 %v161_v28, %v78_v39  ;;  %v163_v21 = vsel %vm91_vm0, %v79_v54, -inf  ;;  %v166_v49 = vsel %vm91_vm0, %v80_v29, -inf }
 0x139   :  { %v2518_v47 = vsel %vm2360_vm6, %v2517_v46, %v2516_v0  ;;  %v2523_v58 = vrot.slane %v2181_v45, 1  ;;  %v281_v13 = vrot.slane %v204_v43, 7  ;;  %v164_v3 = vmax.f32 %v162_v14, %v163_v21 }
 0x13a   :  { %v2520_v53 = vsel %vm2363_vm7, %v2519_v23, %v2518_v47  ;;  %v282_v35 = vrot.slane %v205_v38, 7  ;;  %v167_v60 = vmax.f32 %v165_v59, %v166_v49  ;;  %v5550_v7 = vsel %vm91_vm0, %v81_v31, -inf }
 0x13b   :  { %v2522_v24 = vsel %vm2366_vm8, %v2521_v27, %v2520_v53  ;;  %v337_v34 = vsel %vm244_vm1, -inf, %v281_v13  ;;  %v5555_v9 = vsel %vm91_vm0, %v82_v26, -inf  ;;  %v5557_v15 = vmax.f32 %v164_v3, %v81_v31 }
 0x13c   :  { %v2524_v42 = vsel %vm2369_vm9, %v2523_v58, %v2522_v24  ;;  %v283_v55 = vsel %vm244_vm1, %v281_v13, %v282_v35  ;;  %v5565_v36 = vsel %vm244_vm1, %v282_v35, -inf  ;;  %v781_v44 = vcombine.high %v337_v34, %v337_v34 }
 0x13d   :  { %3993 = vmatmul.mubr.msk.f32.gmra.mrb[10].mxu0 %vm91_vm0, %v2524_v42  ;;  %v788_v22 = vrot.slane %v337_v34, %v4463_v32  ;;  %v798_v50 = vcombine.high %v283_v55, %v283_v55  ;;  %v5570_v12 = vrot.slane %v283_v55, %v4463_v32  ;;  %v2048_v8 = vrot.slane %v5565_v36, %v4463_v32 }
 0x13e   :  { %v5575_v16 = vrot.slane %v781_v44, %v4463_v32  ;;  %v5577_v56 = vmax.f32 %v167_v60, %v82_v26  ;;  %v284_v57 = vrot.slane %v5557_v15, 7  ;;  %v5581_v52 = vsel %vm91_vm0, %v83_v41, -inf }
 0x13f   :  { %v5583_v17 = vcombine.high %v788_v22, %v788_v22  ;;  %v5586_v18 = vrot.slane %v798_v50, %v4463_v32  ;;  %v5590_v6 = vcombine.high %v5570_v12, %v5570_v12  ;;  %v1718_v1 = vsel %vm1045_vm2, %v788_v22, -inf }
 0x140   :  { %v5595_v30 = vcombine.high %v5575_v16, %v5575_v16  ;;  %v1719_v10 = vrot.slane %v1718_v1, 4  ;;  %v1732_v5 = vsel %vm1045_vm2, %v5575_v16, -inf  ;;  %v1746_v40 = vsel %vm1045_vm2, %v5570_v12, -inf }
 0x141   :  { %v5603_v11 = vcombine.high %v5586_v18, %v5586_v18  ;;  %v1725_v46 = vsel %vm1045_vm2, %v5583_v17, -inf  ;;  %v1733_v51 = vrot.slane %v1732_v5, 4  ;;  %v1747_v61 = vrot.slane %v1746_v40, 4 }
 0x142   :  { %v1720_v19 = vmax.f32 %v1718_v1, %v1719_v10  ;;  %v1726_v63 = vrot.slane %v1725_v46, 4  ;;  %v1739_v39 = vsel %vm1045_vm2, %v5595_v30, -inf  ;;  %v1753_v4 = vsel %vm1045_vm2, %v5590_v6, -inf }
 0x143   :  { %v1734_v37 = vmax.f32 %v1732_v5, %v1733_v51  ;;  %v1740_v48 = vrot.slane %v1739_v39, 4  ;;  %v1748_v23 = vmax.f32 %v1746_v40, %v1747_v61  ;;  %v1754_v33 = vrot.slane %v1753_v4, 4 }
 0x144   :  { %v1721_v54 = vrot.slane %v1720_v19, 2  ;;  %v1727_v29 = vmax.f32 %v1725_v46, %v1726_v63  ;;  %v1760_v62 = vsel %vm1045_vm2, %v5586_v18, -inf  ;;  %v1767_v27 = vsel %vm1045_vm2, %v5603_v11, -inf  ;;  %v5615_v59 = vpop.f32.mrb[2].mxu0 }
 0x145   :  { %v1735_v28 = vrot.slane %v1734_v37, 2  ;;  %v1741_v14 = vmax.f32 %v1739_v39, %v1740_v48  ;;  %v1749_v45 = vrot.slane %v1748_v23, 2  ;;  %v1755_v2 = vmax.f32 %v1753_v4, %v1754_v33  ;;  %v5617_v26 = vpop.f32.mrb[3].mxu0 }
 0x146   :  { %v1722_v43 = vmax.f32 %v1720_v19, %v1721_v54  ;;  %v1728_v31 = vrot.slane %v1727_v29, 2  ;;  %v1761_v0 = vrot.slane %v1760_v62, 4  ;;  %v1768_v38 = vrot.slane %v1767_v27, 4 }
 0x147   :  { %v1736_v21 = vmax.f32 %v1734_v37, %v1735_v28  ;;  %v1742_v49 = vrot.slane %v1741_v14, 2  ;;  %v1750_v47 = vmax.f32 %v1748_v23, %v1749_v45  ;;  %v1756_v58 = vrot.slane %v1755_v2, 2 }
 0x148   :  { %v1723_v13 = vrot.slane %v1722_v43, 1  ;;  %v1729_v3 = vmax.f32 %v1727_v29, %v1728_v31  ;;  %v1762_v53 = vmax.f32 %v1760_v62, %v1761_v0  ;;  %v1769_v35 = vmax.f32 %v1767_v27, %v1768_v38 }
 0x149   :  { %v1737_v60 = vrot.slane %v1736_v21, 1  ;;  %v1743_v24 = vmax.f32 %v1741_v14, %v1742_v49  ;;  %v1751_v34 = vrot.slane %v1750_v47, 1  ;;  %v1757_v41 = vmax.f32 %v1755_v2, %v1756_v58 }
 0x14a   :  { %v1724_v42 = vmax.f32 %v1722_v43, %v1723_v13  ;;  %v1730_v55 = vrot.slane %v1729_v3, 1  ;;  %v1763_v44 = vrot.slane %v1762_v53, 2  ;;  %v1770_v22 = vrot.slane %v1769_v35, 2 }
 0x14b   :  { %v1738_v50 = vmax.f32 %v1736_v21, %v1737_v60  ;;  %v1744_v1 = vrot.slane %v1743_v24, 1  ;;  %v1752_v10 = vmax.f32 %v1750_v47, %v1751_v34  ;;  %v1758_v5 = vrot.slane %v1757_v41, 1 }
 0x14c   :  { %v1731_v40 = vmax.f32 %v1729_v3, %v1730_v55  ;;  %v1764_v46 = vmax.f32 %v1762_v53, %v1763_v44  ;;  %v1771_v51 = vmax.f32 %v1769_v35, %v1770_v22  ;;  %v2182_v61 = vmax.f32 %v1724_v42, %v5583_v17 }
 0x14d   :  { %v1745_v19 = vmax.f32 %v1743_v24, %v1744_v1  ;;  %v1759_v63 = vmax.f32 %v1757_v41, %v1758_v5  ;;  %v2184_v39 = vmax.f32 %v1738_v50, %v5595_v30  ;;  %v2186_v4 = vmax.f32 %v1752_v10, %v5590_v6 }
 0x14e   :  { %v1765_v37 = vrot.slane %v1764_v46, 1  ;;  %v1772_v48 = vrot.slane %v1771_v51, 1  ;;  %v2183_v23 = vmax.f32 %v1731_v40, %v5575_v16  ;;  %v285_v33 = vrot.slane %v5577_v56, 7 }
 0x14f   :  { %v2185_v54 = vmax.f32 %v1745_v19, %v5570_v12  ;;  %v2187_v29 = vmax.f32 %v1759_v63, %v5586_v18  ;;  %v2527_v62 = vrot.slane %v2184_v39, 6  ;;  %v2531_v27 = vrot.slane %v2186_v4, 4 }
 0x150   :  { %v1766_v28 = vmax.f32 %v1764_v46, %v1765_v37  ;;  %v1773_v17 = vmax.f32 %v1771_v51, %v1772_v48  ;;  %v2525_v14 = vrot.slane %v2183_v23, 7  ;;  %v286_v30 = vsel %vm244_vm1, %v284_v57, %v285_v33 }
 0x151   :  { %v2529_v6 = vrot.slane %v2185_v54, 5  ;;  %v2533_v45 = vrot.slane %v2187_v29, 3  ;;  %v338_v16 = vsel %vm244_vm1, -inf, %v284_v57  ;;  %v5633_v56 = vsel %vm244_vm1, %v285_v33, -inf }
 0x152   :  { %v2188_v12 = vmax.f32 %v1766_v28, %v5603_v11  ;;  %v2189_v18 = vmax.f32 %v1773_v17, %v2048_v8  ;;  %v2526_v2 = vsel %vm2351_vm3, %v2525_v14, %v2182_v61  ;;  %v815_v43 = vcombine.high %v338_v16, %v338_v16 }
 0x153   :  { %v2528_v31 = vsel %vm2354_vm4, %v2527_v62, %v2526_v2  ;;  %v822_v0 = vrot.slane %v338_v16, %v4463_v32  ;;  %v832_v38 = vcombine.high %v286_v30, %v286_v30  ;;  %v5643_v15 = vrot.slane %v286_v30, %v4463_v32 }
 0x154   :  { %v2530_v57 = vsel %vm2357_vm5, %v2529_v6, %v2528_v31  ;;  %v2535_v21 = vrot.slane %v2188_v12, 2  ;;  %v2537_v49 = vrot.slane %v2189_v18, 1  ;;  %v5647_v11 = vrot.slane %v815_v43, %v4463_v32 }
 0x155   :  { %v2532_v36 = vsel %vm2360_vm6, %v2531_v27, %v2530_v57  ;;  %v5650_v8 = vcombine.high %v822_v0, %v822_v0  ;;  %v5653_v47 = vrot.slane %v832_v38, %v4463_v32  ;;  %v5657_v58 = vcombine.high %v5643_v15, %v5643_v15 }
 0x156   :  { %v2534_v13 = vsel %vm2363_vm7, %v2533_v45, %v2532_v36  ;;  %v5662_v3 = vcombine.high %v5647_v11, %v5647_v11  ;;  %v1774_v53 = vsel %vm1045_vm2, %v822_v0, -inf  ;;  %v1788_v35 = vsel %vm1045_vm2, %v5647_v11, -inf }
 0x157   :  { %v2536_v60 = vsel %vm2366_vm8, %v2535_v21, %v2534_v13  ;;  %v5670_v24 = vcombine.high %v5653_v47, %v5653_v47  ;;  %v1775_v34 = vrot.slane %v1774_v53, 4  ;;  %v1781_v41 = vsel %vm1045_vm2, %v5650_v8, -inf }
 0x158   :  { %v2538_v42 = vsel %vm2369_vm9, %v2537_v49, %v2536_v60  ;;  %v1782_v55 = vrot.slane %v1781_v41, 4  ;;  %v1789_v44 = vrot.slane %v1788_v35, 4  ;;  %v1795_v22 = vsel %vm1045_vm2, %v5662_v3, -inf }
 0x159   :  { %3995 = vmatprep.mubr.msk.f32.mxu0 %vm91_vm0, %v2538_v42  ;;  %v1776_v50 = vmax.f32 %v1774_v53, %v1775_v34  ;;  %v1796_v1 = vrot.slane %v1795_v22, 4  ;;  %v1802_v10 = vsel %vm1045_vm2, %v5643_v15, -inf  ;;  %v1809_v5 = vsel %vm1045_vm2, %v5657_v58, -inf }
 0x15a   :  { %v1783_v40 = vmax.f32 %v1781_v41, %v1782_v55  ;;  %v1790_v46 = vmax.f32 %v1788_v35, %v1789_v44  ;;  %v1803_v51 = vrot.slane %v1802_v10, 4  ;;  %v1810_v61 = vrot.slane %v1809_v5, 4 }
 0x15b   :  { %v1777_v19 = vrot.slane %v1776_v50, 2  ;;  %v1797_v63 = vmax.f32 %v1795_v22, %v1796_v1  ;;  %v1816_v39 = vsel %vm1045_vm2, %v5653_v47, -inf  ;;  %v1823_v4 = vsel %vm1045_vm2, %v5670_v24, -inf }
 0x15c   :  { %v1784_v37 = vrot.slane %v1783_v40, 2  ;;  %v1791_v48 = vrot.slane %v1790_v46, 2  ;;  %v1804_v23 = vmax.f32 %v1802_v10, %v1803_v51  ;;  %v1811_v33 = vmax.f32 %v1809_v5, %v1810_v61 }
 0x15d   :  { %v1778_v54 = vmax.f32 %v1776_v50, %v1777_v19  ;;  %v1798_v29 = vrot.slane %v1797_v63, 2  ;;  %v1817_v62 = vrot.slane %v1816_v39, 4  ;;  %v1824_v27 = vrot.slane %v1823_v4, 4 }
 0x15e   :  { %v1785_v28 = vmax.f32 %v1783_v40, %v1784_v37  ;;  %v1792_v17 = vmax.f32 %v1790_v46, %v1791_v48  ;;  %v1805_v14 = vrot.slane %v1804_v23, 2  ;;  %v1812_v30 = vrot.slane %v1811_v33, 2  ;;  %v84_v40 = vld [vmem:[%s6538_s0 + $0x1c8] sm:$0xff] }
 0x15f   :  { %v1779_v6 = vrot.slane %v1778_v54, 1  ;;  %v1799_v45 = vmax.f32 %v1797_v63, %v1798_v29  ;;  %v1818_v16 = vmax.f32 %v1816_v39, %v1817_v62  ;;  %v1825_v12 = vmax.f32 %v1823_v4, %v1824_v27 }
 0x160   :  { %v1786_v18 = vrot.slane %v1785_v28, 1  ;;  %v1793_v2 = vrot.slane %v1792_v17, 1  ;;  %v1806_v43 = vmax.f32 %v1804_v23, %v1805_v14  ;;  %v1813_v31 = vmax.f32 %v1811_v33, %v1812_v30  ;;  %v87_v23 = vld [vmem:[%s6538_s0 + $0x1e0] sm:$0xff]  ;;  %v88_v33 = vld [vmem:[%s6538_s0 + $0x1e8] sm:$0xff] }
 0x161   :  { %v1780_v0 = vmax.f32 %v1778_v54, %v1779_v6  ;;  %v1800_v38 = vrot.slane %v1799_v45, 1  ;;  %v1819_v57 = vrot.slane %v1818_v16, 2  ;;  %v1826_v21 = vrot.slane %v1825_v12, 2  ;;  %v5723_v14 = vld [vmem:[%s6540_s2] ss:$0 sm:$0xff] }
 0x162   :  { %v1787_v49 = vmax.f32 %v1785_v28, %v1786_v18  ;;  %v1794_v36 = vmax.f32 %v1792_v17, %v1793_v2  ;;  %v1807_v13 = vrot.slane %v1806_v43, 1  ;;  %v1814_v53 = vrot.slane %v1813_v31, 1  ;;  %v89_v2 = vld [vmem:[%s6538_s0 + $0x1f0] sm:$0xff] }
 0x163   :  { %v1801_v35 = vmax.f32 %v1799_v45, %v1800_v38  ;;  %v1820_v60 = vmax.f32 %v1818_v16, %v1819_v57  ;;  %v1827_v34 = vmax.f32 %v1825_v12, %v1826_v21  ;;  %v2055_v41 = vrot.slane %v5633_v56, %v4463_v32  ;;  %v90_v57 = vld [vmem:[%s6538_s0 + $0x1f8] sm:$0xff] }
 0x164   :  { %v1808_v42 = vmax.f32 %v1806_v43, %v1807_v13  ;;  %v1815_v55 = vmax.f32 %v1813_v31, %v1814_v53  ;;  %v2190_v44 = vmax.f32 %v1780_v0, %v5650_v8  ;;  %v2191_v22 = vmax.f32 %v1787_v49, %v5647_v11 }
 0x165   :  { %v1821_v50 = vrot.slane %v1820_v60, 1  ;;  %v1828_v1 = vrot.slane %v1827_v34, 1  ;;  %v2192_v10 = vmax.f32 %v1794_v36, %v5662_v3  ;;  %v2193_v5 = vmax.f32 %v1801_v35, %v5643_v15  ;;  %v85_v15 = vld [vmem:[%s6538_s0 + $0x1d0] sm:$0xff]  ;;  %v86_v3 = vld [vmem:[%s6538_s0 + $0x1d8] sm:$0xff]  ;;  %s4369_s0 = smov 16  }
 0x166   :  { %v2194_v46 = vmax.f32 %v1808_v42, %v5657_v58  ;;  %v2195_v56 = vmax.f32 %v1815_v55, %v5653_v47  ;;  %v2539_v51 = vrot.slane %v2191_v22, 7  ;;  %v170_v8 = vmax.f32 %v5550_v7, %v5581_v52 }
 0x167   :  { %v1822_v61 = vmax.f32 %v1820_v60, %v1821_v50  ;;  %v1829_v11 = vmax.f32 %v1827_v34, %v1828_v1  ;;  %v2541_v19 = vrot.slane %v2192_v10, 6  ;;  %v2543_v63 = vrot.slane %v2193_v5, 5 }
 0x168   :  { %v2540_v58 = vsel %vm2351_vm3, %v2539_v51, %v2190_v44  ;;  %v2545_v39 = vrot.slane %v2194_v46, 4  ;;  %v2547_v47 = vrot.slane %v2195_v56, 3  ;;  %v172_v4 = vsel %vm91_vm0, %v84_v40, -inf }
 0x169   :  { %v2196_v7 = vmax.f32 %v1822_v61, %v5670_v24  ;;  %v2197_v52 = vmax.f32 %v1829_v11, %v2055_v41  ;;  %v2542_v37 = vsel %vm2354_vm4, %v2541_v19, %v2540_v58  ;;  %v173_v48 = vmax.f32 %v5555_v9, %v172_v4 }
 0x16a   :  { %v2544_v54 = vsel %vm2357_vm5, %v2543_v63, %v2542_v37  ;;  %v174_v29 = vsel %vm91_vm0, %v85_v15, -inf  ;;  %v177_v62 = vsel %vm91_vm0, %v86_v3, -inf  ;;  %v208_v24 = vmax.f32 %v170_v8, %v85_v15 }
 0x16b   :  { %v2546_v27 = vsel %vm2360_vm6, %v2545_v39, %v2544_v54  ;;  %v2549_v28 = vrot.slane %v2196_v7, 2  ;;  %v2551_v17 = vrot.slane %v2197_v52, 1  ;;  %v209_v9 = vmax.f32 %v173_v48, %v86_v3 }
 0x16c   :  { %v2548_v30 = vsel %vm2363_vm7, %v2547_v47, %v2546_v27  ;;  %v287_v6 = vrot.slane %v208_v24, 7  ;;  %v175_v45 = vsel %vm91_vm0, %v87_v23, -inf  ;;  %v178_v16 = vsel %vm91_vm0, %v88_v33, -inf }
 0x16d   :  { %v2550_v12 = vsel %vm2366_vm8, %v2549_v28, %v2548_v30  ;;  %v288_v18 = vrot.slane %v209_v9, 7  ;;  %v176_v43 = vmax.f32 %v174_v29, %v175_v45  ;;  %v179_v31 = vmax.f32 %v177_v62, %v178_v16 }
 0x16e   :  { %v2552_v0 = vsel %vm2369_vm9, %v2551_v17, %v2550_v12  ;;  %v339_v38 = vsel %vm244_vm1, -inf, %v287_v6  ;;  %v5739_v21 = vadd.f32 %v5476_v20, %v5723_v14  ;;  %vm2776_vm11 = vcmask 123904  }
 0x16f   :  { %3996 = vmatmul.mubr.msk.f32.gmra.mrb[12].mxu0 %vm91_vm0, %v2552_v0  ;;  %v289_v49 = vsel %vm244_vm1, %v287_v6, %v288_v18  ;;  %v5744_v36 = vsel %vm244_vm1, %v288_v18, -inf  ;;  %v849_v13 = vcombine.high %v339_v38, %v339_v38  ;;  %v856_v53 = vrot.slane %v339_v38, %v4463_v32 }
 0x170   :  { %v866_v35 = vcombine.high %v289_v49, %v289_v49  ;;  %v5748_v60 = vrot.slane %v289_v49, %v4463_v32  ;;  %v2062_v34 = vrot.slane %v5744_v36, %v4463_v32  ;;  %v5752_v41 = vmax.f32 %v176_v43, %v89_v2 }
 0x171   :  { %v5755_v20 = vrot.slane %v849_v13, %v4463_v32  ;;  %v5757_v42 = vcombine.high %v856_v53, %v856_v53  ;;  %v1830_v55 = vsel %vm1045_vm2, %v856_v53, -inf  ;;  %v5760_v44 = vmax.f32 %v179_v31, %v90_v57 }
 0x172   :  { %v5763_v22 = vrot.slane %v866_v35, %v4463_v32  ;;  %v5767_v50 = vcombine.high %v5748_v60, %v5748_v60  ;;  %v1831_v1 = vrot.slane %v1830_v55, 4  ;;  %v1858_v10 = vsel %vm1045_vm2, %v5748_v60, -inf }
 0x173   :  { %v5773_v5 = vcombine.high %v5755_v20, %v5755_v20  ;;  %v1837_v40 = vsel %vm1045_vm2, %v5757_v42, -inf  ;;  %v1844_v46 = vsel %vm1045_vm2, %v5755_v20, -inf  ;;  %v1859_v56 = vrot.slane %v1858_v10, 4 }
 0x174   :  { %v5781_v51 = vcombine.high %v5763_v22, %v5763_v22  ;;  %v1832_v8 = vmax.f32 %v1830_v55, %v1831_v1  ;;  %v1838_v61 = vrot.slane %v1837_v40, 4  ;;  %v1845_v11 = vrot.slane %v1844_v46, 4 }
 0x175   :  { %v1851_v19 = vsel %vm1045_vm2, %v5773_v5, -inf  ;;  %v1860_v63 = vmax.f32 %v1858_v10, %v1859_v56  ;;  %v1865_v15 = vsel %vm1045_vm2, %v5767_v50, -inf  ;;  %v1872_v3 = vsel %vm1045_vm2, %v5763_v22, -inf }
 0x176   :  { %v1833_v58 = vrot.slane %v1832_v8, 2  ;;  %v1839_v39 = vmax.f32 %v1837_v40, %v1838_v61  ;;  %v1846_v47 = vmax.f32 %v1844_v46, %v1845_v11  ;;  %v1852_v4 = vrot.slane %v1851_v19, 4 }
 0x177   :  { %v1861_v7 = vrot.slane %v1860_v63, 2  ;;  %v1866_v52 = vrot.slane %v1865_v15, 4  ;;  %v1873_v37 = vrot.slane %v1872_v3, 4  ;;  %v1879_v48 = vsel %vm1045_vm2, %v5781_v51, -inf }
 0x178   :  { %v1834_v23 = vmax.f32 %v1832_v8, %v1833_v58  ;;  %v1840_v33 = vrot.slane %v1839_v39, 2  ;;  %v1847_v54 = vrot.slane %v1846_v47, 2  ;;  %v1853_v29 = vmax.f32 %v1851_v19, %v1852_v4  ;;  %v5791_v62 = vpop.f32.mrb[4].mxu0 }
 0x179   :  { %v1862_v24 = vmax.f32 %v1860_v63, %v1861_v7  ;;  %v1867_v27 = vmax.f32 %v1865_v15, %v1866_v52  ;;  %v1874_v28 = vmax.f32 %v1872_v3, %v1873_v37  ;;  %v1880_v17 = vrot.slane %v1879_v48, 4  ;;  %v5793_v9 = vpop.f32.mrb[5].mxu0 }
 0x17a   :  { %v1835_v30 = vrot.slane %v1834_v23, 1  ;;  %v1841_v6 = vmax.f32 %v1839_v39, %v1840_v33  ;;  %v1848_v45 = vmax.f32 %v1846_v47, %v1847_v54  ;;  %v1854_v16 = vrot.slane %v1853_v29, 2 }
 0x17b   :  { %v1863_v12 = vrot.slane %v1862_v24, 1  ;;  %v1868_v18 = vrot.slane %v1867_v27, 2  ;;  %v1875_v2 = vrot.slane %v1874_v28, 2  ;;  %v1881_v43 = vmax.f32 %v1879_v48, %v1880_v17 }
 0x17c   :  { %v1836_v31 = vmax.f32 %v1834_v23, %v1835_v30  ;;  %v1842_v0 = vrot.slane %v1841_v6, 1  ;;  %v1849_v38 = vrot.slane %v1848_v45, 1  ;;  %v1855_v57 = vmax.f32 %v1853_v29, %v1854_v16 }
 0x17d   :  { %v1864_v49 = vmax.f32 %v1862_v24, %v1863_v12  ;;  %v1869_v13 = vmax.f32 %v1867_v27, %v1868_v18  ;;  %v1876_v53 = vmax.f32 %v1874_v28, %v1875_v2  ;;  %v1882_v35 = vrot.slane %v1881_v43, 2 }
 0x17e   :  { %v1843_v55 = vmax.f32 %v1841_v6, %v1842_v0  ;;  %v1850_v1 = vmax.f32 %v1848_v45, %v1849_v38  ;;  %v1856_v10 = vrot.slane %v1855_v57, 1  ;;  %v2198_v40 = vmax.f32 %v1836_v31, %v5757_v42 }
 0x17f   :  { %v1870_v46 = vrot.slane %v1869_v13, 1  ;;  %v1877_v56 = vrot.slane %v1876_v53, 1  ;;  %v1883_v8 = vmax.f32 %v1881_v43, %v1882_v35  ;;  %v2202_v61 = vmax.f32 %v1864_v49, %v5767_v50 }
 0x180   :  { %v1857_v11 = vmax.f32 %v1855_v57, %v1856_v10  ;;  %v2199_v19 = vmax.f32 %v1843_v55, %v5755_v20  ;;  %v2200_v63 = vmax.f32 %v1850_v1, %v5773_v5  ;;  %v290_v15 = vrot.slane %v5752_v41, 7 }
 0x181   :  { %v1871_v3 = vmax.f32 %v1869_v13, %v1870_v46  ;;  %v1878_v58 = vmax.f32 %v1876_v53, %v1877_v56  ;;  %v1884_v39 = vrot.slane %v1883_v8, 1  ;;  %v2559_v47 = vrot.slane %v2202_v61, 4 }
 0x182   :  { %v2201_v4 = vmax.f32 %v1857_v11, %v5748_v60  ;;  %v2553_v7 = vrot.slane %v2199_v19, 7  ;;  %v2555_v42 = vrot.slane %v2200_v63, 6  ;;  %v291_v52 = vrot.slane %v5760_v44, 7 }
 0x183   :  { %v1885_v37 = vmax.f32 %v1883_v8, %v1884_v39  ;;  %v2203_v50 = vmax.f32 %v1871_v3, %v5763_v22  ;;  %v2204_v48 = vmax.f32 %v1878_v58, %v5781_v51  ;;  %v340_v20 = vsel %vm244_vm1, -inf, %v290_v15 }
 0x184   :  { %v2554_v5 = vsel %vm2351_vm3, %v2553_v7, %v2198_v40  ;;  %v2557_v41 = vrot.slane %v2201_v4, 5  ;;  %v292_v23 = vsel %vm244_vm1, %v290_v15, %v291_v52  ;;  %v5808_v33 = vsel %vm244_vm1, %v291_v52, -inf }
 0x185   :  { %v2205_v60 = vmax.f32 %v1885_v37, %v2062_v34  ;;  %v2556_v44 = vsel %vm2354_vm4, %v2555_v42, %v2554_v5  ;;  %v2561_v54 = vrot.slane %v2203_v50, 3  ;;  %v2563_v22 = vrot.slane %v2204_v48, 2 }
 0x186   :  { %v2558_v51 = vsel %vm2357_vm5, %v2557_v41, %v2556_v44  ;;  %v883_v29 = vcombine.high %v340_v20, %v340_v20  ;;  %v890_v24 = vrot.slane %v340_v20, %v4463_v32  ;;  %v900_v27 = vcombine.high %v292_v23, %v292_v23 }
 0x187   :  { %v2560_v28 = vsel %vm2360_vm6, %v2559_v47, %v2558_v51  ;;  %v2565_v17 = vrot.slane %v2205_v60, 1  ;;  %v5818_v30 = vrot.slane %v292_v23, %v4463_v32  ;;  %v2069_v36 = vrot.slane %v5808_v33, %v4463_v32 }
 0x188   :  { %v2562_v34 = vsel %vm2363_vm7, %v2561_v54, %v2560_v28  ;;  %v5824_v6 = vrot.slane %v883_v29, %v4463_v32  ;;  %v5826_v45 = vcombine.high %v890_v24, %v890_v24  ;;  %v5829_v16 = vrot.slane %v900_v27, %v4463_v32 }
 0x189   :  { %v2564_v12 = vsel %vm2366_vm8, %v2563_v22, %v2562_v34  ;;  %v5834_v18 = vcombine.high %v5818_v30, %v5818_v30  ;;  %v1886_v2 = vsel %vm1045_vm2, %v890_v24, -inf  ;;  %v1914_v43 = vsel %vm1045_vm2, %v5818_v30, -inf }
 0x18a   :  { %v2566_v31 = vsel %vm2369_vm9, %v2565_v17, %v2564_v12  ;;  %v5842_v0 = vcombine.high %v5824_v6, %v5824_v6  ;;  %v5846_v38 = vcombine.high %v5829_v16, %v5829_v16  ;;  %v1887_v57 = vrot.slane %v1886_v2, 4 }
 0x18b   :  { %3998 = vmatprep.mubr.msk.f32.mxu0 %vm91_vm0, %v2566_v31  ;;  %v1893_v49 = vsel %vm1045_vm2, %v5826_v45, -inf  ;;  %v1900_v13 = vsel %vm1045_vm2, %v5824_v6, -inf  ;;  %v1915_v53 = vrot.slane %v1914_v43, 4  ;;  %v1921_v35 = vsel %vm1045_vm2, %v5834_v18, -inf }
 0x18c   :  { %v1888_v55 = vmax.f32 %v1886_v2, %v1887_v57  ;;  %v1894_v1 = vrot.slane %v1893_v49, 4  ;;  %v1901_v10 = vrot.slane %v1900_v13, 4  ;;  %v1907_v40 = vsel %vm1045_vm2, %v5842_v0, -inf }
 0x18d   :  { %v1908_v46 = vrot.slane %v1907_v40, 4  ;;  %v1916_v56 = vmax.f32 %v1914_v43, %v1915_v53  ;;  %v1922_v8 = vrot.slane %v1921_v35, 4  ;;  %v1928_v61 = vsel %vm1045_vm2, %v5829_v16, -inf }
 0x18e   :  { %v1889_v11 = vrot.slane %v1888_v55, 2  ;;  %v1895_v19 = vmax.f32 %v1893_v49, %v1894_v1  ;;  %v1902_v63 = vmax.f32 %v1900_v13, %v1901_v10  ;;  %v1929_v15 = vrot.slane %v1928_v61, 4 }
 0x18f   :  { %v1909_v3 = vmax.f32 %v1907_v40, %v1908_v46  ;;  %v1917_v58 = vrot.slane %v1916_v56, 2  ;;  %v1923_v39 = vmax.f32 %v1921_v35, %v1922_v8  ;;  %v1935_v47 = vsel %vm1045_vm2, %v5846_v38, -inf }
 0x190   :  { %v1890_v4 = vmax.f32 %v1888_v55, %v1889_v11  ;;  %v1896_v7 = vrot.slane %v1895_v19, 2  ;;  %v1903_v42 = vrot.slane %v1902_v63, 2  ;;  %v1930_v52 = vmax.f32 %v1928_v61, %v1929_v15 }
 0x191   :  { %v1910_v37 = vrot.slane %v1909_v3, 2  ;;  %v1918_v50 = vmax.f32 %v1916_v56, %v1917_v58  ;;  %v1924_v48 = vrot.slane %v1923_v39, 2  ;;  %v1936_v20 = vrot.slane %v1935_v47, 4 }
 0x192   :  { %v1891_v5 = vrot.slane %v1890_v4, 1  ;;  %v1897_v41 = vmax.f32 %v1895_v19, %v1896_v7  ;;  %v1904_v23 = vmax.f32 %v1902_v63, %v1903_v42  ;;  %v1931_v60 = vrot.slane %v1930_v52, 2 }
 0x193   :  { %v1911_v44 = vmax.f32 %v1909_v3, %v1910_v37  ;;  %v1919_v54 = vrot.slane %v1918_v50, 1  ;;  %v1925_v22 = vmax.f32 %v1923_v39, %v1924_v48  ;;  %v1937_v51 = vmax.f32 %v1935_v47, %v1936_v20 }
 0x194   :  { %v1892_v29 = vmax.f32 %v1890_v4, %v1891_v5  ;;  %v1898_v24 = vrot.slane %v1897_v41, 1  ;;  %v1905_v27 = vrot.slane %v1904_v23, 1  ;;  %v1932_v28 = vmax.f32 %v1930_v52, %v1931_v60 }
 0x195   :  { %v1912_v17 = vrot.slane %v1911_v44, 1  ;;  %v1920_v34 = vmax.f32 %v1918_v50, %v1919_v54  ;;  %v1926_v12 = vrot.slane %v1925_v22, 1  ;;  %v1938_v2 = vrot.slane %v1937_v51, 2 }
 0x196   :  { %v1899_v43 = vmax.f32 %v1897_v41, %v1898_v24  ;;  %v1906_v31 = vmax.f32 %v1904_v23, %v1905_v27  ;;  %v1933_v57 = vrot.slane %v1932_v28, 1  ;;  %v2206_v49 = vmax.f32 %v1892_v29, %v5826_v45 }
 0x197   :  { %v1913_v13 = vmax.f32 %v1911_v44, %v1912_v17  ;;  %v1927_v53 = vmax.f32 %v1925_v22, %v1926_v12  ;;  %v1939_v35 = vmax.f32 %v1937_v51, %v1938_v2  ;;  %v2210_v55 = vmax.f32 %v1920_v34, %v5834_v18 }
 0x198   :  { %v1934_v1 = vmax.f32 %v1932_v28, %v1933_v57  ;;  %v2207_v10 = vmax.f32 %v1899_v43, %v5824_v6  ;;  %v2208_v40 = vmax.f32 %v1906_v31, %v5842_v0  ;;  %v2759_v46 = vmax.f32 %v5739_v21, 0.0 }
 0x199   :  { %v1940_v56 = vrot.slane %v1939_v35, 1  ;;  %v2209_v8 = vmax.f32 %v1913_v13, %v5818_v30  ;;  %v2211_v61 = vmax.f32 %v1927_v53, %v5829_v16  ;;  %v5868_v11 = vrot.slane %v2210_v55, 4 }
 0x19a   :  { %v2212_v45 = vmax.f32 %v1934_v1, %v5846_v38  ;;  %v2567_v19 = vrot.slane %v2207_v10, 7  ;;  %v2569_v63 = vrot.slane %v2208_v40, 6  ;;  %v4368_v6 = vmov 0.0  }
 0x19b   :  { %v1941_v15 = vmax.f32 %v1939_v35, %v1940_v56  ;;  %v2571_v18 = vrot.slane %v2209_v8, 5  ;;  %v2575_v3 = vrot.slane %v2211_v61, 3  ;;  %2780 = vst.msk [vmem:[#allocation2 + $0x20] sm:$0xff] %vm2774_vm10, %v4368_v6  ;;  %2775 = vst.msk [vmem:[#allocation2] sm:$0xff] %vm2774_vm10, %v4368_v6  ;;  %v2680_v16 = vadd.f32 %v5723_v14, %v5487_v25 }
 0x19c   :  { %2778 = vst.msk [vmem:[#allocation2 + $0x10] sm:$0xff] %vm2774_vm10, %v4368_v6  ;;  %2782 = vst.msk [vmem:[#allocation2 + $0x30] sm:$0xff] %vm2774_vm10, %v4368_v6  ;;  %v2568_v21 = vsel %vm2351_vm3, %v2567_v19, %v2206_v49  ;;  %v2577_v30 = vrot.slane %v2212_v45, 2  ;;  %v2695_v0 = vadd.f32 %v5615_v59, %v5723_v14  ;;  %v2690_v39 = vadd.f32 %v5723_v14, %v5617_v26 }
 0x19d   :  { %2784 = vst.msk [vmem:[#allocation2 + $0x40] sm:$0xff] %vm2774_vm10, %v4368_v6  ;;  %2786 = vst.msk [vmem:[#allocation2 + $0x50] sm:$0xff] %vm2774_vm10, %v4368_v6  ;;  %v2213_v38 = vmax.f32 %v1941_v15, %v2069_v36  ;;  %v2570_v58 = vsel %vm2354_vm4, %v2569_v63, %v2568_v21  ;;  %v2705_v47 = vadd.f32 %v5791_v62, %v5723_v14  ;;  %v2758_v25 = vmax.f32 %v2680_v16, 0.0 }
 0x19e   :  { %2788 = vst.msk [vmem:[#allocation2 + $0x60] sm:$0xff] %vm2774_vm10, %v4368_v6  ;;  %2790 = vst.msk [vmem:[#allocation2 + $0x70] sm:$0xff] %vm2774_vm10, %v4368_v6  ;;  %v2572_v4 = vsel %vm2357_vm5, %v2571_v18, %v2570_v58  ;;  %v2761_v7 = vmax.f32 %v2695_v0, 0.0  ;;  %v2700_v59 = vadd.f32 %v5723_v14, %v5793_v9  ;;  %v2760_v36 = vmax.f32 %v2690_v39, 0.0 }
 0x19f   :  { %2792 = vst.msk [vmem:[#allocation2 + $0x80] sm:$0xff] %vm2774_vm10, %v4368_v6  ;;  %2794 = vst.msk [vmem:[#allocation2 + $0x90] sm:$0xff] %vm2774_vm10, %v4368_v6  ;;  %v2574_v32 = vsel %vm2360_vm6, %v5868_v11, %v2572_v4  ;;  %v2579_v33 = vrot.slane %v2213_v38, 1  ;;  %v2763_v42 = vmax.f32 %v2705_v47, 0.0  ;;  %vm3442_vm12 = vcmask 261120  }
 0x1a0   :  { %2796 = vst.msk [vmem:[#allocation2 + $0xa0] sm:$0xff] %vm2774_vm10, %v4368_v6  ;;  %2798 = vst.msk [vmem:[#allocation2 + $0xb0] sm:$0xff] %vm2774_vm10, %v4368_v6  ;;  %v2576_v52 = vsel %vm2363_vm7, %v2575_v3, %v2574_v32  ;;  %v2762_v26 = vmax.f32 %v2700_v59, 0.0  ;;  %vm3459_vm13 = vcmask 392192   ;;  %vm3476_vm14 = vcmask 523264  }
 0x1a1   :  { %2800 = vst.msk [vmem:[#allocation2 + $0xc0] sm:$0xff] %vm2774_vm10, %v4368_v6  ;;  %2802 = vst.msk [vmem:[#allocation2 + $0xd0] sm:$0xff] %vm2774_vm10, %v4368_v6  ;;  %v2578_v62 = vsel %vm2366_vm8, %v2577_v30, %v2576_v52  ;;  %v3544_v52 = vld [vmem:[%s6541_s3] sm:$0xff]  ;;  %vm3493_vm15 = vcmask 654336   ;;  %vm3527_vm1 = vcmask 916480   ;;  %vm4377_vm2 = vmmov 0  }
 0x1a2   :  { %2804 = vst.msk [vmem:[#allocation2 + $0xe0] sm:$0xff] %vm2774_vm10, %v4368_v6  ;;  %2806 = vst.msk [vmem:[#allocation2 + $0xf0] sm:$0xff] %vm2774_vm10, %v4368_v6  ;;  %v2580_v9 = vsel %vm2369_vm9, %v2579_v33, %v2578_v62  ;;  %v4376_v33 = vmov 0.0|0.0  }
 0x1a3   :  { %2808 = vst.msk [vmem:[#allocation2 + $0x100] sm:$0xff] %vm2774_vm10, %v4368_v6  ;;  %2810 = vst.msk [vmem:[#allocation2 + $0x110] sm:$0xff] %vm2774_vm10, %v4368_v6  ;;  %3999 = vmatmul.mubr.msk.f32.gmra.mrb[14].mxu0 %vm91_vm0, %v2580_v9  ;;  %4038 = vmatprep.subr.bf16.mxu1 %v4376_v33  ;;  %vm3510_vm0 = vcmask 785408  }
 0x1a4   :  { %2812 = vst.msk [vmem:[#allocation2 + $0x120] sm:$0xff] %vm2774_vm10, %v4368_v6  ;;  %2814 = vst.msk [vmem:[#allocation2 + $0x130] sm:$0xff] %vm2774_vm10, %v4368_v6  ;;  %4008 = vmatprep.subr.bf16.mxu0 %v4376_v33 }
 0x1a5   :  { %2781 = vst.msk [vmem:[#allocation2 + $0x28] sm:$0x3] %vm2776_vm11, %v4368_v6  ;;  %2777 = vst.msk [vmem:[#allocation2 + $0x8] sm:$0x3] %vm2776_vm11, %v4368_v6 }
 0x1a6   :  { %2779 = vst.msk [vmem:[#allocation2 + $0x18] sm:$0x3] %vm2776_vm11, %v4368_v6  ;;  %2783 = vst.msk [vmem:[#allocation2 + $0x38] sm:$0x3] %vm2776_vm11, %v4368_v6  ;;  %v2937_v12 = vld [vmem:[#allocation2 + $0x90] sm:$0xff] }
 0x1a7   :  { %2785 = vst.msk [vmem:[#allocation2 + $0x48] sm:$0x3] %vm2776_vm11, %v4368_v6  ;;  %2787 = vst.msk [vmem:[#allocation2 + $0x58] sm:$0x3] %vm2776_vm11, %v4368_v6 }
 0x1a8   :  { %2789 = vst.msk [vmem:[#allocation2 + $0x68] sm:$0x3] %vm2776_vm11, %v4368_v6  ;;  %2791 = vst.msk [vmem:[#allocation2 + $0x78] sm:$0x3] %vm2776_vm11, %v4368_v6 }
 0x1a9   :  { %2793 = vst.msk [vmem:[#allocation2 + $0x88] sm:$0x3] %vm2776_vm11, %v4368_v6  ;;  %2795 = vst.msk [vmem:[#allocation2 + $0x98] sm:$0x3] %vm2776_vm11, %v4368_v6 }
 0x1aa   :  { %2797 = vst.msk [vmem:[#allocation2 + $0xa8] sm:$0x3] %vm2776_vm11, %v4368_v6  ;;  %2799 = vst.msk [vmem:[#allocation2 + $0xb8] sm:$0x3] %vm2776_vm11, %v4368_v6  ;;  %v3988_v50 = vpop.f32.mrb[6].mxu0 }
 0x1ab   :  { %2801 = vst.msk [vmem:[#allocation2 + $0xc8] sm:$0x3] %vm2776_vm11, %v4368_v6  ;;  %2803 = vst.msk [vmem:[#allocation2 + $0xd8] sm:$0x3] %vm2776_vm11, %v4368_v6  ;;  %v2715_v48 = vadd.f32 %v3988_v50, %v5723_v14  ;;  %v2709_v20 = vpop.f32.mrb[7].mxu0  ;;  %v3546_v50 = vld [vmem:[%s6541_s3 + $0x10] sm:$0xff] }
 0x1ac   :  { %2805 = vst.msk [vmem:[#allocation2 + $0xe8] sm:$0x3] %vm2776_vm11, %v4368_v6  ;;  %2807 = vst.msk [vmem:[#allocation2 + $0xf8] sm:$0x3] %vm2776_vm11, %v4368_v6  ;;  %v2710_v5 = vadd.f32 %v5723_v14, %v2709_v20  ;;  %v2849_v11 = vld [vmem:[#allocation2 + $0x1] sm:$0xff] }
 0x1ad   :  { %2809 = vst.msk [vmem:[#allocation2 + $0x108] sm:$0x3] %vm2776_vm11, %v4368_v6  ;;  %2811 = vst.msk [vmem:[#allocation2 + $0x118] sm:$0x3] %vm2776_vm11, %v4368_v6  ;;  %v2765_v41 = vmax.f32 %v2715_v48, 0.0  ;;  %v2865_v15 = vld [vmem:[#allocation2 + $0x2] sm:$0xff] }
 0x1ae   :  { %2813 = vst.msk [vmem:[#allocation2 + $0x128] sm:$0x3] %vm2776_vm11, %v4368_v6  ;;  %2815 = vst.msk [vmem:[#allocation2 + $0x138] sm:$0x3] %vm2776_vm11, %v4368_v6  ;;  %v2764_v23 = vmax.f32 %v2710_v5, 0.0  ;;  %v3547_v48 = vld [vmem:[%s6541_s3 + $0x18] sm:$0xff] }
 0x1af   :  { %2818 = vst.msk [vmem:[#allocation2 + $0x21] sm:$0xff] %vm2774_vm10, %v2759_v46  ;;  %2817 = vst.msk [vmem:[#allocation2 + $0x11] sm:$0xff] %vm2774_vm10, %v2758_v25  ;;  %v4012_v5 = vpack.c.bf16 %v3547_v48, %v3546_v50 }
 0x1b0   :  { %2820 = vst.msk [vmem:[#allocation2 + $0x41] sm:$0xff] %vm2774_vm10, %v2761_v7  ;;  %2819 = vst.msk [vmem:[#allocation2 + $0x31] sm:$0xff] %vm2774_vm10, %v2760_v36  ;;  %v2953_v57 = vld [vmem:[#allocation2 + $0x91] sm:$0xff] }
 0x1b1   :  { %2822 = vst.msk [vmem:[#allocation2 + $0x61] sm:$0xff] %vm2774_vm10, %v2763_v42  ;;  %2821 = vst.msk [vmem:[#allocation2 + $0x51] sm:$0xff] %vm2774_vm10, %v2762_v26  ;;  %v2857_v27 = vld [vmem:[#allocation2 + $0xa1] sm:$0xff] }
 0x1b2   :  { %2824 = vst.msk [vmem:[#allocation2 + $0x81] sm:$0xff] %vm2774_vm10, %v2765_v41  ;;  %2823 = vst.msk [vmem:[#allocation2 + $0x71] sm:$0xff] %vm2774_vm10, %v2764_v23  ;;  %v2873_v34 = vld [vmem:[#allocation2 + $0xa2] sm:$0xff] }
 0x1b3   :  { %v3545_v26 = vld [vmem:[%s6541_s3 + $0x8] sm:$0xff]  ;;  %v3548_v23 = vld [vmem:[%s6541_s3 + $0x20] sm:$0xff] }
 0x1b4   :  { %v4009_v9 = vpack.c.bf16 %v3545_v26, %v3544_v52 }
 0x1b6   :  { %v5979_v37 = vld [vmem:[#allocation2 + $0x22] sm:$0xff]  ;;  %v2897_v53 = vld [vmem:[#allocation2 + $0x11] sm:$0xff]  ;;  %4047 = vmatpush1.bf16.msra.mxu1 %v4009_v9  ;;  %4010 = vmatpush1.bf16.msra.mxu0 %v4009_v9 }
 0x1b7   :  { %3937 = vmatprep.mubr.msk.f32.mxu0 %vm2774_vm10, %v5979_v37  ;;  %v6007_v1 = vld [vmem:[#allocation2 + $0x10] sm:$0xff]  ;;  %4039 = vmatprep.subr.bf16.mxu1 %v4376_v33  ;;  %v6168_v50 = vld [vmem:[#allocation2 + $0x40] sm:$0xff] }
 0x1b8   :  { %v2913_v40 = vld [vmem:[#allocation2 + $0x12] sm:$0xff]  ;;  %4011 = vmatprep.subr.bf16.mxu0 %v4376_v33 }
 0x1b9   :  { %v5991_v24 = vld [vmem:[#allocation2 + $0x71] sm:$0xff]  ;;  %v2920_v8 = vld [vmem:[#allocation2 + $0x82] sm:$0xff] }
 0x1ba   :  { %v4068_v28 = vpack.i.bf16 %v2857_v27, %v5991_v24  ;;  %v5994_v17 = vld [vmem:[#allocation2 + $0x72] sm:$0xff]  ;;  %v6020_v18 = vld [vmem:[#allocation2 + $0x80] sm:$0xff]  ;;  %4048 = vmatpush1.bf16.msra.mxu1 %v4012_v5  ;;  %4013 = vmatpush1.bf16.msra.mxu0 %v4012_v5 }
 0x1bb   :  { %v4073_v31 = vpack.i.bf16 %v2873_v34, %v5994_v17  ;;  %v6026_v30 = vld [vmem:[#allocation2 + $0x81] sm:$0xff]  ;;  %v6034_v25 = vld [vmem:[#allocation2 + $0x30] sm:$0xff]  ;;  %4040 = vmatprep.subr.bf16.mxu1 %v4376_v33  ;;  %4014 = vmatprep.subr.bf16.mxu0 %v4376_v33 }
 0x1bc   :  { %4069 = vrot.lane.b32.xlu0 %v4068_v28, %s4369_s0  ;;  %v2899_v36 = vld [vmem:[#allocation2 + $0x31] sm:$0xff] }
 0x1bd   :  { %v6060_v20 = vld [vmem:[#allocation2 + $0x32] sm:$0xff] }
 0x1be   :  { %v3550_v27 = vld [vmem:[%s6541_s3 + $0x30] sm:$0xff]  ;;  %v3551_v28 = vld [vmem:[%s6541_s3 + $0x38] sm:$0xff] }
 0x1bf   :  { %v6160_v52 = vld [vmem:[#allocation2 + $0x52] sm:$0xff] }
 0x1c0   :  { %4074 = vrot.lane.b32.xlu0 %v4073_v31, %s4371_s12 }
 0x1dd   :  { %v3991_v60 = vpop.f32.mrb[8].mxu0 }
 0x1de   :  { %v2725_v44 = vadd.f32 %v3991_v60, %v5723_v14  ;;  %v2719_v54 = vpop.f32.mrb[9].mxu0  ;;  %v3549_v60 = vld [vmem:[%s6541_s3 + $0x28] sm:$0xff] }
 0x1df   :  { %v2720_v22 = vadd.f32 %v5723_v14, %v2719_v54  ;;  %v2969_v54 = vld [vmem:[#allocation2 + $0x92] sm:$0xff] }
 0x1e0   :  { %v2767_v51 = vmax.f32 %v2725_v44, 0.0  ;;  %3944 = vmatprep.mubr.msk.f32.mxu1 %vm2774_vm10, %v2969_v54  ;;  %v6180_v54 = vld [vmem:[#allocation2 + $0x42] sm:$0xff] }
 0x1e1   :  { %v2766_v29 = vmax.f32 %v2720_v22, 0.0  ;;  %v6076_v22 = vld [vmem:[#allocation2 + $0x20] sm:$0xff] }
 0x1e2   :  { %2826 = vst.msk [vmem:[#allocation2 + $0xc1] sm:$0xff] %vm2774_vm10, %v2767_v51  ;;  %v4015_v51 = vpack.c.bf16 %v3549_v60, %v3548_v23 }
 0x1e3   :  { %2825 = vst.msk [vmem:[#allocation2 + $0xb1] sm:$0xff] %vm2774_vm10, %v2766_v29 }
 0x1e4   :  { %4049 = vmatpush1.bf16.msra.mxu1 %v4015_v51  ;;  %4016 = vmatpush1.bf16.msra.mxu0 %v4015_v51 }
 0x1e5   :  { %4041 = vmatprep.subr.bf16.mxu1 %v4376_v33  ;;  %4017 = vmatprep.subr.bf16.mxu0 %v4376_v33 }
 0x1e9   :  { %v5997_v2 = vld [vmem:[#allocation2 + $0xc0] sm:$0xff] }
 0x1ea   :  { %v4078_v43 = vpack.i.bf16 %v5997_v2, %v2937_v12  ;;  %v2954_v49 = vld [vmem:[#allocation2 + $0xc1] sm:$0xff]  ;;  %v4088_v10 = vpack.i.bf16 %v5997_v2, %v6007_v1  ;;  %v2921_v56 = vld [vmem:[#allocation2 + $0xb2] sm:$0xff] }
 0x1eb   :  { %v4083_v13 = vpack.i.bf16 %v2954_v49, %v2953_v57  ;;  %v4093_v35 = vpack.i.bf16 %v2954_v49, %v2897_v53  ;;  %v6004_v55 = vld [vmem:[#allocation2 + $0xc2] sm:$0xff]  ;;  %v4123_v61 = vpack.i.bf16 %v2921_v56, %v2920_v8  ;;  %v2858_v45 = vld [vmem:[#allocation2 + $0xb1] sm:$0xff]  ;;  %v4133_v21 = vpack.i.bf16 %v2921_v56, %v2865_v15 }
 0x1ec   :  { %4079 = vrot.lane.b32.xlu1 %v4078_v43, %s4370_s11  ;;  %v4103_v46 = vpack.i.bf16 %v6004_v55, %v2913_v40  ;;  %v4128_v19 = vpack.i.bf16 %v2858_v45, %v2849_v11  ;;  %v6016_v63 = vld [vmem:[#allocation2 + $0xb0] sm:$0xff]  ;;  %v4118_v16 = vpack.i.bf16 %v2858_v45, %v6026_v30  ;;  %v2946_v12 = vld [vmem:[#allocation2 + $0x21] sm:$0xff]  ;;  %v4018_v43 = vpack.c.bf16 %v3551_v28, %v3550_v27  ;;  %v3559_v11 = vld [vmem:[%s6541_s3 + $0x78] sm:$0xff] }
 0x1ed   :  { %4094 = vrot.lane.b32.xlu0 %v4093_v35, %s4373_s14  ;;  %v4113_v3 = vpack.i.bf16 %v6016_v63, %v6020_v18  ;;  %v3552_v57 = vld [vmem:[%s6541_s3 + $0x40] sm:$0xff]  ;;  %v3553_v49 = vld [vmem:[%s6541_s3 + $0x48] sm:$0xff]  ;;  %v3554_v53 = vld [vmem:[%s6541_s3 + $0x50] sm:$0xff] }
 0x1ee   :  { %4050 = vmatpush1.bf16.msra.mxu1 %v4018_v43  ;;  %4019 = vmatpush1.bf16.msra.mxu0 %v4018_v43  ;;  %v3556_v56 = vld [vmem:[%s6541_s3 + $0x60] sm:$0xff]  ;;  %v3557_v8 = vld [vmem:[%s6541_s3 + $0x68] sm:$0xff] }
 0x1ef   :  { %4042 = vmatprep.subr.bf16.mxu1 %v4376_v33  ;;  %4020 = vmatprep.subr.bf16.mxu0 %v4376_v33  ;;  %v3561_v15 = vld [vmem:[%s6541_s3 + $0x88] sm:$0xff] }
 0x1f0   :  { %4084 = vrot.lane.b32.xlu1 %v4083_v13, %s4372_s13  ;;  %v4021_v13 = vpack.c.bf16 %v3553_v49, %v3552_v57 }
 0x1f1   :  { %4104 = vrot.lane.b32.xlu0 %v4103_v46, %s4375_s16 }
 0x1f2   :  { %4051 = vmatpush1.bf16.msra.mxu1 %v4021_v13  ;;  %4022 = vmatpush1.bf16.msra.mxu0 %v4021_v13 }
 0x1f3   :  { %4043 = vmatprep.subr.bf16.mxu1 %v4376_v33  ;;  %4023 = vmatprep.subr.bf16.mxu0 %v4376_v33 }
 0x1f4   :  { %4089 = vrot.lane.b32.xlu1 %v4088_v10, %s4374_s15 }
 0x1f5   :  { %4124 = vrot.lane.b32.xlu0 %v4123_v61, %s4375_s16  ;;  %v4027_v61 = vpack.c.bf16 %v3557_v8, %v3556_v56 }
 0x1f8   :  { %4099 = vrot.lane.b32.xlu1 %v4093_v35, %s4369_s0  ;;  %v3555_v35 = vld [vmem:[%s6541_s3 + $0x58] sm:$0xff] }
 0x1f9   :  { %4129 = vrot.lane.b32.xlu0 %v4128_v19, %s4369_s0  ;;  %v4024_v40 = vpack.c.bf16 %v3555_v35, %v3554_v53  ;;  %v3560_v19 = vld [vmem:[%s6541_s3 + $0x80] sm:$0xff] }
 0x1fb   :  { %4052 = vmatpush1.bf16.msra.mxu1 %v4024_v40  ;;  %4025 = vmatpush1.bf16.msra.mxu0 %v4024_v40 }
 0x1fc   :  { %4109 = vrot.lane.b32.xlu1 %v4103_v46, %s4371_s12  ;;  %4044 = vmatprep.subr.bf16.mxu1 %v4376_v33 }
 0x1fd   :  { %4134 = vrot.lane.b32.xlu0 %v4133_v21, %s4371_s12  ;;  %4026 = vmatprep.subr.bf16.mxu0 %v4376_v33 }
 0x1ff   :  { %4053 = vmatpush1.bf16.msra.mxu1 %v4027_v61  ;;  %4028 = vmatpush1.bf16.msra.mxu0 %v4027_v61 }
 0x200   :  { %4114 = vrot.lane.b32.xlu1 %v4113_v3, %s4374_s15  ;;  %4045 = vmatprep.subr.bf16.mxu1 %v4376_v33  ;;  %v4033_v3 = vpack.c.bf16 %v3561_v15, %v3560_v19 }
 0x201   :  { %4029 = vmatprep.subr.bf16.mxu0 %v4376_v33 }
 0x204   :  { %4119 = vrot.lane.b32.xlu1 %v4118_v16, %s4373_s14 }
 0x210   :  { %v3994_v0 = vpop.f32.mrb[10].mxu0 }
 0x211   :  { %v2735_v38 = vadd.f32 %v3994_v0, %v5723_v14  ;;  %v2729_v58 = vpop.f32.mrb[11].mxu0 }
 0x212   :  { %v2730_v39 = vadd.f32 %v5723_v14, %v2729_v58 }
 0x213   :  { %v2769_v47 = vmax.f32 %v2735_v38, 0.0 }
 0x214   :  { %v2768_v4 = vmax.f32 %v2730_v39, 0.0 }
 0x215   :  { %2828 = vst.msk [vmem:[#allocation2 + $0xe1] sm:$0xff] %vm2774_vm10, %v2769_v47  ;;  %v6148_v47 = vld [vmem:[#allocation2 + $0x50] sm:$0xff] }
 0x216   :  { %2827 = vst.msk [vmem:[#allocation2 + $0xd1] sm:$0xff] %vm2774_vm10, %v2768_v4 }
 0x21c   :  { %v6036_v7 = vld [vmem:[#allocation2 + $0xe0] sm:$0xff] }
 0x21d   :  { %v4143_v59 = vpack.i.bf16 %v6036_v7, %v6034_v25  ;;  %v2908_v32 = vld [vmem:[#allocation2 + $0xe1] sm:$0xff]  ;;  %v6072_v44 = vld [vmem:[#allocation2 + $0xd0] sm:$0xff] }
 0x21e   :  { %v4153_v42 = vpack.i.bf16 %v2908_v32, %v2899_v36  ;;  %v6050_v62 = vld [vmem:[#allocation2 + $0xe2] sm:$0xff]  ;;  %v4173_v29 = vpack.i.bf16 %v6072_v44, %v6076_v22  ;;  %v2955_v34 = vld [vmem:[#allocation2 + $0xd1] sm:$0xff] }
 0x21f   :  { %4144 = vrot.lane.b32.xlu0 %v4143_v59, %s4374_s15  ;;  %4139 = vrot.lane.b32.xlu1 %v4143_v59, %s4370_s11  ;;  %v4163_v41 = vpack.i.bf16 %v6050_v62, %v6060_v20  ;;  %v4183_v31 = vpack.i.bf16 %v2955_v34, %v2946_v12  ;;  %v6109_v10 = vld [vmem:[#allocation2 + $0xd2] sm:$0xff] }
 0x220   :  { %v4203_v46 = vpack.i.bf16 %v6109_v10, %v5979_v37  ;;  %v3558_v37 = vld [vmem:[%s6541_s3 + $0x70] sm:$0xff] }
 0x221   :  { %v4030_v45 = vpack.c.bf16 %v3559_v11, %v3558_v37  ;;  %v2901_v36 = vld [vmem:[#allocation2 + $0x51] sm:$0xff] }
 0x223   :  { %4154 = vrot.lane.b32.xlu0 %v4153_v42, %s4373_s14  ;;  %4149 = vrot.lane.b32.xlu1 %v4153_v42, %s4372_s13 }
 0x224   :  { %4054 = vmatpush1.bf16.msra.mxu1 %v4030_v45  ;;  %4031 = vmatpush1.bf16.msra.mxu0 %v4030_v45  ;;  %v2841_v45 = vld [vmem:[#allocation2 + $0xa0] sm:$0xff] }
 0x225   :  { %4046 = vmatprep.subr.bf16.mxu1 %v4376_v33  ;;  %4032 = vmatprep.subr.bf16.mxu0 %v4376_v33 }
 0x227   :  { %4164 = vrot.lane.b32.xlu0 %v4163_v41, %s4375_s16  ;;  %4159 = vrot.lane.b32.xlu1 %v4153_v42, %s4369_s0 }
 0x228   :  { %4055 = vmatpush1.bf16.msra.mxu1 %v4033_v3  ;;  %4034 = vmatpush1.bf16.msra.mxu0 %v4033_v3  ;;  %v2887_v3 = vld [vmem:[#allocation2 + $0x70] sm:$0xff] }
 0x229   :  { %4035 = vmatprep.subr.bf16.mxu0 %v4376_v33 }
 0x22b   :  { %4174 = vrot.lane.b32.xlu0 %v4173_v29, %s4370_s11  ;;  %4169 = vrot.lane.b32.xlu1 %v4163_v41, %s4371_s12  ;;  %v2948_v41 = vld [vmem:[#allocation2 + $0x41] sm:$0xff] }
 0x22f   :  { %4184 = vrot.lane.b32.xlu0 %v4183_v31, %s4372_s13  ;;  %4179 = vrot.lane.b32.xlu1 %v4173_v29, %s4374_s15  ;;  %v4070_v29 = vpop.permute.xlu0 %4069 }
 0x230   :  { %v4072_v37 = vunpack.i.h.bf16 %v4070_v29  ;;  %v4071_v11 = vunpack.i.l.bf16 %v4070_v29 }
 0x233   :  { %4194 = vrot.lane.b32.xlu0 %v4183_v31, %s4369_s0  ;;  %4189 = vrot.lane.b32.xlu1 %v4183_v31, %s4373_s14  ;;  %v4075_v28 = vpop.permute.xlu0 %4074 }
 0x234   :  { %v4077_v19 = vunpack.i.h.bf16 %v4075_v28  ;;  %v4076_v15 = vunpack.i.l.bf16 %v4075_v28 }
 0x237   :  { %4204 = vrot.lane.b32.xlu0 %v4203_v46, %s4371_s12  ;;  %4199 = vrot.lane.b32.xlu1 %v4203_v46, %s4375_s16 }
 0x242   :  { %v3997_v21 = vpop.f32.mrb[12].mxu0 }
 0x243   :  { %v2745_v16 = vadd.f32 %v3997_v21, %v5723_v14  ;;  %v2739_v0 = vpop.f32.mrb[13].mxu0 }
 0x244   :  { %v2740_v38 = vadd.f32 %v5723_v14, %v2739_v0 }
 0x245   :  { %v2771_v58 = vmax.f32 %v2745_v16, 0.0 }
 0x246   :  { %v2770_v39 = vmax.f32 %v2740_v38, 0.0 }
 0x247   :  { %2830 = vst.msk [vmem:[#allocation2 + $0x101] sm:$0xff] %vm2774_vm10, %v2771_v58 }
 0x248   :  { %2829 = vst.msk [vmem:[#allocation2 + $0xf1] sm:$0xff] %vm2774_vm10, %v2770_v39  ;;  %v3434_v39 = vsel %vm2774_vm10, %v2841_v45, %v4072_v37 }
 0x24e   :  { %v6150_v4 = vld [vmem:[#allocation2 + $0x100] sm:$0xff] }
 0x24f   :  { %v4213_v59 = vpack.i.bf16 %v6150_v4, %v6148_v47  ;;  %v2910_v32 = vld [vmem:[#allocation2 + $0x101] sm:$0xff]  ;;  %v6164_v9 = vld [vmem:[#allocation2 + $0xf0] sm:$0xff] }
 0x250   :  { %v4223_v42 = vpack.i.bf16 %v2910_v32, %v2901_v36  ;;  %v6156_v33 = vld [vmem:[#allocation2 + $0x102] sm:$0xff]  ;;  %v4243_v48 = vpack.i.bf16 %v6164_v9, %v6168_v50  ;;  %v2957_v5 = vld [vmem:[#allocation2 + $0xf1] sm:$0xff]  ;;  %v3451_v36 = vsel %vm3442_vm12, %v3434_v39, %v4077_v19 }
 0x251   :  { %4214 = vrot.lane.b32.xlu0 %v4213_v59, %s4374_s15  ;;  %4209 = vrot.lane.b32.xlu1 %v4213_v59, %s4370_s11  ;;  %v4233_v26 = vpack.i.bf16 %v6156_v33, %v6160_v52  ;;  %v4253_v23 = vpack.i.bf16 %v2957_v5, %v2948_v41  ;;  %v6176_v60 = vld [vmem:[#allocation2 + $0xf2] sm:$0xff]  ;;  %v3433_v59 = vsel %vm2774_vm10, %v2887_v3, %v4071_v11 }
 0x252   :  { %v4273_v51 = vpack.i.bf16 %v6176_v60, %v6180_v54  ;;  %v3450_v32 = vsel %vm3442_vm12, %v3433_v59, %v4076_v15 }
 0x255   :  { %4224 = vrot.lane.b32.xlu0 %v4223_v42, %s4373_s14  ;;  %4219 = vrot.lane.b32.xlu1 %v4223_v42, %s4372_s13 }
 0x259   :  { %4234 = vrot.lane.b32.xlu0 %v4233_v26, %s4375_s16  ;;  %4229 = vrot.lane.b32.xlu1 %v4223_v42, %s4369_s0 }
 0x25d   :  { %4244 = vrot.lane.b32.xlu0 %v4243_v48, %s4370_s11  ;;  %4239 = vrot.lane.b32.xlu1 %v4233_v26, %s4371_s12 }
 0x25e   :  { %v6186_v27 = vpop.permute.xlu1 %4079 }
 0x25f   :  { %v6190_v12 = vpop.permute.xlu0 %4094  ;;  %v4081_v28 = vunpack.i.l.bf16 %v6186_v27 }
 0x261   :  { %4254 = vrot.lane.b32.xlu0 %v4253_v23, %s4372_s13  ;;  %4249 = vrot.lane.b32.xlu1 %v4243_v48, %s4374_s15 }
 0x262   :  { %v6188_v34 = vpop.permute.xlu1 %4084 }
 0x263   :  { %v6198_v40 = vpop.permute.xlu0 %4104 }
 0x265   :  { %4264 = vrot.lane.b32.xlu0 %v4253_v23, %s4369_s0  ;;  %4259 = vrot.lane.b32.xlu1 %v4253_v23, %s4373_s14 }
 0x266   :  { %v6192_v43 = vpop.permute.xlu1 %4089 }
 0x267   :  { %v4125_v8 = vpop.permute.xlu0 %4124 }
 0x268   :  { %v4127_v5 = vunpack.i.h.bf16 %v4125_v8  ;;  %v4126_v41 = vunpack.i.l.bf16 %v4125_v8 }
 0x269   :  { %4274 = vrot.lane.b32.xlu0 %v4273_v51, %s4371_s12  ;;  %4269 = vrot.lane.b32.xlu1 %v4273_v51, %s4375_s16 }
 0x26a   :  { %v6195_v13 = vpop.permute.xlu1 %4099 }
 0x26b   :  { %v4130_v42 = vpop.permute.xlu0 %4129 }
 0x26c   :  { %v4132_v39 = vunpack.i.h.bf16 %v4130_v42  ;;  %v4131_v59 = vunpack.i.l.bf16 %v4130_v42 }
 0x26e   :  { %v6201_v56 = vpop.permute.xlu1 %4109 }
 0x26f   :  { %v4135_v45 = vpop.permute.xlu0 %4134 }
 0x272   :  { %v4115_v61 = vpop.permute.xlu1 %4114 }
 0x273   :  { %v4116_v16 = vunpack.i.l.bf16 %v4115_v61 }
 0x275   :  { %v3467_v51 = vsel %vm3459_vm13, %v3450_v32, %v4116_v16  ;;  %v4137_v32 = vunpack.i.h.bf16 %v4135_v45 }
 0x276   :  { %v4000_v31 = vpop.f32.mrb[14].mxu0  ;;  %v4120_v38 = vpop.permute.xlu1 %4119 }
 0x277   :  { %v2755_v57 = vadd.f32 %v4000_v31, %v5723_v14  ;;  %v2749_v49 = vpop.f32.mrb[15].mxu0  ;;  %v4122_v26 = vunpack.i.h.bf16 %v4120_v38  ;;  %v4121_v48 = vunpack.i.l.bf16 %v4120_v38 }
 0x278   :  { %v2750_v53 = vadd.f32 %v5723_v14, %v2749_v49  ;;  %v4117_v14 = vunpack.i.h.bf16 %v4115_v61  ;;  %v6225_v61 = vld [vmem:[#allocation2 + $0x60] sm:$0xff] }
 0x279   :  { %v2773_v35 = vmax.f32 %v2755_v57, 0.0  ;;  %v3484_v31 = vsel %vm3476_vm14, %v3467_v51, %v4121_v48 }
 0x27a   :  { %v2772_v46 = vmax.f32 %v2750_v53, 0.0  ;;  %v3468_v23 = vsel %vm3459_vm13, %v3451_v36, %v4117_v14  ;;  %v4086_v53 = vunpack.i.l.bf16 %v6188_v34  ;;  %v4136_v36 = vunpack.i.l.bf16 %v4135_v45 }
 0x27b   :  { %2832 = vst.msk [vmem:[#allocation2 + $0x121] sm:$0xff] %vm2774_vm10, %v2773_v35  ;;  %v3485_v57 = vsel %vm3476_vm14, %v3468_v23, %v4122_v26  ;;  %v3501_v35 = vsel %vm3493_vm15, %v3484_v31, %v4126_v41  ;;  %v2945_v41 = vld [vmem:[#allocation2 + $0x130] sm:$0xff]  ;;  %v3435_v23 = vsel %vm2774_vm10, %v6016_v63, %v4132_v39 }
 0x27c   :  { %2831 = vst.msk [vmem:[#allocation2 + $0x111] sm:$0xff] %vm2774_vm10, %v2772_v46  ;;  %v3502_v46 = vsel %vm3493_vm15, %v3485_v57, %v4127_v5  ;;  %v3518_v8 = vsel %vm3510_vm0, %v3501_v35, %v4081_v28  ;;  %v4091_v57 = vunpack.i.l.bf16 %v6192_v43  ;;  %v4338_v63 = vpack.i.bf16 %v2945_v41, %v6020_v18 }
 0x27d   :  { %v3535_v37 = vsel %vm3527_vm1, %v3518_v8, %v4086_v53  ;;  %v4111_v41 = vunpack.i.l.bf16 %v6201_v56 }
 0x27e   :  { %3717 = vmatmul.mubr.f32.vlgmr.msra.gmra.mrb[0].mxu1 %v3535_v37 }
 0x27f   :  { %3945 = vmatprep.mubr.msk.f32.mxu1 %vm2774_vm10, %v6004_v55 }
 0x282   :  { %v2896_v21 = vld [vmem:[#allocation2 + $0x120] sm:$0xff] }
 0x283   :  { %v4283_v0 = vpack.i.bf16 %v2896_v21, %v2887_v3  ;;  %v2912_v58 = vld [vmem:[#allocation2 + $0x121] sm:$0xff]  ;;  %v6216_v49 = vld [vmem:[#allocation2 + $0x110] sm:$0xff]  ;;  %v4087_v3 = vunpack.i.h.bf16 %v6188_v34 }
 0x284   :  { %v4293_v29 = vpack.i.bf16 %v2912_v58, %v5991_v24  ;;  %v4082_v24 = vunpack.i.h.bf16 %v6186_v27  ;;  %v4298_v11 = vpack.i.bf16 %v6216_v49, %v6225_v61  ;;  %v2959_v15 = vld [vmem:[#allocation2 + $0x111] sm:$0xff]  ;;  %v2950_v27 = vld [vmem:[#allocation2 + $0x61] sm:$0xff] }
 0x285   :  { %4284 = vrot.lane.b32.xlu0 %v4283_v0, %s4374_s15  ;;  %4279 = vrot.lane.b32.xlu1 %v4283_v0, %s4370_s11  ;;  %v4308_v14 = vpack.i.bf16 %v2959_v15, %v2950_v27  ;;  %v6237_v16 = vld [vmem:[#allocation2 + $0x112] sm:$0xff]  ;;  %v6247_v0 = vld [vmem:[#allocation2 + $0x62] sm:$0xff]  ;;  %v4107_v15 = vunpack.i.h.bf16 %v6198_v40 }
 0x286   :  { %v3519_v19 = vsel %vm3510_vm0, %v3502_v46, %v4082_v24  ;;  %v4323_v38 = vpack.i.bf16 %v6237_v16, %v6247_v0  ;;  %v6251_v58 = vld [vmem:[#allocation2 + $0x122] sm:$0xff]  ;;  %v4097_v46 = vunpack.i.h.bf16 %v6190_v12  ;;  %v4096_v24 = vunpack.i.l.bf16 %v6190_v12 }
 0x287   :  { %v3536_v21 = vsel %vm3527_vm1, %v3519_v19, %v4087_v3  ;;  %v4328_v5 = vpack.i.bf16 %v6251_v58, %v5994_v17  ;;  %v4092_v17 = vunpack.i.h.bf16 %v6192_v43  ;;  %v4106_v3 = vunpack.i.l.bf16 %v6198_v40 }
 0x288   :  { %3722 = vmatmul.mubr.f32.gmra.mrb[2].mxu1 %v3536_v21 }
 0x289   :  { %4294 = vrot.lane.b32.xlu0 %v4293_v29, %s4373_s14  ;;  %4289 = vrot.lane.b32.xlu1 %v4293_v29, %s4372_s13  ;;  %v3452_v29 = vsel %vm3442_vm12, %v3435_v23, %v4137_v32  ;;  %v4101_v32 = vunpack.i.l.bf16 %v6195_v13 }
 0x28a   :  { %3946 = vmatprep.mubr.msk.f32.mxu1 %vm2774_vm10, %v6109_v10  ;;  %v2833_v10 = vld [vmem:[#allocation2] sm:$0xff]  ;;  %v3469_v35 = vsel %vm3459_vm13, %v3452_v29, %v4092_v17 }
 0x28b   :  { %v3426_v42 = vsel %vm2774_vm10, %v2833_v10, %v4131_v59  ;;  %v3486_v19 = vsel %vm3476_vm14, %v3469_v35, %v4097_v46  ;;  %v4102_v10 = vunpack.i.h.bf16 %v6195_v13 }
 0x28c   :  { %v3443_v51 = vsel %vm3442_vm12, %v3426_v42, %v4136_v36 }
 0x28d   :  { %4299 = vrot.lane.b32.xlu0 %v4298_v11, %s4370_s11  ;;  %4304 = vrot.lane.b32.xlu1 %v4298_v11, %s4374_s15  ;;  %v3460_v53 = vsel %vm3459_vm13, %v3443_v51, %v4091_v57  ;;  %v2961_v11 = vld [vmem:[#allocation2 + $0x131] sm:$0xff]  ;;  %v3436_v17 = vsel %vm2774_vm10, %v5997_v2, %v4102_v10  ;;  %v3427_v57 = vsel %vm2774_vm10, %v6007_v1, %v4101_v32  ;;  %s4378_s15 = smov [#allocation3]  }
 0x28e   :  { %v3477_v18 = vsel %vm3476_vm14, %v3460_v53, %v4096_v24 }
 0x28f   :  { %v3494_v12 = vsel %vm3493_vm15, %v3477_v18, %v4106_v3 }
 0x291   :  { %4309 = vrot.lane.b32.xlu0 %v4308_v14, %s4372_s13  ;;  %4314 = vrot.lane.b32.xlu1 %v4308_v14, %s4373_s14  ;;  %v6243_v34 = vpop.permute.xlu0 %4144  ;;  %v6245_v55 = vpop.permute.xlu1 %4139 }
 0x295   :  { %4319 = vrot.lane.b32.xlu0 %v4308_v14, %s4369_s0  ;;  %4324 = vrot.lane.b32.xlu1 %v4323_v38, %s4375_s16  ;;  %v6255_v26 = vpop.permute.xlu0 %4154  ;;  %v6257_v48 = vpop.permute.xlu1 %4149 }
 0x296   :  { %v4152_v1 = vunpack.i.h.bf16 %v6257_v48 }
 0x299   :  { %4334 = vrot.lane.b32.xlu0 %v4323_v38, %s4371_s12  ;;  %4329 = vrot.lane.b32.xlu1 %v4328_v5, %s4375_s16  ;;  %v6268_v28 = vpop.permute.xlu0 %4164  ;;  %v6270_v31 = vpop.permute.xlu1 %4159  ;;  %v3503_v38 = vsel %vm3493_vm15, %v3486_v19, %v4107_v15  ;;  %v4112_v5 = vunpack.i.h.bf16 %v6201_v56  ;;  %v3444_v56 = vsel %vm3442_vm12, %v3427_v57, %v4111_v41  ;;  %v4147_v41 = vunpack.i.h.bf16 %v6243_v34  ;;  %s3911_s16 = sshll.u32 %s4378_s15, 4  ;;  %s3912_s16 = int_to_ptr.vmem [resolvable:$true] %s3911_s16 }
 0x29a   :  { %s4343_s2 = scalar_lea.vmem %s3912_s16, 32  ;;  %p4348_p1 = scmp.lt.s32.totalorder %s3912_s16, %s3912_s16 }
 0x29b   :  { %p4344_p0 = scmp.ne.s32.totalorder %s3912_s16, %s4343_s2  ;;  %p4349_p2 = scmp.lt.s32.totalorder %s4343_s2, %s4343_s2 }
 0x29d   :  { %4339 = vrot.lane.b32.xlu0 %v4338_v63, %s4370_s11  ;;  %3390 = vrot.lane.b32.xlu1 %v6026_v30, %s4372_s13  ;;  %v4175_v8 = vpop.permute.xlu0 %4174  ;;  %v6282_v37 = vpop.permute.xlu1 %4169  ;;  %v3453_v63 = vsel %vm3442_vm12, %v3436_v17, %v4112_v5  ;;  %p4350_p3 = por %p4349_p2, %p4348_p1 }
 0x29e   :  { %v4177_v43 = vunpack.i.h.bf16 %v4175_v8  ;;  %v4176_v45 = vunpack.i.l.bf16 %v4175_v8  ;;  %v4141_v8 = vunpack.i.l.bf16 %v6245_v55 }
 0x29f   :  { %p4351_p4 = pnand %p4350_p3, %p4344_p0 }
 0x2a0   :  { %v3511_v39 = vsel %vm3510_vm0, %v3494_v12, %v4176_v45  ;;  %v3520_v59 = vsel %vm3510_vm0, %v3503_v38, %v4177_v43  ;;  %v4151_v43 = vunpack.i.l.bf16 %v6257_v48 }
 0x2a1   :  { %3408 = vrot.lane.b32.xlu0 %v2961_v11, %s4372_s13  ;;  %v4185_v30 = vpop.permute.xlu0 %4184  ;;  %v4180_v27 = vpop.permute.xlu1 %4179 }
 0x2a2   :  { %v4187_v21 = vunpack.i.h.bf16 %v4185_v30  ;;  %v4186_v14 = vunpack.i.l.bf16 %v4185_v30  ;;  %v4182_v42 = vunpack.i.h.bf16 %v4180_v27  ;;  %v4181_v51 = vunpack.i.l.bf16 %v4180_v27 }
 0x2a4   :  { %v3528_v40 = vsel %vm3527_vm1, %v3511_v39, %v4186_v14  ;;  %v3537_v36 = vsel %vm3527_vm1, %v3520_v59, %v4187_v21  ;;  %v3461_v35 = vsel %vm3459_vm13, %v3444_v56, %v4181_v51 }
 0x2a5   :  { %3682 = vmatmul.mubr.f32.vlgmr.msra.gmra.mrb[16].mxu0 %v3528_v40  ;;  %3727 = vmatmul.mubr.f32.gmra.mrb[4].mxu1 %v3537_v36  ;;  %v4190_v23 = vpop.permute.xlu1 %4189  ;;  %v4195_v48 = vpop.permute.xlu0 %4194 }
 0x2a6   :  { %3938 = vmatprep.mubr.msk.f32.mxu0 %vm2774_vm10, %v6060_v20  ;;  %3947 = vmatprep.mubr.msk.f32.mxu1 %vm2774_vm10, %v6050_v62  ;;  %v4192_v13 = vunpack.i.h.bf16 %v4190_v23  ;;  %v4191_v29 = vunpack.i.l.bf16 %v4190_v23  ;;  %v3470_v20 = vsel %vm3459_vm13, %v3453_v63, %v4182_v42  ;;  %v4142_v62 = vunpack.i.h.bf16 %v6245_v55 }
 0x2a7   :  { %v4197_v21 = vunpack.i.h.bf16 %v4195_v48  ;;  %v4196_v14 = vunpack.i.l.bf16 %v4195_v48  ;;  %v4146_v23 = vunpack.i.l.bf16 %v6243_v34  ;;  %v4166_v34 = vunpack.i.l.bf16 %v6268_v28 }
 0x2a8   :  { %v3478_v2 = vsel %vm3476_vm14, %v3461_v35, %v4191_v29  ;;  %v3487_v11 = vsel %vm3476_vm14, %v3470_v20, %v4192_v13 }
 0x2a9   :  { %v4200_v53 = vpop.permute.xlu1 %4199  ;;  %v4205_v30 = vpop.permute.xlu0 %4204 }
 0x2aa   :  { %v4202_v46 = vunpack.i.h.bf16 %v4200_v53  ;;  %v4201_v24 = vunpack.i.l.bf16 %v4200_v53  ;;  %v4207_v38 = vunpack.i.h.bf16 %v4205_v30  ;;  %v4206_v39 = vunpack.i.l.bf16 %v4205_v30 }
 0x2ab   :  { %v4167_v53 = vunpack.i.h.bf16 %v6268_v28 }
 0x2ac   :  { %v3495_v45 = vsel %vm3493_vm15, %v3478_v2, %v4201_v24  ;;  %v3504_v18 = vsel %vm3493_vm15, %v3487_v11, %v4202_v46  ;;  %v4162_v11 = vunpack.i.h.bf16 %v6270_v31 }
 0x2ad   :  { %v3512_v19 = vsel %vm3510_vm0, %v3495_v45, %v4141_v8  ;;  %v3521_v15 = vsel %vm3510_vm0, %v3504_v18, %v4142_v62  ;;  %v4172_v45 = vunpack.i.h.bf16 %v6282_v37  ;;  %v4171_v18 = vunpack.i.l.bf16 %v6282_v37 }
 0x2ae   :  { %v3529_v3 = vsel %vm3527_vm1, %v3512_v19, %v4151_v43  ;;  %v3538_v55 = vsel %vm3527_vm1, %v3521_v15, %v4152_v1  ;;  %v4161_v1 = vunpack.i.l.bf16 %v6270_v31  ;;  %v3438_v48 = vsel %vm2774_vm10, %v6036_v7, %v4162_v11 }
 0x2af   :  { %3687 = vmatmul.mubr.f32.gmra.mrb[18].mxu0 %v3529_v3  ;;  %3732 = vmatmul.mubr.f32.gmra.mrb[6].mxu1 %v3538_v55 }
 0x2b0   :  { %3939 = vmatprep.mubr.msk.f32.mxu0 %vm2774_vm10, %v6180_v54  ;;  %3948 = vmatprep.mubr.msk.f32.mxu1 %vm2774_vm10, %v6176_v60  ;;  %v3437_v54 = vsel %vm2774_vm10, %v6072_v44, %v4197_v21  ;;  %v3428_v60 = vsel %vm2774_vm10, %v6076_v22, %v4196_v14  ;;  %v4157_v44 = vunpack.i.h.bf16 %v6255_v26  ;;  %v4156_v22 = vunpack.i.l.bf16 %v6255_v26 }
 0x2b1   :  { %v3445_v32 = vsel %vm3442_vm12, %v3428_v60, %v4206_v39  ;;  %v3454_v40 = vsel %vm3442_vm12, %v3437_v54, %v4207_v38  ;;  %v3429_v30 = vsel %vm2774_vm10, %v6034_v25, %v4161_v1  ;;  %v3455_v21 = vsel %vm3442_vm12, %v3438_v48, %v4172_v45 }
 0x2b2   :  { %v3462_v42 = vsel %vm3459_vm13, %v3445_v32, %v4146_v23  ;;  %v3471_v51 = vsel %vm3459_vm13, %v3454_v40, %v4147_v41  ;;  %v3446_v37 = vsel %vm3442_vm12, %v3429_v30, %v4171_v18 }
 0x2b3   :  { %v3479_v56 = vsel %vm3476_vm14, %v3462_v42, %v4156_v22  ;;  %v3488_v63 = vsel %vm3476_vm14, %v3471_v51, %v4157_v44 }
 0x2b4   :  { %v3496_v62 = vsel %vm3493_vm15, %v3479_v56, %v4166_v34  ;;  %v3505_v26 = vsel %vm3493_vm15, %v3488_v63, %v4167_v53 }
 0x2c3   :  { %v6327_v27 = vpop.permute.xlu0 %4214  ;;  %v6329_v12 = vpop.permute.xlu1 %4209 }
 0x2c4   :  { %v4211_v60 = vunpack.i.l.bf16 %v6329_v12 }
 0x2c7   :  { %v6331_v59 = vpop.permute.xlu0 %4224  ;;  %v6333_v10 = vpop.permute.xlu1 %4219 }
 0x2c8   :  { %v4222_v25 = vunpack.i.h.bf16 %v6333_v10  ;;  %v4221_v40 = vunpack.i.l.bf16 %v6333_v10 }
 0x2cb   :  { %v6341_v36 = vpop.permute.xlu0 %4234  ;;  %v6343_v5 = vpop.permute.xlu1 %4229 }
 0x2cc   :  { %v4231_v11 = vunpack.i.l.bf16 %v6343_v5 }
 0x2cf   :  { %v4245_v13 = vpop.permute.xlu0 %4244  ;;  %v6351_v29 = vpop.permute.xlu1 %4239 }
 0x2d0   :  { %v4247_v17 = vunpack.i.h.bf16 %v4245_v13  ;;  %v4246_v57 = vunpack.i.l.bf16 %v4245_v13 }
 0x2d2   :  { %v3513_v8 = vsel %vm3510_vm0, %v3496_v62, %v4246_v57  ;;  %v3522_v2 = vsel %vm3510_vm0, %v3505_v26, %v4247_v17  ;;  %v4216_v62 = vunpack.i.l.bf16 %v6327_v27 }
 0x2d3   :  { %v4255_v35 = vpop.permute.xlu0 %4254  ;;  %v4250_v20 = vpop.permute.xlu1 %4249 }
 0x2d4   :  { %v4257_v46 = vunpack.i.h.bf16 %v4255_v35  ;;  %v4256_v24 = vunpack.i.l.bf16 %v4255_v35  ;;  %v4252_v15 = vunpack.i.h.bf16 %v4250_v20  ;;  %v4251_v3 = vunpack.i.l.bf16 %v4250_v20 }
 0x2d6   :  { %v3530_v43 = vsel %vm3527_vm1, %v3513_v8, %v4256_v24  ;;  %v3539_v28 = vsel %vm3527_vm1, %v3522_v2, %v4257_v46  ;;  %v3463_v38 = vsel %vm3459_vm13, %v3446_v37, %v4251_v3  ;;  %v4217_v24 = vunpack.i.h.bf16 %v6327_v27 }
 0x2d7   :  { %3692 = vmatmul.mubr.f32.gmra.mrb[20].mxu0 %v3530_v43  ;;  %3737 = vmatmul.mubr.f32.gmra.mrb[8].mxu1 %v3539_v28  ;;  %v4260_v19 = vpop.permute.xlu1 %4259  ;;  %v4265_v10 = vpop.permute.xlu0 %4264  ;;  %v4232_v2 = vunpack.i.h.bf16 %v6343_v5  ;;  %v4242_v3 = vunpack.i.h.bf16 %v6351_v29  ;;  %v3431_v5 = vsel %vm2774_vm10, %v6148_v47, %v4231_v11 }
 0x2d8   :  { %3940 = vmatprep.mubr.msk.f32.mxu0 %vm2774_vm10, %v6160_v52  ;;  %3949 = vmatprep.mubr.msk.f32.mxu1 %vm2774_vm10, %v6156_v33  ;;  %v4262_v31 = vunpack.i.h.bf16 %v4260_v19  ;;  %v4261_v55 = vunpack.i.l.bf16 %v4260_v19  ;;  %v3472_v52 = vsel %vm3459_vm13, %v3455_v21, %v4252_v15  ;;  %v4212_v33 = vunpack.i.h.bf16 %v6329_v12 }
 0x2d9   :  { %v4267_v13 = vunpack.i.h.bf16 %v4265_v10  ;;  %v4266_v17 = vunpack.i.l.bf16 %v4265_v10  ;;  %v4237_v19 = vunpack.i.h.bf16 %v6341_v36  ;;  %v4236_v15 = vunpack.i.l.bf16 %v6341_v36 }
 0x2da   :  { %v3480_v7 = vsel %vm3476_vm14, %v3463_v38, %v4261_v55  ;;  %v3489_v32 = vsel %vm3476_vm14, %v3472_v52, %v4262_v31  ;;  %v3440_v31 = vsel %vm2774_vm10, %v6150_v4, %v4232_v2 }
 0x2db   :  { %v4270_v14 = vpop.permute.xlu1 %4269  ;;  %v4275_v22 = vpop.permute.xlu0 %4274  ;;  %v3439_v34 = vsel %vm2774_vm10, %v6164_v9, %v4267_v13  ;;  %v3430_v35 = vsel %vm2774_vm10, %v6168_v50, %v4266_v17  ;;  %v4227_v9 = vunpack.i.h.bf16 %v6331_v59  ;;  %v4226_v50 = vunpack.i.l.bf16 %v6331_v59 }
 0x2dc   :  { %v4272_v39 = vunpack.i.h.bf16 %v4270_v14  ;;  %v4271_v54 = vunpack.i.l.bf16 %v4270_v14  ;;  %v4277_v57 = vunpack.i.h.bf16 %v4275_v22  ;;  %v4276_v56 = vunpack.i.l.bf16 %v4275_v22 }
 0x2dd   :  { %v4241_v59 = vunpack.i.l.bf16 %v6351_v29  ;;  %v3457_v47 = vsel %vm3442_vm12, %v3440_v31, %v4242_v3 }
 0x2de   :  { %v3497_v41 = vsel %vm3493_vm15, %v3480_v7, %v4271_v54  ;;  %v3506_v23 = vsel %vm3493_vm15, %v3489_v32, %v4272_v39 }
 0x2df   :  { %v3514_v42 = vsel %vm3510_vm0, %v3497_v41, %v4211_v60  ;;  %v3523_v51 = vsel %vm3510_vm0, %v3506_v23, %v4212_v33  ;;  %v3448_v4 = vsel %vm3442_vm12, %v3431_v5, %v4241_v59 }
 0x2e0   :  { %v3531_v44 = vsel %vm3527_vm1, %v3514_v42, %v4221_v40  ;;  %v3540_v12 = vsel %vm3527_vm1, %v3523_v51, %v4222_v25  ;;  %v2967_v40 = vld [vmem:[#allocation2 + $0x72] sm:$0xff] }
 0x2e1   :  { %3697 = vmatmul.mubr.f32.gmra.mrb[22].mxu0 %v3531_v44  ;;  %3742 = vmatmul.mubr.f32.gmra.mrb[10].mxu1 %v3540_v12 }
 0x2e2   :  { %3941 = vmatprep.mubr.msk.f32.mxu0 %vm2774_vm10, %v6247_v0  ;;  %3950 = vmatprep.mubr.msk.f32.mxu1 %vm2774_vm10, %v6237_v16  ;;  %v3447_v0 = vsel %vm3442_vm12, %v3430_v35, %v4276_v56  ;;  %v3456_v16 = vsel %vm3442_vm12, %v3439_v34, %v4277_v57 }
 0x2e3   :  { %v3464_v26 = vsel %vm3459_vm13, %v3447_v0, %v4216_v62  ;;  %v3473_v8 = vsel %vm3459_vm13, %v3456_v16, %v4217_v24 }
 0x2e4   :  { %v3481_v18 = vsel %vm3476_vm14, %v3464_v26, %v4226_v50  ;;  %v3490_v27 = vsel %vm3476_vm14, %v3473_v8, %v4227_v9  ;;  %v2977_v9 = vld [vmem:[#allocation2 + $0x132] sm:$0xff] }
 0x2e5   :  { %v3498_v38 = vsel %vm3493_vm15, %v3481_v18, %v4236_v15  ;;  %v3507_v36 = vsel %vm3493_vm15, %v3490_v27, %v4237_v19 }
 0x2f7   :  { %v6395_v63 = vpop.permute.xlu0 %4284  ;;  %v6397_v53 = vpop.permute.xlu1 %4279 }
 0x2f8   :  { %v4282_v12 = vunpack.i.h.bf16 %v6397_v53  ;;  %v4281_v10 = vunpack.i.l.bf16 %v6397_v53  ;;  %v4287_v17 = vunpack.i.h.bf16 %v6395_v63  ;;  %v4286_v57 = vunpack.i.l.bf16 %v6395_v63 }
 0x2fb   :  { %v6405_v20 = vpop.permute.xlu0 %4294  ;;  %v6407_v46 = vpop.permute.xlu1 %4289 }
 0x2fc   :  { %v4291_v35 = vunpack.i.l.bf16 %v6407_v46 }
 0x2ff   :  { %v4300_v1 = vpop.permute.xlu0 %4299  ;;  %v4305_v43 = vpop.permute.xlu1 %4304 }
 0x300   :  { %v4302_v28 = vunpack.i.h.bf16 %v4300_v1  ;;  %v4301_v45 = vunpack.i.l.bf16 %v4300_v1  ;;  %v4307_v55 = vunpack.i.h.bf16 %v4305_v43  ;;  %v4306_v48 = vunpack.i.l.bf16 %v4305_v43 }
 0x301   :  { %v4297_v1 = vunpack.i.h.bf16 %v6405_v20  ;;  %v4296_v43 = vunpack.i.l.bf16 %v6405_v20 }
 0x302   :  { %v3515_v29 = vsel %vm3510_vm0, %v3498_v38, %v4301_v45  ;;  %v3524_v54 = vsel %vm3510_vm0, %v3507_v36, %v4302_v28  ;;  %v3465_v7 = vsel %vm3459_vm13, %v3448_v4, %v4306_v48  ;;  %v3474_v32 = vsel %vm3459_vm13, %v3457_v47, %v4307_v55  ;;  %v3820_v36 = vld [vmem:[%s6543_s5] sm:$0xff] }
 0x303   :  { %v4310_v30 = vpop.permute.xlu0 %4309  ;;  %v4315_v37 = vpop.permute.xlu1 %4314  ;;  %v6485_v4 = vld [vmem:[%s6542_s4] ss:$0 sm:$0xff] }
 0x304   :  { %v4312_v21 = vunpack.i.h.bf16 %v4310_v30  ;;  %v4311_v14 = vunpack.i.l.bf16 %v4310_v30  ;;  %v4317_v52 = vunpack.i.h.bf16 %v4315_v37  ;;  %v4316_v39 = vunpack.i.l.bf16 %v4315_v37 }
 0x306   :  { %v3532_v33 = vsel %vm3527_vm1, %v3515_v29, %v4311_v14  ;;  %v3541_v60 = vsel %vm3527_vm1, %v3524_v54, %v4312_v21  ;;  %v3482_v22 = vsel %vm3476_vm14, %v3465_v7, %v4316_v39  ;;  %v3491_v13 = vsel %vm3476_vm14, %v3474_v32, %v4317_v52  ;;  %v3821_v52 = vld [vmem:[%s6543_s5 + $0x8] sm:$0xff] }
 0x307   :  { %v4320_v25 = vpop.permute.xlu0 %4319  ;;  %3702 = vmatmul.mubr.f32.gmra.mrb[24].mxu0 %v3532_v33  ;;  %3747 = vmatmul.mubr.f32.gmra.mrb[12].mxu1 %v3541_v60  ;;  %v4325_v41 = vpop.permute.xlu1 %4324  ;;  %v4036_v39 = vpack.c.bf16 %v3821_v52, %v3820_v36 }
 0x308   :  { %v4322_v23 = vunpack.i.h.bf16 %v4320_v25  ;;  %v4321_v42 = vunpack.i.l.bf16 %v4320_v25  ;;  %3942 = vmatprep.mubr.msk.f32.mxu0 %vm2774_vm10, %v2967_v40  ;;  %3951 = vmatprep.mubr.msk.f32.mxu1 %vm2774_vm10, %v6251_v58  ;;  %v4327_v51 = vunpack.i.h.bf16 %v4325_v41  ;;  %v4326_v44 = vunpack.i.l.bf16 %v4325_v41 }
 0x309   :  { %v4292_v58 = vunpack.i.h.bf16 %v6407_v46  ;;  %4037 = vmatpush3.bf16.msra.mxu0 %v4036_v39 }
 0x30a   :  { %v3499_v56 = vsel %vm3493_vm15, %v3482_v22, %v4326_v44  ;;  %v3508_v34 = vsel %vm3493_vm15, %v3491_v13, %v4327_v51  ;;  %v3441_v62 = vsel %vm2774_vm10, %v6216_v49, %v4322_v23  ;;  %v3432_v63 = vsel %vm2774_vm10, %v6225_v61, %v4321_v42  ;;  %v2968_v61 = vld [vmem:[#allocation2 + $0x82] sm:$0xff] }
 0x30b   :  { %v4335_v0 = vpop.permute.xlu0 %4334  ;;  %v4330_v16 = vpop.permute.xlu1 %4329  ;;  %v3516_v53 = vsel %vm3510_vm0, %v3499_v56, %v4281_v10  ;;  %v3525_v24 = vsel %vm3510_vm0, %v3508_v34, %v4282_v12 }
 0x30c   :  { %v4337_v26 = vunpack.i.h.bf16 %v4335_v0  ;;  %v4336_v8 = vunpack.i.l.bf16 %v4335_v0  ;;  %v4332_v50 = vunpack.i.h.bf16 %v4330_v16  ;;  %v4331_v2 = vunpack.i.l.bf16 %v4330_v16 }
 0x30d   :  { %v3533_v11 = vsel %vm3527_vm1, %v3516_v53, %v4291_v35  ;;  %v3542_v46 = vsel %vm3527_vm1, %v3525_v24, %v4292_v58 }
 0x30e   :  { %v3449_v28 = vsel %vm3442_vm12, %v3432_v63, %v4336_v8  ;;  %v3458_v49 = vsel %vm3442_vm12, %v3441_v62, %v4337_v26  ;;  %3707 = vmatmul.mubr.f32.gmra.mrb[26].mxu0 %v3533_v11  ;;  %3752 = vmatmul.mubr.f32.gmra.mrb[14].mxu1 %v3542_v46 }
 0x30f   :  { %v3466_v45 = vsel %vm3459_vm13, %v3449_v28, %v4286_v57  ;;  %v3475_v18 = vsel %vm3459_vm13, %v3458_v49, %v4287_v17  ;;  %v4340_v27 = vpop.permute.xlu0 %4339  ;;  %3943 = vmatprep.mubr.msk.f32.mxu0 %vm2774_vm10, %v2968_v61  ;;  %3952 = vmatprep.mubr.msk.f32.mxu1 %vm2774_vm10, %v2977_v9  ;;  %v3391_v3 = vpop.permute.xlu1 %3390 }
 0x310   :  { %v4342_v19 = vunpack.i.h.bf16 %v4340_v27  ;;  %v4341_v15 = vunpack.i.l.bf16 %v4340_v27  ;;  %v3483_v20 = vsel %vm3476_vm14, %v3466_v45, %v4296_v43  ;;  %v3492_v59 = vsel %vm3476_vm14, %v3475_v18, %v4297_v1 }
 0x311   :  { %v3500_v31 = vsel %vm3493_vm15, %v3483_v20, %v4331_v2  ;;  %v3509_v5 = vsel %vm3493_vm15, %v3492_v59, %v4332_v50 }
 0x312   :  { %v3517_v55 = vsel %vm3510_vm0, %v3500_v31, %v4341_v15  ;;  %v3526_v48 = vsel %vm3510_vm0, %v3509_v5, %v4342_v19 }
 0x313   :  { %v3409_v30 = vpop.permute.xlu0 %3408  ;;  %v3534_v37 = vsel %vm3527_vm1, %v3517_v55, %v3391_v3 }
 0x314   :  { %3712 = vmatmul.mubr.f32.gmra.mrb[28].mxu0 %v3534_v37  ;;  %v3543_v21 = vsel %vm3527_vm1, %v3526_v48, %v3409_v30 }
 0x315   :  { %3757 = vmatmul.mubr.f32.gmra.mrb[16].mxu1 %v3543_v21  ;;  %4005 = vmatprep.mubr.msk.f32.mxu0 %vm4377_vm2, %v4368_v6 }
 0x351   :  { %v6474_v14 = vpop.f32.mrb[0].mxu1 }
 0x352   :  { %v3720_v38 = vpop.f32.mrb[1].mxu1 }
 0x35b   :  { %v3723_v29 = vpop.f32.mrb[2].mxu1 }
 0x35c   :  { %v3725_v54 = vpop.f32.mrb[3].mxu1  ;;  %v3724_v47 = vadd.f32 %v6485_v4, %v3723_v29 }
 0x35e   :  { %v3770_v7 = vmax.f32 %v3724_v47, 0.0 }
 0x360   :  { %v3799_v23 = vsel %vm2774_vm10, %v3770_v7, 0.0 }
 0x378   :  { %v3683_v33 = vpop.f32.mrb[16].mxu0  ;;  %v3728_v60 = vpop.f32.mrb[4].mxu1 }
 0x379   :  { %v3729_v32 = vadd.f32 %v6485_v4, %v3728_v60  ;;  %v3685_v25 = vpop.f32.mrb[17].mxu0  ;;  %v3730_v40 = vpop.f32.mrb[5].mxu1  ;;  %v3684_v44 = vadd.f32 %v6485_v4, %v3683_v33 }
 0x37b   :  { %v3771_v41 = vmax.f32 %v3729_v32, 0.0  ;;  %v3762_v22 = vmax.f32 %v3684_v44, 0.0 }
 0x37d   :  { %v3800_v42 = vsel %vm2774_vm10, %v3771_v41, 0.0  ;;  %v3778_v6 = vsel %vm2774_vm10, %v3762_v22, 0.0 }
 0x37e   :  { %v3801_v51 = vadd.f32 %v3800_v42, %v3799_v23  ;;  %v3719_v23 = vadd.f32 %v6485_v4, %v6474_v14 }
 0x382   :  { %v3688_v12 = vpop.f32.mrb[18].mxu0  ;;  %v3733_v10 = vpop.f32.mrb[6].mxu1 }
 0x383   :  { %v3689_v13 = vadd.f32 %v6485_v4, %v3688_v12  ;;  %v3734_v17 = vadd.f32 %v6485_v4, %v3733_v10  ;;  %v3690_v57 = vpop.f32.mrb[19].mxu0  ;;  %v3735_v56 = vpop.f32.mrb[7].mxu1 }
 0x385   :  { %v3763_v34 = vmax.f32 %v3689_v13, 0.0  ;;  %v3772_v58 = vmax.f32 %v3734_v17, 0.0 }
 0x387   :  { %v3779_v35 = vsel %vm2774_vm10, %v3763_v34, 0.0  ;;  %v3802_v0 = vsel %vm2774_vm10, %v3772_v58, 0.0  ;;  %v3769_v34 = vmax.f32 %v3719_v23, 0.0 }
 0x388   :  { %v3780_v16 = vadd.f32 %v3779_v35, %v3778_v6  ;;  %v3803_v53 = vadd.f32 %v3802_v0, %v3801_v51 }
 0x3aa   :  { %v3693_v24 = vpop.f32.mrb[20].mxu0  ;;  %v3738_v62 = vpop.f32.mrb[8].mxu1 }
 0x3ab   :  { %v3694_v63 = vadd.f32 %v6485_v4, %v3693_v24  ;;  %v3739_v26 = vadd.f32 %v6485_v4, %v3738_v62  ;;  %v3695_v8 = vpop.f32.mrb[21].mxu0  ;;  %v3740_v9 = vpop.f32.mrb[9].mxu1 }
 0x3ad   :  { %v3764_v50 = vmax.f32 %v3694_v63, 0.0  ;;  %v3773_v2 = vmax.f32 %v3739_v26, 0.0 }
 0x3af   :  { %v3781_v11 = vsel %vm2774_vm10, %v3764_v50, 0.0  ;;  %v3804_v46 = vsel %vm2774_vm10, %v3773_v2, 0.0 }
 0x3b0   :  { %v3782_v1 = vadd.f32 %v3781_v11, %v3780_v16  ;;  %v3805_v43 = vadd.f32 %v3804_v46, %v3803_v53  ;;  %v3791_v16 = vsel %vm2774_vm10, %v3769_v34, 0.0 }
 0x3b4   :  { %v3698_v28 = vpop.f32.mrb[22].mxu0  ;;  %v3743_v49 = vpop.f32.mrb[10].mxu1 }
 0x3b5   :  { %v3699_v61 = vadd.f32 %v6485_v4, %v3698_v28  ;;  %v3744_v45 = vadd.f32 %v6485_v4, %v3743_v49  ;;  %v3700_v18 = vpop.f32.mrb[23].mxu0  ;;  %v3745_v27 = vpop.f32.mrb[11].mxu1  ;;  %v3953_v49 = vld [vmem:[%s6544_s6] ss:$0 sm:$0xff] }
 0x3b7   :  { %v3765_v19 = vmax.f32 %v3699_v61, 0.0  ;;  %v3774_v15 = vmax.f32 %v3744_v45, 0.0 }
 0x3b9   :  { %v3783_v3 = vsel %vm2774_vm10, %v3765_v19, 0.0  ;;  %v3806_v20 = vsel %vm2774_vm10, %v3774_v15, 0.0 }
 0x3ba   :  { %v3784_v59 = vadd.f32 %v3783_v3, %v3782_v1  ;;  %v3807_v31 = vadd.f32 %v3806_v20, %v3805_v43 }
 0x3da   :  { %v3703_v5 = vpop.f32.mrb[24].mxu0  ;;  %v3748_v55 = vpop.f32.mrb[12].mxu1 }
 0x3db   :  { %v3704_v48 = vadd.f32 %v6485_v4, %v3703_v5  ;;  %v3749_v30 = vadd.f32 %v6485_v4, %v3748_v55  ;;  %v3705_v37 = vpop.f32.mrb[25].mxu0  ;;  %v3750_v21 = vpop.f32.mrb[13].mxu1 }
 0x3dd   :  { %v3766_v38 = vmax.f32 %v3704_v48, 0.0  ;;  %v3775_v36 = vmax.f32 %v3749_v30, 0.0 }
 0x3df   :  { %v3785_v52 = vsel %vm2774_vm10, %v3766_v38, 0.0  ;;  %v3808_v39 = vsel %vm2774_vm10, %v3775_v36, 0.0 }
 0x3e0   :  { %v3786_v29 = vadd.f32 %v3785_v52, %v3784_v59  ;;  %v3809_v54 = vadd.f32 %v3808_v39, %v3807_v31 }
 0x3e1   :  { %v3708_v47 = vpop.f32.mrb[26].mxu0  ;;  %v3753_v33 = vpop.f32.mrb[14].mxu1 }
 0x3e2   :  { %v3709_v60 = vadd.f32 %v6485_v4, %v3708_v47  ;;  %v3754_v7 = vadd.f32 %v6485_v4, %v3753_v33  ;;  %v3710_v32 = vpop.f32.mrb[27].mxu0  ;;  %v3755_v25 = vpop.f32.mrb[15].mxu1 }
 0x3e4   :  { %v3767_v40 = vmax.f32 %v3709_v60, 0.0  ;;  %v3776_v41 = vmax.f32 %v3754_v7, 0.0 }
 0x3e6   :  { %v3787_v42 = vsel %vm2774_vm10, %v3767_v40, 0.0  ;;  %v3810_v51 = vsel %vm2774_vm10, %v3776_v41, 0.0 }
 0x3e7   :  { %v3788_v44 = vadd.f32 %v3787_v42, %v3786_v29  ;;  %v3811_v12 = vadd.f32 %v3810_v51, %v3809_v54  ;;  %v3713_v10 = vpop.f32.mrb[28].mxu0 }
 0x3e8   :  { %v3714_v22 = vadd.f32 %v6485_v4, %v3713_v10  ;;  %v3715_v13 = vpop.f32.mrb[29].mxu0  ;;  %v3758_v17 = vpop.f32.mrb[16].mxu1 }
 0x3e9   :  { %v3759_v57 = vadd.f32 %v6485_v4, %v3758_v17  ;;  %v3760_v56 = vpop.f32.mrb[17].mxu1 }
 0x3ea   :  { %v3768_v58 = vmax.f32 %v3714_v22, 0.0 }
 0x3eb   :  { %v3777_v6 = vmax.f32 %v3759_v57, 0.0 }
 0x3ec   :  { %v3789_v35 = vsel %vm2774_vm10, %v3768_v58, 0.0 }
 0x3ed   :  { %v3790_v14 = vadd.f32 %v3789_v35, %v3788_v44  ;;  %v3812_v0 = vsel %vm2774_vm10, %v3777_v6, 0.0 }
 0x3ee   :  { %v3813_v53 = vadd.f32 %v3812_v0, %v3811_v12 }
 0x3ef   :  { %v3792_v24 = vadd.f32 %v3791_v16, %v3790_v14 }
 0x3f0   :  { %v3814_v62 = vrot.slane %v3813_v53, 4 }
 0x3f1   :  { %v3793_v63 = vrot.slane %v3792_v24, 4 }
 0x3f2   :  { %v3815_v26 = vadd.f32 %v3814_v62, %v3813_v53 }
 0x3f3   :  { %v3794_v8 = vadd.f32 %v3793_v63, %v3792_v24 }
 0x3f4   :  { %v3816_v9 = vrot.slane %v3815_v26, 2 }
 0x3f5   :  { %v3795_v50 = vrot.slane %v3794_v8, 2 }
 0x3f6   :  { %v3817_v4 = vadd.f32 %v3816_v9, %v3815_v26 }
 0x3f7   :  { %v3796_v2 = vadd.f32 %v3795_v50, %v3794_v8 }
 0x3f8   :  { %v3818_v11 = vrot.slane %v3817_v4, 1 }
 0x3f9   :  { %v3797_v46 = vrot.slane %v3796_v2, 1 }
 0x3fa   :  { %v3819_v1 = vadd.f32 %v3818_v11, %v3817_v4 }
 0x3fb   :  { %v3798_v43 = vadd.f32 %v3797_v46, %v3796_v2 }
 0x3fd   :  { %v3831_v28 = vsel %vm2351_vm3, %v3819_v1, %v3798_v43 }
 0x3fe   :  { %4006 = vmatmul.mubr.msk.f32.vlgmr.msra.gmra.mrb[30].mxu0 %vm2774_vm10, %v3831_v28 }
 0x4d1   :  { %v3900_v61 = vpop.f32.mrb[30].mxu0 }
 0x4d2   :  { %v3901_v45 = vadd.f32 %v3953_v49, %v3900_v61  ;;  %v4007_v18 = vpop.f32.mrb[31].mxu0 }
 0x4d4   :  { %3904 = vst [vmem:[#allocation3] sm:$0x3] %v3901_v45 }
 0x4d5   :  { %4354 = shalt.err (!%p4351_p4)
}
 0x4d6   :  { %s4355_s18 = scalar_lea.hbm %s6545_s7, 32 }
 0x4d7   :  { %p4356_p5 = scmp.ne.s32.totalorder %s6545_s7, %s4355_s18  ;;  %p4359_p6 = scmp.lt.u32.totalorder %s4355_s18, %s6545_s7 }
 0x4d9   :  { %p4361_p7 = pnand %p4359_p6, %p4356_p5 }
 0x4db   :  { %4364 = shalt.err (!%p4361_p7)
}
 0x4dc   :  { %3914 = dma.vmem_to_hbm [thread:$0]  %s3912_s16, 32, %s6545_s7, [#allocation4]  }
 0x4dd   :  { %4365 = dma.done.wait [#allocation4], 32  }
 0x4de   :  { %4366 = vsyncadd [#allocation4], 4294967264 }
 0x4df   :  { %3918 = vsyncpa [#allocation4], 1 }

</bundles_post_ra>
